<compile_context>
chip_gen: v6e
topology: v6e:2x2x1
jax: 0.10.0
libtpu: 0.0.40
codegen_flags: <defaults>
</compile_context>

<pallas_src>
import jax
import jax.numpy as jnp
import numpy as np
from jax import lax
from jax.experimental import pallas as pl
from jax.experimental.pallas import tpu as pltpu

# Small, forward-consistent sizes (module defaults are 512/512/512/256).
VOCAB = 32   # vocab_size
EMB = 16     # embedding_dim
FEAT = 16    # feature_dim
MEM = 16     # memdim (LSTM hidden size)
HID = 16     # attention hidden


def captioning_kernel(g1pre_ref, feat_ref, feath_ref,
                      whh1_ref, watt2_ref, wa_ref,
                      wih2v_ref, wih2h_ref, whh2_ref, b2_ref,
                      wword_ref, bword_ref,
                      y_ref):
    T, B, four_m = g1pre_ref.shape
    M = four_m // 4

    # Time-invariant operands: load once for the whole recurrence.
    feat = feat_ref[...]          # (R, F)
    feat_h = feath_ref[...]       # (R, H)  = att1(feature), precomputed
    whh1 = whh1_ref[...]          # (M, 4M)
    watt2 = watt2_ref[...]        # (M, H)
    wa = wa_ref[...]              # (1, H)
    wih2_v = wih2v_ref[...]       # (F, 4M)
    wih2_h = wih2h_ref[...]       # (M, 4M)
    whh2 = whh2_ref[...]          # (M, 4M)
    b2 = b2_ref[...]              # (1, 4M)
    wword = wword_ref[...]        # (M, V)
    bword = bword_ref[...]        # (1, V)

    def lstm_update(g, c):
        # PyTorch gate order i, f, g, o.  At toy M=16 these lane slices are
        # sub-vreg; at production M (multiple of 128) they are lane-aligned.
        i = jax.nn.sigmoid(g[:, 0 * M:1 * M])
        f = jax.nn.sigmoid(g[:, 1 * M:2 * M])
        gg = jnp.tanh(g[:, 2 * M:3 * M])
        o = jax.nn.sigmoid(g[:, 3 * M:4 * M])
        c_new = f * c + i * gg
        h_new = o * jnp.tanh(c_new)
        return h_new, c_new

    def step(t, carry):
        h1, c1, h2, c2 = carry

        # ---- topdown LSTM: input projection precomputed; only h @ Whh left.
        g1 = g1pre_ref[t] + jnp.dot(h1, whh1,
                                    preferred_element_type=jnp.float32)
        h1, c1 = lstm_update(g1, c1)

        # ---- additive attention over R regions
        att2h = jnp.dot(h1, watt2, preferred_element_type=jnp.float32)   # (B,H)
        out = jnp.tanh(feat_h[None, :, :] + att2h[:, None, :])           # (B,R,H)
        a_t = jnp.sum(out * wa[None, :, :], axis=-1)                     # (B,R)
        a_t = a_t - jnp.max(a_t, axis=-1, keepdims=True)
        e = jnp.exp(a_t)
        alpha = e * pl.reciprocal(jnp.sum(e, axis=-1, keepdims=True),
                                  approx=True)                           # (B,R)
        v_hat = jnp.dot(alpha, feat, preferred_element_type=jnp.float32) # (B,F)

        # ---- language LSTM: concat-free (split input weight -> two dots)
        g2 = (jnp.dot(v_hat, wih2_v, preferred_element_type=jnp.float32)
              + jnp.dot(h1, wih2_h, preferred_element_type=jnp.float32)
              + jnp.dot(h2, whh2, preferred_element_type=jnp.float32)
              + b2)
        h2, c2 = lstm_update(g2, c2)

        # ---- word projection + softmax; write into the resident (T,B,V)
        #      output block (one HBM writeback after the loop).
        logits = (jnp.dot(h2, wword, preferred_element_type=jnp.float32)
                  + bword)
        logits = logits - jnp.max(logits, axis=-1, keepdims=True)
        ex = jnp.exp(logits)
        y_ref[t] = ex * pl.reciprocal(jnp.sum(ex, axis=-1, keepdims=True),
                                      approx=True)
        return (h1, c1, h2, c2)

    z = jnp.zeros((B, M), jnp.float32)
    lax.fori_loop(0, T, step, (z, z, z, z), unroll=(T <= 16))


def captioning_forward(params, feature, sequence):
    B, T = sequence.shape
    R, F = feature.shape
    E = params['embed'].shape[1]
    M = params['whh1_T'].shape[0]
    H = params['watt1_T'].shape[1]
    V = params['wword_T'].shape[1]

    feature = feature.astype(jnp.float32)

    # ---- XLA-side glue / hoisted recurrence-independent work --------------
    wordft = jnp.take(params['embed'], sequence, axis=0)            # (B,T,E)
    avgf = jnp.mean(feature, axis=0)                                # (F,)
    # Fold the time/batch-invariant mean-feature term into the topdown bias
    # and precompute the full topdown input projection for every step.
    b1_eff = params['b1'] + avgf[None, :] @ params['wih1_T'][E:, :]  # (1,4M)
    g1_pre = (jnp.einsum('bte,eg->tbg', wordft, params['wih1_T'][:E, :])
              + b1_eff).astype(jnp.float32)                          # (T,B,4M)
    feat_h = feature @ params['watt1_T']                             # (R,H)
    wih2_v = params['wih2_T'][:F, :]                                 # (F,4M)
    wih2_h = params['wih2_T'][F:, :]                                 # (M,4M)

    def full(shape):
        n = len(shape)
        return pl.BlockSpec(shape, lambda i, _n=n: (0,) * _n)

    grid_spec = pltpu.PrefetchScalarGridSpec(
        num_scalar_prefetch=0,
        grid=(1,),   # single grid point: whole recurrence runs in-kernel
        in_specs=[
            full((T, B, 4 * M)),     # g1_pre (topdown gate pre-activations)
            full((R, F)),            # feature
            full((R, H)),            # att1(feature)
            full((M, 4 * M)),        # whh1
            full((M, H)),            # watt2
            full((1, H)),            # w_a
            full((F, 4 * M)),        # wih2 (v_hat half)
            full((M, 4 * M)),        # wih2 (h1 half)
            full((M, 4 * M)),        # whh2
            full((1, 4 * M)),        # b2
            full((M, V)),            # word weight
            full((1, V)),            # word bias
        ],
        out_specs=full((T, B, V)),
    )
    # TODO(synk): at production sizes (M=512, large vocab) cast weights to
    # bf16, mark them pl.Buffered(1), and tile the vocab projection to fit
    # v7x's 64 MiB VMEM; unnecessary at these toy shapes.
    return pl.pallas_call(
        captioning_kernel,
        out_shape=jax.ShapeDtypeStruct((T, B, V), jnp.float32),
        grid_spec=grid_spec,
        compiler_params=pltpu.CompilerParams(
            dimension_semantics=("arbitrary",)),
    )(g1_pre, feature, feat_h,
      params['whh1_T'], params['watt2_T'], params['wa'],
      wih2_v, wih2_h, params['whh2_T'], params['b2'],
      params['wword_T'], params['bword'])


def reference_forward(params, feature, sequence):
    """Pure-JAX reference mirroring the PyTorch forward."""
    B, T = sequence.shape
    R, F = feature.shape
    M = params['whh1_T'].shape[0]

    wordft = jnp.take(params['embed'], sequence, axis=0)
    avgf = jnp.mean(feature, axis=0)
    x1 = jnp.concatenate(
        [wordft, jnp.broadcast_to(avgf, (B, T, F))], axis=-1)
    x1 = jnp.transpose(x1, (1, 0, 2))                             # (T, B, E+F)

    def make_step(wih_T, whh_T, b):
        def step(carry, x):
            h, c = carry
            g = x @ wih_T + h @ whh_T + b
            i = jax.nn.sigmoid(g[:, :M])
            f = jax.nn.sigmoid(g[:, M:2 * M])
            gg = jnp.tanh(g[:, 2 * M:3 * M])
            o = jax.nn.sigmoid(g[:, 3 * M:])
            c = f * c + i * gg
            h = o * jnp.tanh(c)
            return (h, c), h
        return step

    zeros = (jnp.zeros((B, M), jnp.float32), jnp.zeros((B, M), jnp.float32))
    _, h1 = lax.scan(make_step(params['wih1_T'], params['whh1_T'],
                               params['b1']), zeros, x1)          # (T, B, M)
    feat_h = feature @ params['watt1_T']                          # (R, H)
    att2h = h1 @ params['watt2_T']                                # (T, B, H)
    out = jnp.tanh(feat_h[None, None, :, :] + att2h[:, :, None, :])
    a = jnp.sum(out * params['wa'][None, None, :, :], axis=-1)    # (T, B, R)
    alpha = jax.nn.softmax(a, axis=-1)
    v_hat = jnp.einsum('tbr,rf->tbf', alpha, feature)             # (T, B, F)
    x2 = jnp.concatenate([v_hat, h1], axis=-1)
    _, h2 = lax.scan(make_step(params['wih2_T'], params['whh2_T'],
                               params['b2']), zeros, x2)
    logits = h2 @ params['wword_T'] + params['bword']
    return jax.nn.softmax(logits, axis=-1)


if __name__ == "__main__":
    B, T, R = 2, 8, 4
    key = jax.random.PRNGKey(0)
    keys = jax.random.split(key, 16)
    s = 0.1
    params = {
        'embed':   s * jax.random.normal(keys[0], (VOCAB, EMB), jnp.float32),
        'wih1_T':  s * jax.random.normal(keys[1], (EMB + FEAT, 4 * MEM), jnp.float32),
        'whh1_T':  s * jax.random.normal(keys[2], (MEM, 4 * MEM), jnp.float32),
        'b1':      s * jax.random.normal(keys[3], (1, 4 * MEM), jnp.float32),
        'watt1_T': s * jax.random.normal(keys[4], (FEAT, HID), jnp.float32),
        'watt2_T': s * jax.random.normal(keys[5], (MEM, HID), jnp.float32),
        'wa':      s * jax.random.normal(keys[6], (1, HID), jnp.float32),
        'wih2_T':  s * jax.random.normal(keys[7], (FEAT + MEM, 4 * MEM), jnp.float32),
        'whh2_T':  s * jax.random.normal(keys[8], (MEM, 4 * MEM), jnp.float32),
        'b2':      s * jax.random.normal(keys[9], (1, 4 * MEM), jnp.float32),
        'wword_T': s * jax.random.normal(keys[10], (MEM, VOCAB), jnp.float32),
        'bword':   s * jax.random.normal(keys[11], (1, VOCAB), jnp.float32),
    }
    feature = jax.random.normal(keys[12], (R, FEAT), jnp.float32)
    sequence = jax.random.randint(keys[13], (B, T), 0, VOCAB)

    y = jax.block_until_ready(captioning_forward(params, feature, sequence))
    y_ref = jax.block_until_ready(reference_forward(params, feature, sequence))

    assert y.shape == (T, B, VOCAB)
    # Tolerance accounts for pl.reciprocal(approx=True) in the two softmaxes
    # (EUP approximate reciprocal, ~2^-12 relative error).
    np.testing.assert_allclose(np.asarray(y), np.asarray(y_ref),
                               rtol=2e-3, atol=2e-3)
    print("KERNEL_OK")
</pallas_src>

<mosaic_0001>
module attributes {stable_mosaic.version = 11 : i64} {
  func.func @captioning_kernel(%arg0: i32, %arg1: memref<8x2x64xf32, #tpu.memory_space<vmem>>, %arg2: memref<4x16xf32, #tpu.memory_space<vmem>>, %arg3: memref<4x16xf32, #tpu.memory_space<vmem>>, %arg4: memref<16x64xf32, #tpu.memory_space<vmem>>, %arg5: memref<16x16xf32, #tpu.memory_space<vmem>>, %arg6: memref<1x16xf32, #tpu.memory_space<vmem>>, %arg7: memref<16x64xf32, #tpu.memory_space<vmem>>, %arg8: memref<16x64xf32, #tpu.memory_space<vmem>>, %arg9: memref<16x64xf32, #tpu.memory_space<vmem>>, %arg10: memref<1x64xf32, #tpu.memory_space<vmem>>, %arg11: memref<16x32xf32, #tpu.memory_space<vmem>>, %arg12: memref<1x32xf32, #tpu.memory_space<vmem>>, %arg13: memref<8x2x32xf32, #tpu.memory_space<vmem>>) attributes {dimension_semantics = [#tpu.dimension_semantics<arbitrary>], iteration_bounds = array<i64: 1>, scalar_prefetch = 0 : i64, scratch_operands = 0 : i64, tpu.core_type = #tpu.core_type<tc>, window_params = [{pipeline_mode = #tpu.pipeline_mode<synchronous>, transform_indices = @transform_0, window_bounds = array<i64: 8, 2, 64>}, {pipeline_mode = #tpu.pipeline_mode<synchronous>, transform_indices = @transform_1, window_bounds = array<i64: 4, 16>}, {pipeline_mode = #tpu.pipeline_mode<synchronous>, transform_indices = @transform_2, window_bounds = array<i64: 4, 16>}, {pipeline_mode = #tpu.pipeline_mode<synchronous>, transform_indices = @transform_3, window_bounds = array<i64: 16, 64>}, {pipeline_mode = #tpu.pipeline_mode<synchronous>, transform_indices = @transform_4, window_bounds = array<i64: 16, 16>}, {pipeline_mode = #tpu.pipeline_mode<synchronous>, transform_indices = @transform_5, window_bounds = array<i64: 1, 16>}, {pipeline_mode = #tpu.pipeline_mode<synchronous>, transform_indices = @transform_6, window_bounds = array<i64: 16, 64>}, {pipeline_mode = #tpu.pipeline_mode<synchronous>, transform_indices = @transform_7, window_bounds = array<i64: 16, 64>}, {pipeline_mode = #tpu.pipeline_mode<synchronous>, transform_indices = @transform_8, window_bounds = array<i64: 16, 64>}, {pipeline_mode = #tpu.pipeline_mode<synchronous>, transform_indices = @transform_9, window_bounds = array<i64: 1, 64>}, {pipeline_mode = #tpu.pipeline_mode<synchronous>, transform_indices = @transform_10, window_bounds = array<i64: 16, 32>}, {pipeline_mode = #tpu.pipeline_mode<synchronous>, transform_indices = @transform_11, window_bounds = array<i64: 1, 32>}, {pipeline_mode = #tpu.pipeline_mode<synchronous>, transform_indices = @transform_12, window_bounds = array<i64: 8, 2, 32>}]} {
    %c0 = arith.constant 0 : index
    %c0_0 = arith.constant 0 : index
    %0 = vector.load %arg2[%c0, %c0_0] : memref<4x16xf32, #tpu.memory_space<vmem>>, vector<4x16xf32>
    %c0_1 = arith.constant 0 : index
    %c0_2 = arith.constant 0 : index
    %1 = vector.load %arg3[%c0_1, %c0_2] : memref<4x16xf32, #tpu.memory_space<vmem>>, vector<4x16xf32>
    %c0_3 = arith.constant 0 : index
    %c0_4 = arith.constant 0 : index
    %2 = vector.load %arg4[%c0_3, %c0_4] : memref<16x64xf32, #tpu.memory_space<vmem>>, vector<16x64xf32>
    %c0_5 = arith.constant 0 : index
    %c0_6 = arith.constant 0 : index
    %3 = vector.load %arg5[%c0_5, %c0_6] : memref<16x16xf32, #tpu.memory_space<vmem>>, vector<16x16xf32>
    %c0_7 = arith.constant 0 : index
    %c0_8 = arith.constant 0 : index
    %4 = vector.load %arg6[%c0_7, %c0_8] : memref<1x16xf32, #tpu.memory_space<vmem>>, vector<1x16xf32>
    %c0_9 = arith.constant 0 : index
    %c0_10 = arith.constant 0 : index
    %5 = vector.load %arg7[%c0_9, %c0_10] : memref<16x64xf32, #tpu.memory_space<vmem>>, vector<16x64xf32>
    %c0_11 = arith.constant 0 : index
    %c0_12 = arith.constant 0 : index
    %6 = vector.load %arg8[%c0_11, %c0_12] : memref<16x64xf32, #tpu.memory_space<vmem>>, vector<16x64xf32>
    %c0_13 = arith.constant 0 : index
    %c0_14 = arith.constant 0 : index
    %7 = vector.load %arg9[%c0_13, %c0_14] : memref<16x64xf32, #tpu.memory_space<vmem>>, vector<16x64xf32>
    %c0_15 = arith.constant 0 : index
    %c0_16 = arith.constant 0 : index
    %8 = vector.load %arg10[%c0_15, %c0_16] : memref<1x64xf32, #tpu.memory_space<vmem>>, vector<1x64xf32>
    %c0_17 = arith.constant 0 : index
    %c0_18 = arith.constant 0 : index
    %9 = vector.load %arg11[%c0_17, %c0_18] : memref<16x32xf32, #tpu.memory_space<vmem>>, vector<16x32xf32>
    %c0_19 = arith.constant 0 : index
    %c0_20 = arith.constant 0 : index
    %10 = vector.load %arg12[%c0_19, %c0_20] : memref<1x32xf32, #tpu.memory_space<vmem>>, vector<1x32xf32>
    %cst = arith.constant 0.000000e+00 : f32
    %11 = vector.broadcast %cst : f32 to vector<2x16xf32>
    %c0_i32 = arith.constant 0 : i32
    %12 = arith.index_cast %c0_i32 : i32 to index
    %c0_21 = arith.constant 0 : index
    %c0_22 = arith.constant 0 : index
    %13 = vector.load %arg1[%12, %c0_21, %c0_22] : memref<8x2x64xf32, #tpu.memory_space<vmem>>, vector<1x2x64xf32>
    %14 = vector.shape_cast %13 : vector<1x2x64xf32> to vector<2x64xf32>
    %cst_23 = arith.constant dense<0.000000e+00> : vector<2x64xf32>
    %15 = tpu.matmul %11, %2, %cst_23 {dimension_numbers = #tpu.dot_dimension_numbers<[1], [0], [0], [1], [0, 0, 1, 1], [], []>} : vector<2x16xf32>, vector<16x64xf32>, vector<2x64xf32> -> vector<2x64xf32>
    %16 = arith.addf %14, %15 : vector<2x64xf32>
    %17 = vector.extract_strided_slice %16 {offsets = [0, 0], sizes = [2, 16], strides = [1, 1]} : vector<2x64xf32> to vector<2x16xf32>
    %18 = arith.negf %17 : vector<2x16xf32>
    %19 = math.exp %18 : vector<2x16xf32>
    %cst_24 = arith.constant 1.000000e+00 : f32
    %20 = vector.broadcast %cst_24 : f32 to vector<2x16xf32>
    %21 = arith.addf %20, %19 : vector<2x16xf32>
    %22 = arith.divf %20, %21 : vector<2x16xf32>
    %23 = vector.extract_strided_slice %16 {offsets = [0, 16], sizes = [2, 16], strides = [1, 1]} : vector<2x64xf32> to vector<2x16xf32>
    %24 = arith.negf %23 : vector<2x16xf32>
    %25 = math.exp %24 : vector<2x16xf32>
    %cst_25 = arith.constant 1.000000e+00 : f32
    %26 = vector.broadcast %cst_25 : f32 to vector<2x16xf32>
    %27 = arith.addf %26, %25 : vector<2x16xf32>
    %28 = arith.divf %26, %27 : vector<2x16xf32>
    %29 = vector.extract_strided_slice %16 {offsets = [0, 32], sizes = [2, 16], strides = [1, 1]} : vector<2x64xf32> to vector<2x16xf32>
    %30 = math.tanh %29 : vector<2x16xf32>
    %31 = vector.extract_strided_slice %16 {offsets = [0, 48], sizes = [2, 16], strides = [1, 1]} : vector<2x64xf32> to vector<2x16xf32>
    %32 = arith.negf %31 : vector<2x16xf32>
    %33 = math.exp %32 : vector<2x16xf32>
    %cst_26 = arith.constant 1.000000e+00 : f32
    %34 = vector.broadcast %cst_26 : f32 to vector<2x16xf32>
    %35 = arith.addf %34, %33 : vector<2x16xf32>
    %36 = arith.divf %34, %35 : vector<2x16xf32>
    %37 = arith.mulf %28, %11 : vector<2x16xf32>
    %38 = arith.mulf %22, %30 : vector<2x16xf32>
    %39 = arith.addf %37, %38 : vector<2x16xf32>
    %40 = math.tanh %39 : vector<2x16xf32>
    %41 = arith.mulf %36, %40 : vector<2x16xf32>
    %cst_27 = arith.constant dense<0.000000e+00> : vector<2x16xf32>
    %42 = tpu.matmul %41, %3, %cst_27 {dimension_numbers = #tpu.dot_dimension_numbers<[1], [0], [0], [1], [0, 0, 1, 1], [], []>} : vector<2x16xf32>, vector<16x16xf32>, vector<2x16xf32> -> vector<2x16xf32>
    %43 = vector.shape_cast %1 : vector<4x16xf32> to vector<1x4x16xf32>
    %44 = vector.shape_cast %42 : vector<2x16xf32> to vector<2x1x16xf32>
    %45 = vector.broadcast %43 : vector<1x4x16xf32> to vector<2x4x16xf32>
    %46 = vector.broadcast %44 : vector<2x1x16xf32> to vector<2x4x16xf32>
    %47 = arith.addf %45, %46 : vector<2x4x16xf32>
    %48 = math.tanh %47 : vector<2x4x16xf32>
    %49 = vector.shape_cast %4 : vector<1x16xf32> to vector<1x1x16xf32>
    %50 = vector.broadcast %49 : vector<1x1x16xf32> to vector<2x4x16xf32>
    %51 = arith.mulf %48, %50 : vector<2x4x16xf32>
    %cst_28 = arith.constant dense<0.000000e+00> : vector<2x4xf32>
    %52 = vector.multi_reduction <add>, %51, %cst_28 [2] : vector<2x4x16xf32> to vector<2x4xf32>
    %cst_29 = arith.constant dense<0xFF800000> : vector<2xf32>
    %53 = vector.multi_reduction <maximumf>, %52, %cst_29 [1] : vector<2x4xf32> to vector<2xf32>
    %54 = vector.shape_cast %53 : vector<2xf32> to vector<2x1xf32>
    %55 = vector.broadcast %54 : vector<2x1xf32> to vector<2x4xf32>
    %56 = arith.subf %52, %55 : vector<2x4xf32>
    %57 = math.exp %56 : vector<2x4xf32>
    %cst_30 = arith.constant dense<0.000000e+00> : vector<2xf32>
    %58 = vector.multi_reduction <add>, %57, %cst_30 [1] : vector<2x4xf32> to vector<2xf32>
    %59 = vector.shape_cast %58 : vector<2xf32> to vector<2x1xf32>
    %60 = tpu.reciprocal %59 {approx = true} : vector<2x1xf32> -> vector<2x1xf32>
    %61 = vector.broadcast %60 : vector<2x1xf32> to vector<2x4xf32>
    %62 = arith.mulf %57, %61 : vector<2x4xf32>
    %cst_31 = arith.constant dense<0.000000e+00> : vector<2x16xf32>
    %63 = tpu.matmul %62, %0, %cst_31 {dimension_numbers = #tpu.dot_dimension_numbers<[1], [0], [0], [1], [0, 0, 1, 1], [], []>} : vector<2x4xf32>, vector<4x16xf32>, vector<2x16xf32> -> vector<2x16xf32>
    %cst_32 = arith.constant dense<0.000000e+00> : vector<2x64xf32>
    %64 = tpu.matmul %63, %5, %cst_32 {dimension_numbers = #tpu.dot_dimension_numbers<[1], [0], [0], [1], [0, 0, 1, 1], [], []>} : vector<2x16xf32>, vector<16x64xf32>, vector<2x64xf32> -> vector<2x64xf32>
    %cst_33 = arith.constant dense<0.000000e+00> : vector<2x64xf32>
    %65 = tpu.matmul %41, %6, %cst_33 {dimension_numbers = #tpu.dot_dimension_numbers<[1], [0], [0], [1], [0, 0, 1, 1], [], []>} : vector<2x16xf32>, vector<16x64xf32>, vector<2x64xf32> -> vector<2x64xf32>
    %66 = arith.addf %64, %65 : vector<2x64xf32>
    %cst_34 = arith.constant dense<0.000000e+00> : vector<2x64xf32>
    %67 = tpu.matmul %11, %7, %cst_34 {dimension_numbers = #tpu.dot_dimension_numbers<[1], [0], [0], [1], [0, 0, 1, 1], [], []>} : vector<2x16xf32>, vector<16x64xf32>, vector<2x64xf32> -> vector<2x64xf32>
    %68 = arith.addf %66, %67 : vector<2x64xf32>
    %69 = vector.broadcast %8 : vector<1x64xf32> to vector<2x64xf32>
    %70 = arith.addf %68, %69 : vector<2x64xf32>
    %71 = vector.extract_strided_slice %70 {offsets = [0, 0], sizes = [2, 16], strides = [1, 1]} : vector<2x64xf32> to vector<2x16xf32>
    %72 = arith.negf %71 : vector<2x16xf32>
    %73 = math.exp %72 : vector<2x16xf32>
    %cst_35 = arith.constant 1.000000e+00 : f32
    %74 = vector.broadcast %cst_35 : f32 to vector<2x16xf32>
    %75 = arith.addf %74, %73 : vector<2x16xf32>
    %76 = arith.divf %74, %75 : vector<2x16xf32>
    %77 = vector.extract_strided_slice %70 {offsets = [0, 16], sizes = [2, 16], strides = [1, 1]} : vector<2x64xf32> to vector<2x16xf32>
    %78 = arith.negf %77 : vector<2x16xf32>
    %79 = math.exp %78 : vector<2x16xf32>
    %cst_36 = arith.constant 1.000000e+00 : f32
    %80 = vector.broadcast %cst_36 : f32 to vector<2x16xf32>
    %81 = arith.addf %80, %79 : vector<2x16xf32>
    %82 = arith.divf %80, %81 : vector<2x16xf32>
    %83 = vector.extract_strided_slice %70 {offsets = [0, 32], sizes = [2, 16], strides = [1, 1]} : vector<2x64xf32> to vector<2x16xf32>
    %84 = math.tanh %83 : vector<2x16xf32>
    %85 = vector.extract_strided_slice %70 {offsets = [0, 48], sizes = [2, 16], strides = [1, 1]} : vector<2x64xf32> to vector<2x16xf32>
    %86 = arith.negf %85 : vector<2x16xf32>
    %87 = math.exp %86 : vector<2x16xf32>
    %cst_37 = arith.constant 1.000000e+00 : f32
    %88 = vector.broadcast %cst_37 : f32 to vector<2x16xf32>
    %89 = arith.addf %88, %87 : vector<2x16xf32>
    %90 = arith.divf %88, %89 : vector<2x16xf32>
    %91 = arith.mulf %82, %11 : vector<2x16xf32>
    %92 = arith.mulf %76, %84 : vector<2x16xf32>
    %93 = arith.addf %91, %92 : vector<2x16xf32>
    %94 = math.tanh %93 : vector<2x16xf32>
    %95 = arith.mulf %90, %94 : vector<2x16xf32>
    %cst_38 = arith.constant dense<0.000000e+00> : vector<2x32xf32>
    %96 = tpu.matmul %95, %9, %cst_38 {dimension_numbers = #tpu.dot_dimension_numbers<[1], [0], [0], [1], [0, 0, 1, 1], [], []>} : vector<2x16xf32>, vector<16x32xf32>, vector<2x32xf32> -> vector<2x32xf32>
    %97 = vector.broadcast %10 : vector<1x32xf32> to vector<2x32xf32>
    %98 = arith.addf %96, %97 : vector<2x32xf32>
    %cst_39 = arith.constant dense<0xFF800000> : vector<2xf32>
    %99 = vector.multi_reduction <maximumf>, %98, %cst_39 [1] : vector<2x32xf32> to vector<2xf32>
    %100 = vector.shape_cast %99 : vector<2xf32> to vector<2x1xf32>
    %101 = vector.broadcast %100 : vector<2x1xf32> to vector<2x32xf32>
    %102 = arith.subf %98, %101 : vector<2x32xf32>
    %103 = math.exp %102 : vector<2x32xf32>
    %cst_40 = arith.constant dense<0.000000e+00> : vector<2xf32>
    %104 = vector.multi_reduction <add>, %103, %cst_40 [1] : vector<2x32xf32> to vector<2xf32>
    %105 = vector.shape_cast %104 : vector<2xf32> to vector<2x1xf32>
    %106 = tpu.reciprocal %105 {approx = true} : vector<2x1xf32> -> vector<2x1xf32>
    %107 = vector.broadcast %106 : vector<2x1xf32> to vector<2x32xf32>
    %108 = arith.mulf %103, %107 : vector<2x32xf32>
    %109 = arith.index_cast %c0_i32 : i32 to index
    %c0_41 = arith.constant 0 : index
    %c0_42 = arith.constant 0 : index
    %110 = vector.load %arg13[%109, %c0_41, %c0_42] : memref<8x2x32xf32, #tpu.memory_space<vmem>>, vector<1x2x32xf32>
    %111 = vector.shape_cast %110 : vector<1x2x32xf32> to vector<2x32xf32>
    %112 = vector.shape_cast %108 : vector<2x32xf32> to vector<1x2x32xf32>
    tpu.vector_store %arg13[%109, %c0_41, %c0_42], %112 {strides = array<i32>} : memref<8x2x32xf32, #tpu.memory_space<vmem>>, vector<1x2x32xf32>,
    %c1_i32 = arith.constant 1 : i32
    %113 = arith.index_cast %c1_i32 : i32 to index
    %c0_43 = arith.constant 0 : index
    %c0_44 = arith.constant 0 : index
    %114 = vector.load %arg1[%113, %c0_43, %c0_44] : memref<8x2x64xf32, #tpu.memory_space<vmem>>, vector<1x2x64xf32>
    %115 = vector.shape_cast %114 : vector<1x2x64xf32> to vector<2x64xf32>
    %cst_45 = arith.constant dense<0.000000e+00> : vector<2x64xf32>
    %116 = tpu.matmul %41, %2, %cst_45 {dimension_numbers = #tpu.dot_dimension_numbers<[1], [0], [0], [1], [0, 0, 1, 1], [], []>} : vector<2x16xf32>, vector<16x64xf32>, vector<2x64xf32> -> vector<2x64xf32>
    %117 = arith.addf %115, %116 : vector<2x64xf32>
    %118 = vector.extract_strided_slice %117 {offsets = [0, 0], sizes = [2, 16], strides = [1, 1]} : vector<2x64xf32> to vector<2x16xf32>
    %119 = arith.negf %118 : vector<2x16xf32>
    %120 = math.exp %119 : vector<2x16xf32>
    %cst_46 = arith.constant 1.000000e+00 : f32
    %121 = vector.broadcast %cst_46 : f32 to vector<2x16xf32>
    %122 = arith.addf %121, %120 : vector<2x16xf32>
    %123 = arith.divf %121, %122 : vector<2x16xf32>
    %124 = vector.extract_strided_slice %117 {offsets = [0, 16], sizes = [2, 16], strides = [1, 1]} : vector<2x64xf32> to vector<2x16xf32>
    %125 = arith.negf %124 : vector<2x16xf32>
    %126 = math.exp %125 : vector<2x16xf32>
    %cst_47 = arith.constant 1.000000e+00 : f32
    %127 = vector.broadcast %cst_47 : f32 to vector<2x16xf32>
    %128 = arith.addf %127, %126 : vector<2x16xf32>
    %129 = arith.divf %127, %128 : vector<2x16xf32>
    %130 = vector.extract_strided_slice %117 {offsets = [0, 32], sizes = [2, 16], strides = [1, 1]} : vector<2x64xf32> to vector<2x16xf32>
    %131 = math.tanh %130 : vector<2x16xf32>
    %132 = vector.extract_strided_slice %117 {offsets = [0, 48], sizes = [2, 16], strides = [1, 1]} : vector<2x64xf32> to vector<2x16xf32>
    %133 = arith.negf %132 : vector<2x16xf32>
    %134 = math.exp %133 : vector<2x16xf32>
    %cst_48 = arith.constant 1.000000e+00 : f32
    %135 = vector.broadcast %cst_48 : f32 to vector<2x16xf32>
    %136 = arith.addf %135, %134 : vector<2x16xf32>
    %137 = arith.divf %135, %136 : vector<2x16xf32>
    %138 = arith.mulf %129, %39 : vector<2x16xf32>
    %139 = arith.mulf %123, %131 : vector<2x16xf32>
    %140 = arith.addf %138, %139 : vector<2x16xf32>
    %141 = math.tanh %140 : vector<2x16xf32>
    %142 = arith.mulf %137, %141 : vector<2x16xf32>
    %cst_49 = arith.constant dense<0.000000e+00> : vector<2x16xf32>
    %143 = tpu.matmul %142, %3, %cst_49 {dimension_numbers = #tpu.dot_dimension_numbers<[1], [0], [0], [1], [0, 0, 1, 1], [], []>} : vector<2x16xf32>, vector<16x16xf32>, vector<2x16xf32> -> vector<2x16xf32>
    %144 = vector.shape_cast %1 : vector<4x16xf32> to vector<1x4x16xf32>
    %145 = vector.shape_cast %143 : vector<2x16xf32> to vector<2x1x16xf32>
    %146 = vector.broadcast %144 : vector<1x4x16xf32> to vector<2x4x16xf32>
    %147 = vector.broadcast %145 : vector<2x1x16xf32> to vector<2x4x16xf32>
    %148 = arith.addf %146, %147 : vector<2x4x16xf32>
    %149 = math.tanh %148 : vector<2x4x16xf32>
    %150 = vector.shape_cast %4 : vector<1x16xf32> to vector<1x1x16xf32>
    %151 = vector.broadcast %150 : vector<1x1x16xf32> to vector<2x4x16xf32>
    %152 = arith.mulf %149, %151 : vector<2x4x16xf32>
    %cst_50 = arith.constant dense<0.000000e+00> : vector<2x4xf32>
    %153 = vector.multi_reduction <add>, %152, %cst_50 [2] : vector<2x4x16xf32> to vector<2x4xf32>
    %cst_51 = arith.constant dense<0xFF800000> : vector<2xf32>
    %154 = vector.multi_reduction <maximumf>, %153, %cst_51 [1] : vector<2x4xf32> to vector<2xf32>
    %155 = vector.shape_cast %154 : vector<2xf32> to vector<2x1xf32>
    %156 = vector.broadcast %155 : vector<2x1xf32> to vector<2x4xf32>
    %157 = arith.subf %153, %156 : vector<2x4xf32>
    %158 = math.exp %157 : vector<2x4xf32>
    %cst_52 = arith.constant dense<0.000000e+00> : vector<2xf32>
    %159 = vector.multi_reduction <add>, %158, %cst_52 [1] : vector<2x4xf32> to vector<2xf32>
    %160 = vector.shape_cast %159 : vector<2xf32> to vector<2x1xf32>
    %161 = tpu.reciprocal %160 {approx = true} : vector<2x1xf32> -> vector<2x1xf32>
    %162 = vector.broadcast %161 : vector<2x1xf32> to vector<2x4xf32>
    %163 = arith.mulf %158, %162 : vector<2x4xf32>
    %cst_53 = arith.constant dense<0.000000e+00> : vector<2x16xf32>
    %164 = tpu.matmul %163, %0, %cst_53 {dimension_numbers = #tpu.dot_dimension_numbers<[1], [0], [0], [1], [0, 0, 1, 1], [], []>} : vector<2x4xf32>, vector<4x16xf32>, vector<2x16xf32> -> vector<2x16xf32>
    %cst_54 = arith.constant dense<0.000000e+00> : vector<2x64xf32>
    %165 = tpu.matmul %164, %5, %cst_54 {dimension_numbers = #tpu.dot_dimension_numbers<[1], [0], [0], [1], [0, 0, 1, 1], [], []>} : vector<2x16xf32>, vector<16x64xf32>, vector<2x64xf32> -> vector<2x64xf32>
    %cst_55 = arith.constant dense<0.000000e+00> : vector<2x64xf32>
    %166 = tpu.matmul %142, %6, %cst_55 {dimension_numbers = #tpu.dot_dimension_numbers<[1], [0], [0], [1], [0, 0, 1, 1], [], []>} : vector<2x16xf32>, vector<16x64xf32>, vector<2x64xf32> -> vector<2x64xf32>
    %167 = arith.addf %165, %166 : vector<2x64xf32>
    %cst_56 = arith.constant dense<0.000000e+00> : vector<2x64xf32>
    %168 = tpu.matmul %95, %7, %cst_56 {dimension_numbers = #tpu.dot_dimension_numbers<[1], [0], [0], [1], [0, 0, 1, 1], [], []>} : vector<2x16xf32>, vector<16x64xf32>, vector<2x64xf32> -> vector<2x64xf32>
    %169 = arith.addf %167, %168 : vector<2x64xf32>
    %170 = vector.broadcast %8 : vector<1x64xf32> to vector<2x64xf32>
    %171 = arith.addf %169, %170 : vector<2x64xf32>
    %172 = vector.extract_strided_slice %171 {offsets = [0, 0], sizes = [2, 16], strides = [1, 1]} : vector<2x64xf32> to vector<2x16xf32>
    %173 = arith.negf %172 : vector<2x16xf32>
    %174 = math.exp %173 : vector<2x16xf32>
    %cst_57 = arith.constant 1.000000e+00 : f32
    %175 = vector.broadcast %cst_57 : f32 to vector<2x16xf32>
    %176 = arith.addf %175, %174 : vector<2x16xf32>
    %177 = arith.divf %175, %176 : vector<2x16xf32>
    %178 = vector.extract_strided_slice %171 {offsets = [0, 16], sizes = [2, 16], strides = [1, 1]} : vector<2x64xf32> to vector<2x16xf32>
    %179 = arith.negf %178 : vector<2x16xf32>
    %180 = math.exp %179 : vector<2x16xf32>
    %cst_58 = arith.constant 1.000000e+00 : f32
    %181 = vector.broadcast %cst_58 : f32 to vector<2x16xf32>
    %182 = arith.addf %181, %180 : vector<2x16xf32>
    %183 = arith.divf %181, %182 : vector<2x16xf32>
    %184 = vector.extract_strided_slice %171 {offsets = [0, 32], sizes = [2, 16], strides = [1, 1]} : vector<2x64xf32> to vector<2x16xf32>
    %185 = math.tanh %184 : vector<2x16xf32>
    %186 = vector.extract_strided_slice %171 {offsets = [0, 48], sizes = [2, 16], strides = [1, 1]} : vector<2x64xf32> to vector<2x16xf32>
    %187 = arith.negf %186 : vector<2x16xf32>
    %188 = math.exp %187 : vector<2x16xf32>
    %cst_59 = arith.constant 1.000000e+00 : f32
    %189 = vector.broadcast %cst_59 : f32 to vector<2x16xf32>
    %190 = arith.addf %189, %188 : vector<2x16xf32>
    %191 = arith.divf %189, %190 : vector<2x16xf32>
    %192 = arith.mulf %183, %93 : vector<2x16xf32>
    %193 = arith.mulf %177, %185 : vector<2x16xf32>
    %194 = arith.addf %192, %193 : vector<2x16xf32>
    %195 = math.tanh %194 : vector<2x16xf32>
    %196 = arith.mulf %191, %195 : vector<2x16xf32>
    %cst_60 = arith.constant dense<0.000000e+00> : vector<2x32xf32>
    %197 = tpu.matmul %196, %9, %cst_60 {dimension_numbers = #tpu.dot_dimension_numbers<[1], [0], [0], [1], [0, 0, 1, 1], [], []>} : vector<2x16xf32>, vector<16x32xf32>, vector<2x32xf32> -> vector<2x32xf32>
    %198 = vector.broadcast %10 : vector<1x32xf32> to vector<2x32xf32>
    %199 = arith.addf %197, %198 : vector<2x32xf32>
    %cst_61 = arith.constant dense<0xFF800000> : vector<2xf32>
    %200 = vector.multi_reduction <maximumf>, %199, %cst_61 [1] : vector<2x32xf32> to vector<2xf32>
    %201 = vector.shape_cast %200 : vector<2xf32> to vector<2x1xf32>
    %202 = vector.broadcast %201 : vector<2x1xf32> to vector<2x32xf32>
    %203 = arith.subf %199, %202 : vector<2x32xf32>
    %204 = math.exp %203 : vector<2x32xf32>
    %cst_62 = arith.constant dense<0.000000e+00> : vector<2xf32>
    %205 = vector.multi_reduction <add>, %204, %cst_62 [1] : vector<2x32xf32> to vector<2xf32>
    %206 = vector.shape_cast %205 : vector<2xf32> to vector<2x1xf32>
    %207 = tpu.reciprocal %206 {approx = true} : vector<2x1xf32> -> vector<2x1xf32>
    %208 = vector.broadcast %207 : vector<2x1xf32> to vector<2x32xf32>
    %209 = arith.mulf %204, %208 : vector<2x32xf32>
    %210 = arith.index_cast %c1_i32 : i32 to index
    %c0_63 = arith.constant 0 : index
    %c0_64 = arith.constant 0 : index
    %211 = vector.load %arg13[%210, %c0_63, %c0_64] : memref<8x2x32xf32, #tpu.memory_space<vmem>>, vector<1x2x32xf32>
    %212 = vector.shape_cast %211 : vector<1x2x32xf32> to vector<2x32xf32>
    %213 = vector.shape_cast %209 : vector<2x32xf32> to vector<1x2x32xf32>
    tpu.vector_store %arg13[%210, %c0_63, %c0_64], %213 {strides = array<i32>} : memref<8x2x32xf32, #tpu.memory_space<vmem>>, vector<1x2x32xf32>,
    %c2_i32 = arith.constant 2 : i32
    %214 = arith.index_cast %c2_i32 : i32 to index
    %c0_65 = arith.constant 0 : index
    %c0_66 = arith.constant 0 : index
    %215 = vector.load %arg1[%214, %c0_65, %c0_66] : memref<8x2x64xf32, #tpu.memory_space<vmem>>, vector<1x2x64xf32>
    %216 = vector.shape_cast %215 : vector<1x2x64xf32> to vector<2x64xf32>
    %cst_67 = arith.constant dense<0.000000e+00> : vector<2x64xf32>
    %217 = tpu.matmul %142, %2, %cst_67 {dimension_numbers = #tpu.dot_dimension_numbers<[1], [0], [0], [1], [0, 0, 1, 1], [], []>} : vector<2x16xf32>, vector<16x64xf32>, vector<2x64xf32> -> vector<2x64xf32>
    %218 = arith.addf %216, %217 : vector<2x64xf32>
    %219 = vector.extract_strided_slice %218 {offsets = [0, 0], sizes = [2, 16], strides = [1, 1]} : vector<2x64xf32> to vector<2x16xf32>
    %220 = arith.negf %219 : vector<2x16xf32>
    %221 = math.exp %220 : vector<2x16xf32>
    %cst_68 = arith.constant 1.000000e+00 : f32
    %222 = vector.broadcast %cst_68 : f32 to vector<2x16xf32>
    %223 = arith.addf %222, %221 : vector<2x16xf32>
    %224 = arith.divf %222, %223 : vector<2x16xf32>
    %225 = vector.extract_strided_slice %218 {offsets = [0, 16], sizes = [2, 16], strides = [1, 1]} : vector<2x64xf32> to vector<2x16xf32>
    %226 = arith.negf %225 : vector<2x16xf32>
    %227 = math.exp %226 : vector<2x16xf32>
    %cst_69 = arith.constant 1.000000e+00 : f32
    %228 = vector.broadcast %cst_69 : f32 to vector<2x16xf32>
    %229 = arith.addf %228, %227 : vector<2x16xf32>
    %230 = arith.divf %228, %229 : vector<2x16xf32>
    %231 = vector.extract_strided_slice %218 {offsets = [0, 32], sizes = [2, 16], strides = [1, 1]} : vector<2x64xf32> to vector<2x16xf32>
    %232 = math.tanh %231 : vector<2x16xf32>
    %233 = vector.extract_strided_slice %218 {offsets = [0, 48], sizes = [2, 16], strides = [1, 1]} : vector<2x64xf32> to vector<2x16xf32>
    %234 = arith.negf %233 : vector<2x16xf32>
    %235 = math.exp %234 : vector<2x16xf32>
    %cst_70 = arith.constant 1.000000e+00 : f32
    %236 = vector.broadcast %cst_70 : f32 to vector<2x16xf32>
    %237 = arith.addf %236, %235 : vector<2x16xf32>
    %238 = arith.divf %236, %237 : vector<2x16xf32>
    %239 = arith.mulf %230, %140 : vector<2x16xf32>
    %240 = arith.mulf %224, %232 : vector<2x16xf32>
    %241 = arith.addf %239, %240 : vector<2x16xf32>
    %242 = math.tanh %241 : vector<2x16xf32>
    %243 = arith.mulf %238, %242 : vector<2x16xf32>
    %cst_71 = arith.constant dense<0.000000e+00> : vector<2x16xf32>
    %244 = tpu.matmul %243, %3, %cst_71 {dimension_numbers = #tpu.dot_dimension_numbers<[1], [0], [0], [1], [0, 0, 1, 1], [], []>} : vector<2x16xf32>, vector<16x16xf32>, vector<2x16xf32> -> vector<2x16xf32>
    %245 = vector.shape_cast %1 : vector<4x16xf32> to vector<1x4x16xf32>
    %246 = vector.shape_cast %244 : vector<2x16xf32> to vector<2x1x16xf32>
    %247 = vector.broadcast %245 : vector<1x4x16xf32> to vector<2x4x16xf32>
    %248 = vector.broadcast %246 : vector<2x1x16xf32> to vector<2x4x16xf32>
    %249 = arith.addf %247, %248 : vector<2x4x16xf32>
    %250 = math.tanh %249 : vector<2x4x16xf32>
    %251 = vector.shape_cast %4 : vector<1x16xf32> to vector<1x1x16xf32>
    %252 = vector.broadcast %251 : vector<1x1x16xf32> to vector<2x4x16xf32>
    %253 = arith.mulf %250, %252 : vector<2x4x16xf32>
    %cst_72 = arith.constant dense<0.000000e+00> : vector<2x4xf32>
    %254 = vector.multi_reduction <add>, %253, %cst_72 [2] : vector<2x4x16xf32> to vector<2x4xf32>
    %cst_73 = arith.constant dense<0xFF800000> : vector<2xf32>
    %255 = vector.multi_reduction <maximumf>, %254, %cst_73 [1] : vector<2x4xf32> to vector<2xf32>
    %256 = vector.shape_cast %255 : vector<2xf32> to vector<2x1xf32>
    %257 = vector.broadcast %256 : vector<2x1xf32> to vector<2x4xf32>
    %258 = arith.subf %254, %257 : vector<2x4xf32>
    %259 = math.exp %258 : vector<2x4xf32>
    %cst_74 = arith.constant dense<0.000000e+00> : vector<2xf32>
    %260 = vector.multi_reduction <add>, %259, %cst_74 [1] : vector<2x4xf32> to vector<2xf32>
    %261 = vector.shape_cast %260 : vector<2xf32> to vector<2x1xf32>
    %262 = tpu.reciprocal %261 {approx = true} : vector<2x1xf32> -> vector<2x1xf32>
    %263 = vector.broadcast %262 : vector<2x1xf32> to vector<2x4xf32>
    %264 = arith.mulf %259, %263 : vector<2x4xf32>
    %cst_75 = arith.constant dense<0.000000e+00> : vector<2x16xf32>
    %265 = tpu.matmul %264, %0, %cst_75 {dimension_numbers = #tpu.dot_dimension_numbers<[1], [0], [0], [1], [0, 0, 1, 1], [], []>} : vector<2x4xf32>, vector<4x16xf32>, vector<2x16xf32> -> vector<2x16xf32>
    %cst_76 = arith.constant dense<0.000000e+00> : vector<2x64xf32>
    %266 = tpu.matmul %265, %5, %cst_76 {dimension_numbers = #tpu.dot_dimension_numbers<[1], [0], [0], [1], [0, 0, 1, 1], [], []>} : vector<2x16xf32>, vector<16x64xf32>, vector<2x64xf32> -> vector<2x64xf32>
    %cst_77 = arith.constant dense<0.000000e+00> : vector<2x64xf32>
    %267 = tpu.matmul %243, %6, %cst_77 {dimension_numbers = #tpu.dot_dimension_numbers<[1], [0], [0], [1], [0, 0, 1, 1], [], []>} : vector<2x16xf32>, vector<16x64xf32>, vector<2x64xf32> -> vector<2x64xf32>
    %268 = arith.addf %266, %267 : vector<2x64xf32>
    %cst_78 = arith.constant dense<0.000000e+00> : vector<2x64xf32>
    %269 = tpu.matmul %196, %7, %cst_78 {dimension_numbers = #tpu.dot_dimension_numbers<[1], [0], [0], [1], [0, 0, 1, 1], [], []>} : vector<2x16xf32>, vector<16x64xf32>, vector<2x64xf32> -> vector<2x64xf32>
    %270 = arith.addf %268, %269 : vector<2x64xf32>
    %271 = vector.broadcast %8 : vector<1x64xf32> to vector<2x64xf32>
    %272 = arith.addf %270, %271 : vector<2x64xf32>
    %273 = vector.extract_strided_slice %272 {offsets = [0, 0], sizes = [2, 16], strides = [1, 1]} : vector<2x64xf32> to vector<2x16xf32>
    %274 = arith.negf %273 : vector<2x16xf32>
    %275 = math.exp %274 : vector<2x16xf32>
    %cst_79 = arith.constant 1.000000e+00 : f32
    %276 = vector.broadcast %cst_79 : f32 to vector<2x16xf32>
    %277 = arith.addf %276, %275 : vector<2x16xf32>
    %278 = arith.divf %276, %277 : vector<2x16xf32>
    %279 = vector.extract_strided_slice %272 {offsets = [0, 16], sizes = [2, 16], strides = [1, 1]} : vector<2x64xf32> to vector<2x16xf32>
    %280 = arith.negf %279 : vector<2x16xf32>
    %281 = math.exp %280 : vector<2x16xf32>
    %cst_80 = arith.constant 1.000000e+00 : f32
    %282 = vector.broadcast %cst_80 : f32 to vector<2x16xf32>
    %283 = arith.addf %282, %281 : vector<2x16xf32>
    %284 = arith.divf %282, %283 : vector<2x16xf32>
    %285 = vector.extract_strided_slice %272 {offsets = [0, 32], sizes = [2, 16], strides = [1, 1]} : vector<2x64xf32> to vector<2x16xf32>
    %286 = math.tanh %285 : vector<2x16xf32>
    %287 = vector.extract_strided_slice %272 {offsets = [0, 48], sizes = [2, 16], strides = [1, 1]} : vector<2x64xf32> to vector<2x16xf32>
    %288 = arith.negf %287 : vector<2x16xf32>
    %289 = math.exp %288 : vector<2x16xf32>
    %cst_81 = arith.constant 1.000000e+00 : f32
    %290 = vector.broadcast %cst_81 : f32 to vector<2x16xf32>
    %291 = arith.addf %290, %289 : vector<2x16xf32>
    %292 = arith.divf %290, %291 : vector<2x16xf32>
    %293 = arith.mulf %284, %194 : vector<2x16xf32>
    %294 = arith.mulf %278, %286 : vector<2x16xf32>
    %295 = arith.addf %293, %294 : vector<2x16xf32>
    %296 = math.tanh %295 : vector<2x16xf32>
    %297 = arith.mulf %292, %296 : vector<2x16xf32>
    %cst_82 = arith.constant dense<0.000000e+00> : vector<2x32xf32>
    %298 = tpu.matmul %297, %9, %cst_82 {dimension_numbers = #tpu.dot_dimension_numbers<[1], [0], [0], [1], [0, 0, 1, 1], [], []>} : vector<2x16xf32>, vector<16x32xf32>, vector<2x32xf32> -> vector<2x32xf32>
    %299 = vector.broadcast %10 : vector<1x32xf32> to vector<2x32xf32>
    %300 = arith.addf %298, %299 : vector<2x32xf32>
    %cst_83 = arith.constant dense<0xFF800000> : vector<2xf32>
    %301 = vector.multi_reduction <maximumf>, %300, %cst_83 [1] : vector<2x32xf32> to vector<2xf32>
    %302 = vector.shape_cast %301 : vector<2xf32> to vector<2x1xf32>
    %303 = vector.broadcast %302 : vector<2x1xf32> to vector<2x32xf32>
    %304 = arith.subf %300, %303 : vector<2x32xf32>
    %305 = math.exp %304 : vector<2x32xf32>
    %cst_84 = arith.constant dense<0.000000e+00> : vector<2xf32>
    %306 = vector.multi_reduction <add>, %305, %cst_84 [1] : vector<2x32xf32> to vector<2xf32>
    %307 = vector.shape_cast %306 : vector<2xf32> to vector<2x1xf32>
    %308 = tpu.reciprocal %307 {approx = true} : vector<2x1xf32> -> vector<2x1xf32>
    %309 = vector.broadcast %308 : vector<2x1xf32> to vector<2x32xf32>
    %310 = arith.mulf %305, %309 : vector<2x32xf32>
    %311 = arith.index_cast %c2_i32 : i32 to index
    %c0_85 = arith.constant 0 : index
    %c0_86 = arith.constant 0 : index
    %312 = vector.load %arg13[%311, %c0_85, %c0_86] : memref<8x2x32xf32, #tpu.memory_space<vmem>>, vector<1x2x32xf32>
    %313 = vector.shape_cast %312 : vector<1x2x32xf32> to vector<2x32xf32>
    %314 = vector.shape_cast %310 : vector<2x32xf32> to vector<1x2x32xf32>
    tpu.vector_store %arg13[%311, %c0_85, %c0_86], %314 {strides = array<i32>} : memref<8x2x32xf32, #tpu.memory_space<vmem>>, vector<1x2x32xf32>,
    %c3_i32 = arith.constant 3 : i32
    %315 = arith.index_cast %c3_i32 : i32 to index
    %c0_87 = arith.constant 0 : index
    %c0_88 = arith.constant 0 : index
    %316 = vector.load %arg1[%315, %c0_87, %c0_88] : memref<8x2x64xf32, #tpu.memory_space<vmem>>, vector<1x2x64xf32>
    %317 = vector.shape_cast %316 : vector<1x2x64xf32> to vector<2x64xf32>
    %cst_89 = arith.constant dense<0.000000e+00> : vector<2x64xf32>
    %318 = tpu.matmul %243, %2, %cst_89 {dimension_numbers = #tpu.dot_dimension_numbers<[1], [0], [0], [1], [0, 0, 1, 1], [], []>} : vector<2x16xf32>, vector<16x64xf32>, vector<2x64xf32> -> vector<2x64xf32>
    %319 = arith.addf %317, %318 : vector<2x64xf32>
    %320 = vector.extract_strided_slice %319 {offsets = [0, 0], sizes = [2, 16], strides = [1, 1]} : vector<2x64xf32> to vector<2x16xf32>
    %321 = arith.negf %320 : vector<2x16xf32>
    %322 = math.exp %321 : vector<2x16xf32>
    %cst_90 = arith.constant 1.000000e+00 : f32
    %323 = vector.broadcast %cst_90 : f32 to vector<2x16xf32>
    %324 = arith.addf %323, %322 : vector<2x16xf32>
    %325 = arith.divf %323, %324 : vector<2x16xf32>
    %326 = vector.extract_strided_slice %319 {offsets = [0, 16], sizes = [2, 16], strides = [1, 1]} : vector<2x64xf32> to vector<2x16xf32>
    %327 = arith.negf %326 : vector<2x16xf32>
    %328 = math.exp %327 : vector<2x16xf32>
    %cst_91 = arith.constant 1.000000e+00 : f32
    %329 = vector.broadcast %cst_91 : f32 to vector<2x16xf32>
    %330 = arith.addf %329, %328 : vector<2x16xf32>
    %331 = arith.divf %329, %330 : vector<2x16xf32>
    %332 = vector.extract_strided_slice %319 {offsets = [0, 32], sizes = [2, 16], strides = [1, 1]} : vector<2x64xf32> to vector<2x16xf32>
    %333 = math.tanh %332 : vector<2x16xf32>
    %334 = vector.extract_strided_slice %319 {offsets = [0, 48], sizes = [2, 16], strides = [1, 1]} : vector<2x64xf32> to vector<2x16xf32>
    %335 = arith.negf %334 : vector<2x16xf32>
    %336 = math.exp %335 : vector<2x16xf32>
    %cst_92 = arith.constant 1.000000e+00 : f32
    %337 = vector.broadcast %cst_92 : f32 to vector<2x16xf32>
    %338 = arith.addf %337, %336 : vector<2x16xf32>
    %339 = arith.divf %337, %338 : vector<2x16xf32>
    %340 = arith.mulf %331, %241 : vector<2x16xf32>
    %341 = arith.mulf %325, %333 : vector<2x16xf32>
    %342 = arith.addf %340, %341 : vector<2x16xf32>
    %343 = math.tanh %342 : vector<2x16xf32>
    %344 = arith.mulf %339, %343 : vector<2x16xf32>
    %cst_93 = arith.constant dense<0.000000e+00> : vector<2x16xf32>
    %345 = tpu.matmul %344, %3, %cst_93 {dimension_numbers = #tpu.dot_dimension_numbers<[1], [0], [0], [1], [0, 0, 1, 1], [], []>} : vector<2x16xf32>, vector<16x16xf32>, vector<2x16xf32> -> vector<2x16xf32>
    %346 = vector.shape_cast %1 : vector<4x16xf32> to vector<1x4x16xf32>
    %347 = vector.shape_cast %345 : vector<2x16xf32> to vector<2x1x16xf32>
    %348 = vector.broadcast %346 : vector<1x4x16xf32> to vector<2x4x16xf32>
    %349 = vector.broadcast %347 : vector<2x1x16xf32> to vector<2x4x16xf32>
    %350 = arith.addf %348, %349 : vector<2x4x16xf32>
    %351 = math.tanh %350 : vector<2x4x16xf32>
    %352 = vector.shape_cast %4 : vector<1x16xf32> to vector<1x1x16xf32>
    %353 = vector.broadcast %352 : vector<1x1x16xf32> to vector<2x4x16xf32>
    %354 = arith.mulf %351, %353 : vector<2x4x16xf32>
    %cst_94 = arith.constant dense<0.000000e+00> : vector<2x4xf32>
    %355 = vector.multi_reduction <add>, %354, %cst_94 [2] : vector<2x4x16xf32> to vector<2x4xf32>
    %cst_95 = arith.constant dense<0xFF800000> : vector<2xf32>
    %356 = vector.multi_reduction <maximumf>, %355, %cst_95 [1] : vector<2x4xf32> to vector<2xf32>
    %357 = vector.shape_cast %356 : vector<2xf32> to vector<2x1xf32>
    %358 = vector.broadcast %357 : vector<2x1xf32> to vector<2x4xf32>
    %359 = arith.subf %355, %358 : vector<2x4xf32>
    %360 = math.exp %359 : vector<2x4xf32>
    %cst_96 = arith.constant dense<0.000000e+00> : vector<2xf32>
    %361 = vector.multi_reduction <add>, %360, %cst_96 [1] : vector<2x4xf32> to vector<2xf32>
    %362 = vector.shape_cast %361 : vector<2xf32> to vector<2x1xf32>
    %363 = tpu.reciprocal %362 {approx = true} : vector<2x1xf32> -> vector<2x1xf32>
    %364 = vector.broadcast %363 : vector<2x1xf32> to vector<2x4xf32>
    %365 = arith.mulf %360, %364 : vector<2x4xf32>
    %cst_97 = arith.constant dense<0.000000e+00> : vector<2x16xf32>
    %366 = tpu.matmul %365, %0, %cst_97 {dimension_numbers = #tpu.dot_dimension_numbers<[1], [0], [0], [1], [0, 0, 1, 1], [], []>} : vector<2x4xf32>, vector<4x16xf32>, vector<2x16xf32> -> vector<2x16xf32>
    %cst_98 = arith.constant dense<0.000000e+00> : vector<2x64xf32>
    %367 = tpu.matmul %366, %5, %cst_98 {dimension_numbers = #tpu.dot_dimension_numbers<[1], [0], [0], [1], [0, 0, 1, 1], [], []>} : vector<2x16xf32>, vector<16x64xf32>, vector<2x64xf32> -> vector<2x64xf32>
    %cst_99 = arith.constant dense<0.000000e+00> : vector<2x64xf32>
    %368 = tpu.matmul %344, %6, %cst_99 {dimension_numbers = #tpu.dot_dimension_numbers<[1], [0], [0], [1], [0, 0, 1, 1], [], []>} : vector<2x16xf32>, vector<16x64xf32>, vector<2x64xf32> -> vector<2x64xf32>
    %369 = arith.addf %367, %368 : vector<2x64xf32>
    %cst_100 = arith.constant dense<0.000000e+00> : vector<2x64xf32>
    %370 = tpu.matmul %297, %7, %cst_100 {dimension_numbers = #tpu.dot_dimension_numbers<[1], [0], [0], [1], [0, 0, 1, 1], [], []>} : vector<2x16xf32>, vector<16x64xf32>, vector<2x64xf32> -> vector<2x64xf32>
    %371 = arith.addf %369, %370 : vector<2x64xf32>
    %372 = vector.broadcast %8 : vector<1x64xf32> to vector<2x64xf32>
    %373 = arith.addf %371, %372 : vector<2x64xf32>
    %374 = vector.extract_strided_slice %373 {offsets = [0, 0], sizes = [2, 16], strides = [1, 1]} : vector<2x64xf32> to vector<2x16xf32>
    %375 = arith.negf %374 : vector<2x16xf32>
    %376 = math.exp %375 : vector<2x16xf32>
    %cst_101 = arith.constant 1.000000e+00 : f32
    %377 = vector.broadcast %cst_101 : f32 to vector<2x16xf32>
    %378 = arith.addf %377, %376 : vector<2x16xf32>
    %379 = arith.divf %377, %378 : vector<2x16xf32>
    %380 = vector.extract_strided_slice %373 {offsets = [0, 16], sizes = [2, 16], strides = [1, 1]} : vector<2x64xf32> to vector<2x16xf32>
    %381 = arith.negf %380 : vector<2x16xf32>
    %382 = math.exp %381 : vector<2x16xf32>
    %cst_102 = arith.constant 1.000000e+00 : f32
    %383 = vector.broadcast %cst_102 : f32 to vector<2x16xf32>
    %384 = arith.addf %383, %382 : vector<2x16xf32>
    %385 = arith.divf %383, %384 : vector<2x16xf32>
    %386 = vector.extract_strided_slice %373 {offsets = [0, 32], sizes = [2, 16], strides = [1, 1]} : vector<2x64xf32> to vector<2x16xf32>
    %387 = math.tanh %386 : vector<2x16xf32>
    %388 = vector.extract_strided_slice %373 {offsets = [0, 48], sizes = [2, 16], strides = [1, 1]} : vector<2x64xf32> to vector<2x16xf32>
    %389 = arith.negf %388 : vector<2x16xf32>
    %390 = math.exp %389 : vector<2x16xf32>
    %cst_103 = arith.constant 1.000000e+00 : f32
    %391 = vector.broadcast %cst_103 : f32 to vector<2x16xf32>
    %392 = arith.addf %391, %390 : vector<2x16xf32>
    %393 = arith.divf %391, %392 : vector<2x16xf32>
    %394 = arith.mulf %385, %295 : vector<2x16xf32>
    %395 = arith.mulf %379, %387 : vector<2x16xf32>
    %396 = arith.addf %394, %395 : vector<2x16xf32>
    %397 = math.tanh %396 : vector<2x16xf32>
    %398 = arith.mulf %393, %397 : vector<2x16xf32>
    %cst_104 = arith.constant dense<0.000000e+00> : vector<2x32xf32>
    %399 = tpu.matmul %398, %9, %cst_104 {dimension_numbers = #tpu.dot_dimension_numbers<[1], [0], [0], [1], [0, 0, 1, 1], [], []>} : vector<2x16xf32>, vector<16x32xf32>, vector<2x32xf32> -> vector<2x32xf32>
    %400 = vector.broadcast %10 : vector<1x32xf32> to vector<2x32xf32>
    %401 = arith.addf %399, %400 : vector<2x32xf32>
    %cst_105 = arith.constant dense<0xFF800000> : vector<2xf32>
    %402 = vector.multi_reduction <maximumf>, %401, %cst_105 [1] : vector<2x32xf32> to vector<2xf32>
    %403 = vector.shape_cast %402 : vector<2xf32> to vector<2x1xf32>
    %404 = vector.broadcast %403 : vector<2x1xf32> to vector<2x32xf32>
    %405 = arith.subf %401, %404 : vector<2x32xf32>
    %406 = math.exp %405 : vector<2x32xf32>
    %cst_106 = arith.constant dense<0.000000e+00> : vector<2xf32>
    %407 = vector.multi_reduction <add>, %406, %cst_106 [1] : vector<2x32xf32> to vector<2xf32>
    %408 = vector.shape_cast %407 : vector<2xf32> to vector<2x1xf32>
    %409 = tpu.reciprocal %408 {approx = true} : vector<2x1xf32> -> vector<2x1xf32>
    %410 = vector.broadcast %409 : vector<2x1xf32> to vector<2x32xf32>
    %411 = arith.mulf %406, %410 : vector<2x32xf32>
    %412 = arith.index_cast %c3_i32 : i32 to index
    %c0_107 = arith.constant 0 : index
    %c0_108 = arith.constant 0 : index
    %413 = vector.load %arg13[%412, %c0_107, %c0_108] : memref<8x2x32xf32, #tpu.memory_space<vmem>>, vector<1x2x32xf32>
    %414 = vector.shape_cast %413 : vector<1x2x32xf32> to vector<2x32xf32>
    %415 = vector.shape_cast %411 : vector<2x32xf32> to vector<1x2x32xf32>
    tpu.vector_store %arg13[%412, %c0_107, %c0_108], %415 {strides = array<i32>} : memref<8x2x32xf32, #tpu.memory_space<vmem>>, vector<1x2x32xf32>,
    %c4_i32 = arith.constant 4 : i32
    %416 = arith.index_cast %c4_i32 : i32 to index
    %c0_109 = arith.constant 0 : index
    %c0_110 = arith.constant 0 : index
    %417 = vector.load %arg1[%416, %c0_109, %c0_110] : memref<8x2x64xf32, #tpu.memory_space<vmem>>, vector<1x2x64xf32>
    %418 = vector.shape_cast %417 : vector<1x2x64xf32> to vector<2x64xf32>
    %cst_111 = arith.constant dense<0.000000e+00> : vector<2x64xf32>
    %419 = tpu.matmul %344, %2, %cst_111 {dimension_numbers = #tpu.dot_dimension_numbers<[1], [0], [0], [1], [0, 0, 1, 1], [], []>} : vector<2x16xf32>, vector<16x64xf32>, vector<2x64xf32> -> vector<2x64xf32>
    %420 = arith.addf %418, %419 : vector<2x64xf32>
    %421 = vector.extract_strided_slice %420 {offsets = [0, 0], sizes = [2, 16], strides = [1, 1]} : vector<2x64xf32> to vector<2x16xf32>
    %422 = arith.negf %421 : vector<2x16xf32>
    %423 = math.exp %422 : vector<2x16xf32>
    %cst_112 = arith.constant 1.000000e+00 : f32
    %424 = vector.broadcast %cst_112 : f32 to vector<2x16xf32>
    %425 = arith.addf %424, %423 : vector<2x16xf32>
    %426 = arith.divf %424, %425 : vector<2x16xf32>
    %427 = vector.extract_strided_slice %420 {offsets = [0, 16], sizes = [2, 16], strides = [1, 1]} : vector<2x64xf32> to vector<2x16xf32>
    %428 = arith.negf %427 : vector<2x16xf32>
    %429 = math.exp %428 : vector<2x16xf32>
    %cst_113 = arith.constant 1.000000e+00 : f32
    %430 = vector.broadcast %cst_113 : f32 to vector<2x16xf32>
    %431 = arith.addf %430, %429 : vector<2x16xf32>
    %432 = arith.divf %430, %431 : vector<2x16xf32>
    %433 = vector.extract_strided_slice %420 {offsets = [0, 32], sizes = [2, 16], strides = [1, 1]} : vector<2x64xf32> to vector<2x16xf32>
    %434 = math.tanh %433 : vector<2x16xf32>
    %435 = vector.extract_strided_slice %420 {offsets = [0, 48], sizes = [2, 16], strides = [1, 1]} : vector<2x64xf32> to vector<2x16xf32>
    %436 = arith.negf %435 : vector<2x16xf32>
    %437 = math.exp %436 : vector<2x16xf32>
    %cst_114 = arith.constant 1.000000e+00 : f32
    %438 = vector.broadcast %cst_114 : f32 to vector<2x16xf32>
    %439 = arith.addf %438, %437 : vector<2x16xf32>
    %440 = arith.divf %438, %439 : vector<2x16xf32>
    %441 = arith.mulf %432, %342 : vector<2x16xf32>
    %442 = arith.mulf %426, %434 : vector<2x16xf32>
    %443 = arith.addf %441, %442 : vector<2x16xf32>
    %444 = math.tanh %443 : vector<2x16xf32>
    %445 = arith.mulf %440, %444 : vector<2x16xf32>
    %cst_115 = arith.constant dense<0.000000e+00> : vector<2x16xf32>
    %446 = tpu.matmul %445, %3, %cst_115 {dimension_numbers = #tpu.dot_dimension_numbers<[1], [0], [0], [1], [0, 0, 1, 1], [], []>} : vector<2x16xf32>, vector<16x16xf32>, vector<2x16xf32> -> vector<2x16xf32>
    %447 = vector.shape_cast %1 : vector<4x16xf32> to vector<1x4x16xf32>
    %448 = vector.shape_cast %446 : vector<2x16xf32> to vector<2x1x16xf32>
    %449 = vector.broadcast %447 : vector<1x4x16xf32> to vector<2x4x16xf32>
    %450 = vector.broadcast %448 : vector<2x1x16xf32> to vector<2x4x16xf32>
    %451 = arith.addf %449, %450 : vector<2x4x16xf32>
    %452 = math.tanh %451 : vector<2x4x16xf32>
    %453 = vector.shape_cast %4 : vector<1x16xf32> to vector<1x1x16xf32>
    %454 = vector.broadcast %453 : vector<1x1x16xf32> to vector<2x4x16xf32>
    %455 = arith.mulf %452, %454 : vector<2x4x16xf32>
    %cst_116 = arith.constant dense<0.000000e+00> : vector<2x4xf32>
    %456 = vector.multi_reduction <add>, %455, %cst_116 [2] : vector<2x4x16xf32> to vector<2x4xf32>
    %cst_117 = arith.constant dense<0xFF800000> : vector<2xf32>
    %457 = vector.multi_reduction <maximumf>, %456, %cst_117 [1] : vector<2x4xf32> to vector<2xf32>
    %458 = vector.shape_cast %457 : vector<2xf32> to vector<2x1xf32>
    %459 = vector.broadcast %458 : vector<2x1xf32> to vector<2x4xf32>
    %460 = arith.subf %456, %459 : vector<2x4xf32>
    %461 = math.exp %460 : vector<2x4xf32>
    %cst_118 = arith.constant dense<0.000000e+00> : vector<2xf32>
    %462 = vector.multi_reduction <add>, %461, %cst_118 [1] : vector<2x4xf32> to vector<2xf32>
    %463 = vector.shape_cast %462 : vector<2xf32> to vector<2x1xf32>
    %464 = tpu.reciprocal %463 {approx = true} : vector<2x1xf32> -> vector<2x1xf32>
    %465 = vector.broadcast %464 : vector<2x1xf32> to vector<2x4xf32>
    %466 = arith.mulf %461, %465 : vector<2x4xf32>
    %cst_119 = arith.constant dense<0.000000e+00> : vector<2x16xf32>
    %467 = tpu.matmul %466, %0, %cst_119 {dimension_numbers = #tpu.dot_dimension_numbers<[1], [0], [0], [1], [0, 0, 1, 1], [], []>} : vector<2x4xf32>, vector<4x16xf32>, vector<2x16xf32> -> vector<2x16xf32>
    %cst_120 = arith.constant dense<0.000000e+00> : vector<2x64xf32>
    %468 = tpu.matmul %467, %5, %cst_120 {dimension_numbers = #tpu.dot_dimension_numbers<[1], [0], [0], [1], [0, 0, 1, 1], [], []>} : vector<2x16xf32>, vector<16x64xf32>, vector<2x64xf32> -> vector<2x64xf32>
    %cst_121 = arith.constant dense<0.000000e+00> : vector<2x64xf32>
    %469 = tpu.matmul %445, %6, %cst_121 {dimension_numbers = #tpu.dot_dimension_numbers<[1], [0], [0], [1], [0, 0, 1, 1], [], []>} : vector<2x16xf32>, vector<16x64xf32>, vector<2x64xf32> -> vector<2x64xf32>
    %470 = arith.addf %468, %469 : vector<2x64xf32>
    %cst_122 = arith.constant dense<0.000000e+00> : vector<2x64xf32>
    %471 = tpu.matmul %398, %7, %cst_122 {dimension_numbers = #tpu.dot_dimension_numbers<[1], [0], [0], [1], [0, 0, 1, 1], [], []>} : vector<2x16xf32>, vector<16x64xf32>, vector<2x64xf32> -> vector<2x64xf32>
    %472 = arith.addf %470, %471 : vector<2x64xf32>
    %473 = vector.broadcast %8 : vector<1x64xf32> to vector<2x64xf32>
    %474 = arith.addf %472, %473 : vector<2x64xf32>
    %475 = vector.extract_strided_slice %474 {offsets = [0, 0], sizes = [2, 16], strides = [1, 1]} : vector<2x64xf32> to vector<2x16xf32>
    %476 = arith.negf %475 : vector<2x16xf32>
    %477 = math.exp %476 : vector<2x16xf32>
    %cst_123 = arith.constant 1.000000e+00 : f32
    %478 = vector.broadcast %cst_123 : f32 to vector<2x16xf32>
    %479 = arith.addf %478, %477 : vector<2x16xf32>
    %480 = arith.divf %478, %479 : vector<2x16xf32>
    %481 = vector.extract_strided_slice %474 {offsets = [0, 16], sizes = [2, 16], strides = [1, 1]} : vector<2x64xf32> to vector<2x16xf32>
    %482 = arith.negf %481 : vector<2x16xf32>
    %483 = math.exp %482 : vector<2x16xf32>
    %cst_124 = arith.constant 1.000000e+00 : f32
    %484 = vector.broadcast %cst_124 : f32 to vector<2x16xf32>
    %485 = arith.addf %484, %483 : vector<2x16xf32>
    %486 = arith.divf %484, %485 : vector<2x16xf32>
    %487 = vector.extract_strided_slice %474 {offsets = [0, 32], sizes = [2, 16], strides = [1, 1]} : vector<2x64xf32> to vector<2x16xf32>
    %488 = math.tanh %487 : vector<2x16xf32>
    %489 = vector.extract_strided_slice %474 {offsets = [0, 48], sizes = [2, 16], strides = [1, 1]} : vector<2x64xf32> to vector<2x16xf32>
    %490 = arith.negf %489 : vector<2x16xf32>
    %491 = math.exp %490 : vector<2x16xf32>
    %cst_125 = arith.constant 1.000000e+00 : f32
    %492 = vector.broadcast %cst_125 : f32 to vector<2x16xf32>
    %493 = arith.addf %492, %491 : vector<2x16xf32>
    %494 = arith.divf %492, %493 : vector<2x16xf32>
    %495 = arith.mulf %486, %396 : vector<2x16xf32>
    %496 = arith.mulf %480, %488 : vector<2x16xf32>
    %497 = arith.addf %495, %496 : vector<2x16xf32>
    %498 = math.tanh %497 : vector<2x16xf32>
    %499 = arith.mulf %494, %498 : vector<2x16xf32>
    %cst_126 = arith.constant dense<0.000000e+00> : vector<2x32xf32>
    %500 = tpu.matmul %499, %9, %cst_126 {dimension_numbers = #tpu.dot_dimension_numbers<[1], [0], [0], [1], [0, 0, 1, 1], [], []>} : vector<2x16xf32>, vector<16x32xf32>, vector<2x32xf32> -> vector<2x32xf32>
    %501 = vector.broadcast %10 : vector<1x32xf32> to vector<2x32xf32>
    %502 = arith.addf %500, %501 : vector<2x32xf32>
    %cst_127 = arith.constant dense<0xFF800000> : vector<2xf32>
    %503 = vector.multi_reduction <maximumf>, %502, %cst_127 [1] : vector<2x32xf32> to vector<2xf32>
    %504 = vector.shape_cast %503 : vector<2xf32> to vector<2x1xf32>
    %505 = vector.broadcast %504 : vector<2x1xf32> to vector<2x32xf32>
    %506 = arith.subf %502, %505 : vector<2x32xf32>
    %507 = math.exp %506 : vector<2x32xf32>
    %cst_128 = arith.constant dense<0.000000e+00> : vector<2xf32>
    %508 = vector.multi_reduction <add>, %507, %cst_128 [1] : vector<2x32xf32> to vector<2xf32>
    %509 = vector.shape_cast %508 : vector<2xf32> to vector<2x1xf32>
    %510 = tpu.reciprocal %509 {approx = true} : vector<2x1xf32> -> vector<2x1xf32>
    %511 = vector.broadcast %510 : vector<2x1xf32> to vector<2x32xf32>
    %512 = arith.mulf %507, %511 : vector<2x32xf32>
    %513 = arith.index_cast %c4_i32 : i32 to index
    %c0_129 = arith.constant 0 : index
    %c0_130 = arith.constant 0 : index
    %514 = vector.load %arg13[%513, %c0_129, %c0_130] : memref<8x2x32xf32, #tpu.memory_space<vmem>>, vector<1x2x32xf32>
    %515 = vector.shape_cast %514 : vector<1x2x32xf32> to vector<2x32xf32>
    %516 = vector.shape_cast %512 : vector<2x32xf32> to vector<1x2x32xf32>
    tpu.vector_store %arg13[%513, %c0_129, %c0_130], %516 {strides = array<i32>} : memref<8x2x32xf32, #tpu.memory_space<vmem>>, vector<1x2x32xf32>,
    %c5_i32 = arith.constant 5 : i32
    %517 = arith.index_cast %c5_i32 : i32 to index
    %c0_131 = arith.constant 0 : index
    %c0_132 = arith.constant 0 : index
    %518 = vector.load %arg1[%517, %c0_131, %c0_132] : memref<8x2x64xf32, #tpu.memory_space<vmem>>, vector<1x2x64xf32>
    %519 = vector.shape_cast %518 : vector<1x2x64xf32> to vector<2x64xf32>
    %cst_133 = arith.constant dense<0.000000e+00> : vector<2x64xf32>
    %520 = tpu.matmul %445, %2, %cst_133 {dimension_numbers = #tpu.dot_dimension_numbers<[1], [0], [0], [1], [0, 0, 1, 1], [], []>} : vector<2x16xf32>, vector<16x64xf32>, vector<2x64xf32> -> vector<2x64xf32>
    %521 = arith.addf %519, %520 : vector<2x64xf32>
    %522 = vector.extract_strided_slice %521 {offsets = [0, 0], sizes = [2, 16], strides = [1, 1]} : vector<2x64xf32> to vector<2x16xf32>
    %523 = arith.negf %522 : vector<2x16xf32>
    %524 = math.exp %523 : vector<2x16xf32>
    %cst_134 = arith.constant 1.000000e+00 : f32
    %525 = vector.broadcast %cst_134 : f32 to vector<2x16xf32>
    %526 = arith.addf %525, %524 : vector<2x16xf32>
    %527 = arith.divf %525, %526 : vector<2x16xf32>
    %528 = vector.extract_strided_slice %521 {offsets = [0, 16], sizes = [2, 16], strides = [1, 1]} : vector<2x64xf32> to vector<2x16xf32>
    %529 = arith.negf %528 : vector<2x16xf32>
    %530 = math.exp %529 : vector<2x16xf32>
    %cst_135 = arith.constant 1.000000e+00 : f32
    %531 = vector.broadcast %cst_135 : f32 to vector<2x16xf32>
    %532 = arith.addf %531, %530 : vector<2x16xf32>
    %533 = arith.divf %531, %532 : vector<2x16xf32>
    %534 = vector.extract_strided_slice %521 {offsets = [0, 32], sizes = [2, 16], strides = [1, 1]} : vector<2x64xf32> to vector<2x16xf32>
    %535 = math.tanh %534 : vector<2x16xf32>
    %536 = vector.extract_strided_slice %521 {offsets = [0, 48], sizes = [2, 16], strides = [1, 1]} : vector<2x64xf32> to vector<2x16xf32>
    %537 = arith.negf %536 : vector<2x16xf32>
    %538 = math.exp %537 : vector<2x16xf32>
    %cst_136 = arith.constant 1.000000e+00 : f32
    %539 = vector.broadcast %cst_136 : f32 to vector<2x16xf32>
    %540 = arith.addf %539, %538 : vector<2x16xf32>
    %541 = arith.divf %539, %540 : vector<2x16xf32>
    %542 = arith.mulf %533, %443 : vector<2x16xf32>
    %543 = arith.mulf %527, %535 : vector<2x16xf32>
    %544 = arith.addf %542, %543 : vector<2x16xf32>
    %545 = math.tanh %544 : vector<2x16xf32>
    %546 = arith.mulf %541, %545 : vector<2x16xf32>
    %cst_137 = arith.constant dense<0.000000e+00> : vector<2x16xf32>
    %547 = tpu.matmul %546, %3, %cst_137 {dimension_numbers = #tpu.dot_dimension_numbers<[1], [0], [0], [1], [0, 0, 1, 1], [], []>} : vector<2x16xf32>, vector<16x16xf32>, vector<2x16xf32> -> vector<2x16xf32>
    %548 = vector.shape_cast %1 : vector<4x16xf32> to vector<1x4x16xf32>
    %549 = vector.shape_cast %547 : vector<2x16xf32> to vector<2x1x16xf32>
    %550 = vector.broadcast %548 : vector<1x4x16xf32> to vector<2x4x16xf32>
    %551 = vector.broadcast %549 : vector<2x1x16xf32> to vector<2x4x16xf32>
    %552 = arith.addf %550, %551 : vector<2x4x16xf32>
    %553 = math.tanh %552 : vector<2x4x16xf32>
    %554 = vector.shape_cast %4 : vector<1x16xf32> to vector<1x1x16xf32>
    %555 = vector.broadcast %554 : vector<1x1x16xf32> to vector<2x4x16xf32>
    %556 = arith.mulf %553, %555 : vector<2x4x16xf32>
    %cst_138 = arith.constant dense<0.000000e+00> : vector<2x4xf32>
    %557 = vector.multi_reduction <add>, %556, %cst_138 [2] : vector<2x4x16xf32> to vector<2x4xf32>
    %cst_139 = arith.constant dense<0xFF800000> : vector<2xf32>
    %558 = vector.multi_reduction <maximumf>, %557, %cst_139 [1] : vector<2x4xf32> to vector<2xf32>
    %559 = vector.shape_cast %558 : vector<2xf32> to vector<2x1xf32>
    %560 = vector.broadcast %559 : vector<2x1xf32> to vector<2x4xf32>
    %561 = arith.subf %557, %560 : vector<2x4xf32>
    %562 = math.exp %561 : vector<2x4xf32>
    %cst_140 = arith.constant dense<0.000000e+00> : vector<2xf32>
    %563 = vector.multi_reduction <add>, %562, %cst_140 [1] : vector<2x4xf32> to vector<2xf32>
    %564 = vector.shape_cast %563 : vector<2xf32> to vector<2x1xf32>
    %565 = tpu.reciprocal %564 {approx = true} : vector<2x1xf32> -> vector<2x1xf32>
    %566 = vector.broadcast %565 : vector<2x1xf32> to vector<2x4xf32>
    %567 = arith.mulf %562, %566 : vector<2x4xf32>
    %cst_141 = arith.constant dense<0.000000e+00> : vector<2x16xf32>
    %568 = tpu.matmul %567, %0, %cst_141 {dimension_numbers = #tpu.dot_dimension_numbers<[1], [0], [0], [1], [0, 0, 1, 1], [], []>} : vector<2x4xf32>, vector<4x16xf32>, vector<2x16xf32> -> vector<2x16xf32>
    %cst_142 = arith.constant dense<0.000000e+00> : vector<2x64xf32>
    %569 = tpu.matmul %568, %5, %cst_142 {dimension_numbers = #tpu.dot_dimension_numbers<[1], [0], [0], [1], [0, 0, 1, 1], [], []>} : vector<2x16xf32>, vector<16x64xf32>, vector<2x64xf32> -> vector<2x64xf32>
    %cst_143 = arith.constant dense<0.000000e+00> : vector<2x64xf32>
    %570 = tpu.matmul %546, %6, %cst_143 {dimension_numbers = #tpu.dot_dimension_numbers<[1], [0], [0], [1], [0, 0, 1, 1], [], []>} : vector<2x16xf32>, vector<16x64xf32>, vector<2x64xf32> -> vector<2x64xf32>
    %571 = arith.addf %569, %570 : vector<2x64xf32>
    %cst_144 = arith.constant dense<0.000000e+00> : vector<2x64xf32>
    %572 = tpu.matmul %499, %7, %cst_144 {dimension_numbers = #tpu.dot_dimension_numbers<[1], [0], [0], [1], [0, 0, 1, 1], [], []>} : vector<2x16xf32>, vector<16x64xf32>, vector<2x64xf32> -> vector<2x64xf32>
    %573 = arith.addf %571, %572 : vector<2x64xf32>
    %574 = vector.broadcast %8 : vector<1x64xf32> to vector<2x64xf32>
    %575 = arith.addf %573, %574 : vector<2x64xf32>
    %576 = vector.extract_strided_slice %575 {offsets = [0, 0], sizes = [2, 16], strides = [1, 1]} : vector<2x64xf32> to vector<2x16xf32>
    %577 = arith.negf %576 : vector<2x16xf32>
    %578 = math.exp %577 : vector<2x16xf32>
    %cst_145 = arith.constant 1.000000e+00 : f32
    %579 = vector.broadcast %cst_145 : f32 to vector<2x16xf32>
    %580 = arith.addf %579, %578 : vector<2x16xf32>
    %581 = arith.divf %579, %580 : vector<2x16xf32>
    %582 = vector.extract_strided_slice %575 {offsets = [0, 16], sizes = [2, 16], strides = [1, 1]} : vector<2x64xf32> to vector<2x16xf32>
    %583 = arith.negf %582 : vector<2x16xf32>
    %584 = math.exp %583 : vector<2x16xf32>
    %cst_146 = arith.constant 1.000000e+00 : f32
    %585 = vector.broadcast %cst_146 : f32 to vector<2x16xf32>
    %586 = arith.addf %585, %584 : vector<2x16xf32>
    %587 = arith.divf %585, %586 : vector<2x16xf32>
    %588 = vector.extract_strided_slice %575 {offsets = [0, 32], sizes = [2, 16], strides = [1, 1]} : vector<2x64xf32> to vector<2x16xf32>
    %589 = math.tanh %588 : vector<2x16xf32>
    %590 = vector.extract_strided_slice %575 {offsets = [0, 48], sizes = [2, 16], strides = [1, 1]} : vector<2x64xf32> to vector<2x16xf32>
    %591 = arith.negf %590 : vector<2x16xf32>
    %592 = math.exp %591 : vector<2x16xf32>
    %cst_147 = arith.constant 1.000000e+00 : f32
    %593 = vector.broadcast %cst_147 : f32 to vector<2x16xf32>
    %594 = arith.addf %593, %592 : vector<2x16xf32>
    %595 = arith.divf %593, %594 : vector<2x16xf32>
    %596 = arith.mulf %587, %497 : vector<2x16xf32>
    %597 = arith.mulf %581, %589 : vector<2x16xf32>
    %598 = arith.addf %596, %597 : vector<2x16xf32>
    %599 = math.tanh %598 : vector<2x16xf32>
    %600 = arith.mulf %595, %599 : vector<2x16xf32>
    %cst_148 = arith.constant dense<0.000000e+00> : vector<2x32xf32>
    %601 = tpu.matmul %600, %9, %cst_148 {dimension_numbers = #tpu.dot_dimension_numbers<[1], [0], [0], [1], [0, 0, 1, 1], [], []>} : vector<2x16xf32>, vector<16x32xf32>, vector<2x32xf32> -> vector<2x32xf32>
    %602 = vector.broadcast %10 : vector<1x32xf32> to vector<2x32xf32>
    %603 = arith.addf %601, %602 : vector<2x32xf32>
    %cst_149 = arith.constant dense<0xFF800000> : vector<2xf32>
    %604 = vector.multi_reduction <maximumf>, %603, %cst_149 [1] : vector<2x32xf32> to vector<2xf32>
    %605 = vector.shape_cast %604 : vector<2xf32> to vector<2x1xf32>
    %606 = vector.broadcast %605 : vector<2x1xf32> to vector<2x32xf32>
    %607 = arith.subf %603, %606 : vector<2x32xf32>
    %608 = math.exp %607 : vector<2x32xf32>
    %cst_150 = arith.constant dense<0.000000e+00> : vector<2xf32>
    %609 = vector.multi_reduction <add>, %608, %cst_150 [1] : vector<2x32xf32> to vector<2xf32>
    %610 = vector.shape_cast %609 : vector<2xf32> to vector<2x1xf32>
    %611 = tpu.reciprocal %610 {approx = true} : vector<2x1xf32> -> vector<2x1xf32>
    %612 = vector.broadcast %611 : vector<2x1xf32> to vector<2x32xf32>
    %613 = arith.mulf %608, %612 : vector<2x32xf32>
    %614 = arith.index_cast %c5_i32 : i32 to index
    %c0_151 = arith.constant 0 : index
    %c0_152 = arith.constant 0 : index
    %615 = vector.load %arg13[%614, %c0_151, %c0_152] : memref<8x2x32xf32, #tpu.memory_space<vmem>>, vector<1x2x32xf32>
    %616 = vector.shape_cast %615 : vector<1x2x32xf32> to vector<2x32xf32>
    %617 = vector.shape_cast %613 : vector<2x32xf32> to vector<1x2x32xf32>
    tpu.vector_store %arg13[%614, %c0_151, %c0_152], %617 {strides = array<i32>} : memref<8x2x32xf32, #tpu.memory_space<vmem>>, vector<1x2x32xf32>,
    %c6_i32 = arith.constant 6 : i32
    %618 = arith.index_cast %c6_i32 : i32 to index
    %c0_153 = arith.constant 0 : index
    %c0_154 = arith.constant 0 : index
    %619 = vector.load %arg1[%618, %c0_153, %c0_154] : memref<8x2x64xf32, #tpu.memory_space<vmem>>, vector<1x2x64xf32>
    %620 = vector.shape_cast %619 : vector<1x2x64xf32> to vector<2x64xf32>
    %cst_155 = arith.constant dense<0.000000e+00> : vector<2x64xf32>
    %621 = tpu.matmul %546, %2, %cst_155 {dimension_numbers = #tpu.dot_dimension_numbers<[1], [0], [0], [1], [0, 0, 1, 1], [], []>} : vector<2x16xf32>, vector<16x64xf32>, vector<2x64xf32> -> vector<2x64xf32>
    %622 = arith.addf %620, %621 : vector<2x64xf32>
    %623 = vector.extract_strided_slice %622 {offsets = [0, 0], sizes = [2, 16], strides = [1, 1]} : vector<2x64xf32> to vector<2x16xf32>
    %624 = arith.negf %623 : vector<2x16xf32>
    %625 = math.exp %624 : vector<2x16xf32>
    %cst_156 = arith.constant 1.000000e+00 : f32
    %626 = vector.broadcast %cst_156 : f32 to vector<2x16xf32>
    %627 = arith.addf %626, %625 : vector<2x16xf32>
    %628 = arith.divf %626, %627 : vector<2x16xf32>
    %629 = vector.extract_strided_slice %622 {offsets = [0, 16], sizes = [2, 16], strides = [1, 1]} : vector<2x64xf32> to vector<2x16xf32>
    %630 = arith.negf %629 : vector<2x16xf32>
    %631 = math.exp %630 : vector<2x16xf32>
    %cst_157 = arith.constant 1.000000e+00 : f32
    %632 = vector.broadcast %cst_157 : f32 to vector<2x16xf32>
    %633 = arith.addf %632, %631 : vector<2x16xf32>
    %634 = arith.divf %632, %633 : vector<2x16xf32>
    %635 = vector.extract_strided_slice %622 {offsets = [0, 32], sizes = [2, 16], strides = [1, 1]} : vector<2x64xf32> to vector<2x16xf32>
    %636 = math.tanh %635 : vector<2x16xf32>
    %637 = vector.extract_strided_slice %622 {offsets = [0, 48], sizes = [2, 16], strides = [1, 1]} : vector<2x64xf32> to vector<2x16xf32>
    %638 = arith.negf %637 : vector<2x16xf32>
    %639 = math.exp %638 : vector<2x16xf32>
    %cst_158 = arith.constant 1.000000e+00 : f32
    %640 = vector.broadcast %cst_158 : f32 to vector<2x16xf32>
    %641 = arith.addf %640, %639 : vector<2x16xf32>
    %642 = arith.divf %640, %641 : vector<2x16xf32>
    %643 = arith.mulf %634, %544 : vector<2x16xf32>
    %644 = arith.mulf %628, %636 : vector<2x16xf32>
    %645 = arith.addf %643, %644 : vector<2x16xf32>
    %646 = math.tanh %645 : vector<2x16xf32>
    %647 = arith.mulf %642, %646 : vector<2x16xf32>
    %cst_159 = arith.constant dense<0.000000e+00> : vector<2x16xf32>
    %648 = tpu.matmul %647, %3, %cst_159 {dimension_numbers = #tpu.dot_dimension_numbers<[1], [0], [0], [1], [0, 0, 1, 1], [], []>} : vector<2x16xf32>, vector<16x16xf32>, vector<2x16xf32> -> vector<2x16xf32>
    %649 = vector.shape_cast %1 : vector<4x16xf32> to vector<1x4x16xf32>
    %650 = vector.shape_cast %648 : vector<2x16xf32> to vector<2x1x16xf32>
    %651 = vector.broadcast %649 : vector<1x4x16xf32> to vector<2x4x16xf32>
    %652 = vector.broadcast %650 : vector<2x1x16xf32> to vector<2x4x16xf32>
    %653 = arith.addf %651, %652 : vector<2x4x16xf32>
    %654 = math.tanh %653 : vector<2x4x16xf32>
    %655 = vector.shape_cast %4 : vector<1x16xf32> to vector<1x1x16xf32>
    %656 = vector.broadcast %655 : vector<1x1x16xf32> to vector<2x4x16xf32>
    %657 = arith.mulf %654, %656 : vector<2x4x16xf32>
    %cst_160 = arith.constant dense<0.000000e+00> : vector<2x4xf32>
    %658 = vector.multi_reduction <add>, %657, %cst_160 [2] : vector<2x4x16xf32> to vector<2x4xf32>
    %cst_161 = arith.constant dense<0xFF800000> : vector<2xf32>
    %659 = vector.multi_reduction <maximumf>, %658, %cst_161 [1] : vector<2x4xf32> to vector<2xf32>
    %660 = vector.shape_cast %659 : vector<2xf32> to vector<2x1xf32>
    %661 = vector.broadcast %660 : vector<2x1xf32> to vector<2x4xf32>
    %662 = arith.subf %658, %661 : vector<2x4xf32>
    %663 = math.exp %662 : vector<2x4xf32>
    %cst_162 = arith.constant dense<0.000000e+00> : vector<2xf32>
    %664 = vector.multi_reduction <add>, %663, %cst_162 [1] : vector<2x4xf32> to vector<2xf32>
    %665 = vector.shape_cast %664 : vector<2xf32> to vector<2x1xf32>
    %666 = tpu.reciprocal %665 {approx = true} : vector<2x1xf32> -> vector<2x1xf32>
    %667 = vector.broadcast %666 : vector<2x1xf32> to vector<2x4xf32>
    %668 = arith.mulf %663, %667 : vector<2x4xf32>
    %cst_163 = arith.constant dense<0.000000e+00> : vector<2x16xf32>
    %669 = tpu.matmul %668, %0, %cst_163 {dimension_numbers = #tpu.dot_dimension_numbers<[1], [0], [0], [1], [0, 0, 1, 1], [], []>} : vector<2x4xf32>, vector<4x16xf32>, vector<2x16xf32> -> vector<2x16xf32>
    %cst_164 = arith.constant dense<0.000000e+00> : vector<2x64xf32>
    %670 = tpu.matmul %669, %5, %cst_164 {dimension_numbers = #tpu.dot_dimension_numbers<[1], [0], [0], [1], [0, 0, 1, 1], [], []>} : vector<2x16xf32>, vector<16x64xf32>, vector<2x64xf32> -> vector<2x64xf32>
    %cst_165 = arith.constant dense<0.000000e+00> : vector<2x64xf32>
    %671 = tpu.matmul %647, %6, %cst_165 {dimension_numbers = #tpu.dot_dimension_numbers<[1], [0], [0], [1], [0, 0, 1, 1], [], []>} : vector<2x16xf32>, vector<16x64xf32>, vector<2x64xf32> -> vector<2x64xf32>
    %672 = arith.addf %670, %671 : vector<2x64xf32>
    %cst_166 = arith.constant dense<0.000000e+00> : vector<2x64xf32>
    %673 = tpu.matmul %600, %7, %cst_166 {dimension_numbers = #tpu.dot_dimension_numbers<[1], [0], [0], [1], [0, 0, 1, 1], [], []>} : vector<2x16xf32>, vector<16x64xf32>, vector<2x64xf32> -> vector<2x64xf32>
    %674 = arith.addf %672, %673 : vector<2x64xf32>
    %675 = vector.broadcast %8 : vector<1x64xf32> to vector<2x64xf32>
    %676 = arith.addf %674, %675 : vector<2x64xf32>
    %677 = vector.extract_strided_slice %676 {offsets = [0, 0], sizes = [2, 16], strides = [1, 1]} : vector<2x64xf32> to vector<2x16xf32>
    %678 = arith.negf %677 : vector<2x16xf32>
    %679 = math.exp %678 : vector<2x16xf32>
    %cst_167 = arith.constant 1.000000e+00 : f32
    %680 = vector.broadcast %cst_167 : f32 to vector<2x16xf32>
    %681 = arith.addf %680, %679 : vector<2x16xf32>
    %682 = arith.divf %680, %681 : vector<2x16xf32>
    %683 = vector.extract_strided_slice %676 {offsets = [0, 16], sizes = [2, 16], strides = [1, 1]} : vector<2x64xf32> to vector<2x16xf32>
    %684 = arith.negf %683 : vector<2x16xf32>
    %685 = math.exp %684 : vector<2x16xf32>
    %cst_168 = arith.constant 1.000000e+00 : f32
    %686 = vector.broadcast %cst_168 : f32 to vector<2x16xf32>
    %687 = arith.addf %686, %685 : vector<2x16xf32>
    %688 = arith.divf %686, %687 : vector<2x16xf32>
    %689 = vector.extract_strided_slice %676 {offsets = [0, 32], sizes = [2, 16], strides = [1, 1]} : vector<2x64xf32> to vector<2x16xf32>
    %690 = math.tanh %689 : vector<2x16xf32>
    %691 = vector.extract_strided_slice %676 {offsets = [0, 48], sizes = [2, 16], strides = [1, 1]} : vector<2x64xf32> to vector<2x16xf32>
    %692 = arith.negf %691 : vector<2x16xf32>
    %693 = math.exp %692 : vector<2x16xf32>
    %cst_169 = arith.constant 1.000000e+00 : f32
    %694 = vector.broadcast %cst_169 : f32 to vector<2x16xf32>
    %695 = arith.addf %694, %693 : vector<2x16xf32>
    %696 = arith.divf %694, %695 : vector<2x16xf32>
    %697 = arith.mulf %688, %598 : vector<2x16xf32>
    %698 = arith.mulf %682, %690 : vector<2x16xf32>
    %699 = arith.addf %697, %698 : vector<2x16xf32>
    %700 = math.tanh %699 : vector<2x16xf32>
    %701 = arith.mulf %696, %700 : vector<2x16xf32>
    %cst_170 = arith.constant dense<0.000000e+00> : vector<2x32xf32>
    %702 = tpu.matmul %701, %9, %cst_170 {dimension_numbers = #tpu.dot_dimension_numbers<[1], [0], [0], [1], [0, 0, 1, 1], [], []>} : vector<2x16xf32>, vector<16x32xf32>, vector<2x32xf32> -> vector<2x32xf32>
    %703 = vector.broadcast %10 : vector<1x32xf32> to vector<2x32xf32>
    %704 = arith.addf %702, %703 : vector<2x32xf32>
    %cst_171 = arith.constant dense<0xFF800000> : vector<2xf32>
    %705 = vector.multi_reduction <maximumf>, %704, %cst_171 [1] : vector<2x32xf32> to vector<2xf32>
    %706 = vector.shape_cast %705 : vector<2xf32> to vector<2x1xf32>
    %707 = vector.broadcast %706 : vector<2x1xf32> to vector<2x32xf32>
    %708 = arith.subf %704, %707 : vector<2x32xf32>
    %709 = math.exp %708 : vector<2x32xf32>
    %cst_172 = arith.constant dense<0.000000e+00> : vector<2xf32>
    %710 = vector.multi_reduction <add>, %709, %cst_172 [1] : vector<2x32xf32> to vector<2xf32>
    %711 = vector.shape_cast %710 : vector<2xf32> to vector<2x1xf32>
    %712 = tpu.reciprocal %711 {approx = true} : vector<2x1xf32> -> vector<2x1xf32>
    %713 = vector.broadcast %712 : vector<2x1xf32> to vector<2x32xf32>
    %714 = arith.mulf %709, %713 : vector<2x32xf32>
    %715 = arith.index_cast %c6_i32 : i32 to index
    %c0_173 = arith.constant 0 : index
    %c0_174 = arith.constant 0 : index
    %716 = vector.load %arg13[%715, %c0_173, %c0_174] : memref<8x2x32xf32, #tpu.memory_space<vmem>>, vector<1x2x32xf32>
    %717 = vector.shape_cast %716 : vector<1x2x32xf32> to vector<2x32xf32>
    %718 = vector.shape_cast %714 : vector<2x32xf32> to vector<1x2x32xf32>
    tpu.vector_store %arg13[%715, %c0_173, %c0_174], %718 {strides = array<i32>} : memref<8x2x32xf32, #tpu.memory_space<vmem>>, vector<1x2x32xf32>,
    %c7_i32 = arith.constant 7 : i32
    %719 = arith.index_cast %c7_i32 : i32 to index
    %c0_175 = arith.constant 0 : index
    %c0_176 = arith.constant 0 : index
    %720 = vector.load %arg1[%719, %c0_175, %c0_176] : memref<8x2x64xf32, #tpu.memory_space<vmem>>, vector<1x2x64xf32>
    %721 = vector.shape_cast %720 : vector<1x2x64xf32> to vector<2x64xf32>
    %cst_177 = arith.constant dense<0.000000e+00> : vector<2x64xf32>
    %722 = tpu.matmul %647, %2, %cst_177 {dimension_numbers = #tpu.dot_dimension_numbers<[1], [0], [0], [1], [0, 0, 1, 1], [], []>} : vector<2x16xf32>, vector<16x64xf32>, vector<2x64xf32> -> vector<2x64xf32>
    %723 = arith.addf %721, %722 : vector<2x64xf32>
    %724 = vector.extract_strided_slice %723 {offsets = [0, 0], sizes = [2, 16], strides = [1, 1]} : vector<2x64xf32> to vector<2x16xf32>
    %725 = arith.negf %724 : vector<2x16xf32>
    %726 = math.exp %725 : vector<2x16xf32>
    %cst_178 = arith.constant 1.000000e+00 : f32
    %727 = vector.broadcast %cst_178 : f32 to vector<2x16xf32>
    %728 = arith.addf %727, %726 : vector<2x16xf32>
    %729 = arith.divf %727, %728 : vector<2x16xf32>
    %730 = vector.extract_strided_slice %723 {offsets = [0, 16], sizes = [2, 16], strides = [1, 1]} : vector<2x64xf32> to vector<2x16xf32>
    %731 = arith.negf %730 : vector<2x16xf32>
    %732 = math.exp %731 : vector<2x16xf32>
    %cst_179 = arith.constant 1.000000e+00 : f32
    %733 = vector.broadcast %cst_179 : f32 to vector<2x16xf32>
    %734 = arith.addf %733, %732 : vector<2x16xf32>
    %735 = arith.divf %733, %734 : vector<2x16xf32>
    %736 = vector.extract_strided_slice %723 {offsets = [0, 32], sizes = [2, 16], strides = [1, 1]} : vector<2x64xf32> to vector<2x16xf32>
    %737 = math.tanh %736 : vector<2x16xf32>
    %738 = vector.extract_strided_slice %723 {offsets = [0, 48], sizes = [2, 16], strides = [1, 1]} : vector<2x64xf32> to vector<2x16xf32>
    %739 = arith.negf %738 : vector<2x16xf32>
    %740 = math.exp %739 : vector<2x16xf32>
    %cst_180 = arith.constant 1.000000e+00 : f32
    %741 = vector.broadcast %cst_180 : f32 to vector<2x16xf32>
    %742 = arith.addf %741, %740 : vector<2x16xf32>
    %743 = arith.divf %741, %742 : vector<2x16xf32>
    %744 = arith.mulf %735, %645 : vector<2x16xf32>
    %745 = arith.mulf %729, %737 : vector<2x16xf32>
    %746 = arith.addf %744, %745 : vector<2x16xf32>
    %747 = math.tanh %746 : vector<2x16xf32>
    %748 = arith.mulf %743, %747 : vector<2x16xf32>
    %cst_181 = arith.constant dense<0.000000e+00> : vector<2x16xf32>
    %749 = tpu.matmul %748, %3, %cst_181 {dimension_numbers = #tpu.dot_dimension_numbers<[1], [0], [0], [1], [0, 0, 1, 1], [], []>} : vector<2x16xf32>, vector<16x16xf32>, vector<2x16xf32> -> vector<2x16xf32>
    %750 = vector.shape_cast %1 : vector<4x16xf32> to vector<1x4x16xf32>
    %751 = vector.shape_cast %749 : vector<2x16xf32> to vector<2x1x16xf32>
    %752 = vector.broadcast %750 : vector<1x4x16xf32> to vector<2x4x16xf32>
    %753 = vector.broadcast %751 : vector<2x1x16xf32> to vector<2x4x16xf32>
    %754 = arith.addf %752, %753 : vector<2x4x16xf32>
    %755 = math.tanh %754 : vector<2x4x16xf32>
    %756 = vector.shape_cast %4 : vector<1x16xf32> to vector<1x1x16xf32>
    %757 = vector.broadcast %756 : vector<1x1x16xf32> to vector<2x4x16xf32>
    %758 = arith.mulf %755, %757 : vector<2x4x16xf32>
    %cst_182 = arith.constant dense<0.000000e+00> : vector<2x4xf32>
    %759 = vector.multi_reduction <add>, %758, %cst_182 [2] : vector<2x4x16xf32> to vector<2x4xf32>
    %cst_183 = arith.constant dense<0xFF800000> : vector<2xf32>
    %760 = vector.multi_reduction <maximumf>, %759, %cst_183 [1] : vector<2x4xf32> to vector<2xf32>
    %761 = vector.shape_cast %760 : vector<2xf32> to vector<2x1xf32>
    %762 = vector.broadcast %761 : vector<2x1xf32> to vector<2x4xf32>
    %763 = arith.subf %759, %762 : vector<2x4xf32>
    %764 = math.exp %763 : vector<2x4xf32>
    %cst_184 = arith.constant dense<0.000000e+00> : vector<2xf32>
    %765 = vector.multi_reduction <add>, %764, %cst_184 [1] : vector<2x4xf32> to vector<2xf32>
    %766 = vector.shape_cast %765 : vector<2xf32> to vector<2x1xf32>
    %767 = tpu.reciprocal %766 {approx = true} : vector<2x1xf32> -> vector<2x1xf32>
    %768 = vector.broadcast %767 : vector<2x1xf32> to vector<2x4xf32>
    %769 = arith.mulf %764, %768 : vector<2x4xf32>
    %cst_185 = arith.constant dense<0.000000e+00> : vector<2x16xf32>
    %770 = tpu.matmul %769, %0, %cst_185 {dimension_numbers = #tpu.dot_dimension_numbers<[1], [0], [0], [1], [0, 0, 1, 1], [], []>} : vector<2x4xf32>, vector<4x16xf32>, vector<2x16xf32> -> vector<2x16xf32>
    %cst_186 = arith.constant dense<0.000000e+00> : vector<2x64xf32>
    %771 = tpu.matmul %770, %5, %cst_186 {dimension_numbers = #tpu.dot_dimension_numbers<[1], [0], [0], [1], [0, 0, 1, 1], [], []>} : vector<2x16xf32>, vector<16x64xf32>, vector<2x64xf32> -> vector<2x64xf32>
    %cst_187 = arith.constant dense<0.000000e+00> : vector<2x64xf32>
    %772 = tpu.matmul %748, %6, %cst_187 {dimension_numbers = #tpu.dot_dimension_numbers<[1], [0], [0], [1], [0, 0, 1, 1], [], []>} : vector<2x16xf32>, vector<16x64xf32>, vector<2x64xf32> -> vector<2x64xf32>
    %773 = arith.addf %771, %772 : vector<2x64xf32>
    %cst_188 = arith.constant dense<0.000000e+00> : vector<2x64xf32>
    %774 = tpu.matmul %701, %7, %cst_188 {dimension_numbers = #tpu.dot_dimension_numbers<[1], [0], [0], [1], [0, 0, 1, 1], [], []>} : vector<2x16xf32>, vector<16x64xf32>, vector<2x64xf32> -> vector<2x64xf32>
    %775 = arith.addf %773, %774 : vector<2x64xf32>
    %776 = vector.broadcast %8 : vector<1x64xf32> to vector<2x64xf32>
    %777 = arith.addf %775, %776 : vector<2x64xf32>
    %778 = vector.extract_strided_slice %777 {offsets = [0, 0], sizes = [2, 16], strides = [1, 1]} : vector<2x64xf32> to vector<2x16xf32>
    %779 = arith.negf %778 : vector<2x16xf32>
    %780 = math.exp %779 : vector<2x16xf32>
    %cst_189 = arith.constant 1.000000e+00 : f32
    %781 = vector.broadcast %cst_189 : f32 to vector<2x16xf32>
    %782 = arith.addf %781, %780 : vector<2x16xf32>
    %783 = arith.divf %781, %782 : vector<2x16xf32>
    %784 = vector.extract_strided_slice %777 {offsets = [0, 16], sizes = [2, 16], strides = [1, 1]} : vector<2x64xf32> to vector<2x16xf32>
    %785 = arith.negf %784 : vector<2x16xf32>
    %786 = math.exp %785 : vector<2x16xf32>
    %cst_190 = arith.constant 1.000000e+00 : f32
    %787 = vector.broadcast %cst_190 : f32 to vector<2x16xf32>
    %788 = arith.addf %787, %786 : vector<2x16xf32>
    %789 = arith.divf %787, %788 : vector<2x16xf32>
    %790 = vector.extract_strided_slice %777 {offsets = [0, 32], sizes = [2, 16], strides = [1, 1]} : vector<2x64xf32> to vector<2x16xf32>
    %791 = math.tanh %790 : vector<2x16xf32>
    %792 = vector.extract_strided_slice %777 {offsets = [0, 48], sizes = [2, 16], strides = [1, 1]} : vector<2x64xf32> to vector<2x16xf32>
    %793 = arith.negf %792 : vector<2x16xf32>
    %794 = math.exp %793 : vector<2x16xf32>
    %cst_191 = arith.constant 1.000000e+00 : f32
    %795 = vector.broadcast %cst_191 : f32 to vector<2x16xf32>
    %796 = arith.addf %795, %794 : vector<2x16xf32>
    %797 = arith.divf %795, %796 : vector<2x16xf32>
    %798 = arith.mulf %789, %699 : vector<2x16xf32>
    %799 = arith.mulf %783, %791 : vector<2x16xf32>
    %800 = arith.addf %798, %799 : vector<2x16xf32>
    %801 = math.tanh %800 : vector<2x16xf32>
    %802 = arith.mulf %797, %801 : vector<2x16xf32>
    %cst_192 = arith.constant dense<0.000000e+00> : vector<2x32xf32>
    %803 = tpu.matmul %802, %9, %cst_192 {dimension_numbers = #tpu.dot_dimension_numbers<[1], [0], [0], [1], [0, 0, 1, 1], [], []>} : vector<2x16xf32>, vector<16x32xf32>, vector<2x32xf32> -> vector<2x32xf32>
    %804 = vector.broadcast %10 : vector<1x32xf32> to vector<2x32xf32>
    %805 = arith.addf %803, %804 : vector<2x32xf32>
    %cst_193 = arith.constant dense<0xFF800000> : vector<2xf32>
    %806 = vector.multi_reduction <maximumf>, %805, %cst_193 [1] : vector<2x32xf32> to vector<2xf32>
    %807 = vector.shape_cast %806 : vector<2xf32> to vector<2x1xf32>
    %808 = vector.broadcast %807 : vector<2x1xf32> to vector<2x32xf32>
    %809 = arith.subf %805, %808 : vector<2x32xf32>
    %810 = math.exp %809 : vector<2x32xf32>
    %cst_194 = arith.constant dense<0.000000e+00> : vector<2xf32>
    %811 = vector.multi_reduction <add>, %810, %cst_194 [1] : vector<2x32xf32> to vector<2xf32>
    %812 = vector.shape_cast %811 : vector<2xf32> to vector<2x1xf32>
    %813 = tpu.reciprocal %812 {approx = true} : vector<2x1xf32> -> vector<2x1xf32>
    %814 = vector.broadcast %813 : vector<2x1xf32> to vector<2x32xf32>
    %815 = arith.mulf %810, %814 : vector<2x32xf32>
    %816 = arith.index_cast %c7_i32 : i32 to index
    %c0_195 = arith.constant 0 : index
    %c0_196 = arith.constant 0 : index
    %817 = vector.load %arg13[%816, %c0_195, %c0_196] : memref<8x2x32xf32, #tpu.memory_space<vmem>>, vector<1x2x32xf32>
    %818 = vector.shape_cast %817 : vector<1x2x32xf32> to vector<2x32xf32>
    %819 = vector.shape_cast %815 : vector<2x32xf32> to vector<1x2x32xf32>
    tpu.vector_store %arg13[%816, %c0_195, %c0_196], %819 {strides = array<i32>} : memref<8x2x32xf32, #tpu.memory_space<vmem>>, vector<1x2x32xf32>,
    %c8_i32 = arith.constant 8 : i32
    return
  }
  func.func @transform_0(%arg0: i32) -> (i32, i32, i32) {
    %c0_i32 = arith.constant 0 : i32
    %c0_i32_0 = arith.constant 0 : i32
    %c0_i32_1 = arith.constant 0 : i32
    %c0_i32_2 = arith.constant 0 : i32
    return %c0_i32, %c0_i32_0, %c0_i32_1 : i32, i32, i32
  }
  func.func @transform_1(%arg0: i32) -> (i32, i32) {
    %c0_i32 = arith.constant 0 : i32
    %c0_i32_0 = arith.constant 0 : i32
    %c0_i32_1 = arith.constant 0 : i32
    return %c0_i32, %c0_i32_0 : i32, i32
  }
  func.func @transform_2(%arg0: i32) -> (i32, i32) {
    %c0_i32 = arith.constant 0 : i32
    %c0_i32_0 = arith.constant 0 : i32
    %c0_i32_1 = arith.constant 0 : i32
    return %c0_i32, %c0_i32_0 : i32, i32
  }
  func.func @transform_3(%arg0: i32) -> (i32, i32) {
    %c0_i32 = arith.constant 0 : i32
    %c0_i32_0 = arith.constant 0 : i32
    %c0_i32_1 = arith.constant 0 : i32
    return %c0_i32, %c0_i32_0 : i32, i32
  }
  func.func @transform_4(%arg0: i32) -> (i32, i32) {
    %c0_i32 = arith.constant 0 : i32
    %c0_i32_0 = arith.constant 0 : i32
    %c0_i32_1 = arith.constant 0 : i32
    return %c0_i32, %c0_i32_0 : i32, i32
  }
  func.func @transform_5(%arg0: i32) -> (i32, i32) {
    %c0_i32 = arith.constant 0 : i32
    %c0_i32_0 = arith.constant 0 : i32
    %c0_i32_1 = arith.constant 0 : i32
    return %c0_i32, %c0_i32_0 : i32, i32
  }
  func.func @transform_6(%arg0: i32) -> (i32, i32) {
    %c0_i32 = arith.constant 0 : i32
    %c0_i32_0 = arith.constant 0 : i32
    %c0_i32_1 = arith.constant 0 : i32
    return %c0_i32, %c0_i32_0 : i32, i32
  }
  func.func @transform_7(%arg0: i32) -> (i32, i32) {
    %c0_i32 = arith.constant 0 : i32
    %c0_i32_0 = arith.constant 0 : i32
    %c0_i32_1 = arith.constant 0 : i32
    return %c0_i32, %c0_i32_0 : i32, i32
  }
  func.func @transform_8(%arg0: i32) -> (i32, i32) {
    %c0_i32 = arith.constant 0 : i32
    %c0_i32_0 = arith.constant 0 : i32
    %c0_i32_1 = arith.constant 0 : i32
    return %c0_i32, %c0_i32_0 : i32, i32
  }
  func.func @transform_9(%arg0: i32) -> (i32, i32) {
    %c0_i32 = arith.constant 0 : i32
    %c0_i32_0 = arith.constant 0 : i32
    %c0_i32_1 = arith.constant 0 : i32
    return %c0_i32, %c0_i32_0 : i32, i32
  }
  func.func @transform_10(%arg0: i32) -> (i32, i32) {
    %c0_i32 = arith.constant 0 : i32
    %c0_i32_0 = arith.constant 0 : i32
    %c0_i32_1 = arith.constant 0 : i32
    return %c0_i32, %c0_i32_0 : i32, i32
  }
  func.func @transform_11(%arg0: i32) -> (i32, i32) {
    %c0_i32 = arith.constant 0 : i32
    %c0_i32_0 = arith.constant 0 : i32
    %c0_i32_1 = arith.constant 0 : i32
    return %c0_i32, %c0_i32_0 : i32, i32
  }
  func.func @transform_12(%arg0: i32) -> (i32, i32, i32) {
    %c0_i32 = arith.constant 0 : i32
    %c0_i32_0 = arith.constant 0 : i32
    %c0_i32_1 = arith.constant 0 : i32
    %c0_i32_2 = arith.constant 0 : i32
    return %c0_i32, %c0_i32_0, %c0_i32_1 : i32, i32, i32
  }
}

</mosaic_0001>

<bundles_post_ra>
// kernel: tpu_custom_call.1
= control target key start
LH: loop header
LB: loop body
LE: loop exit
PB: predicated region body
PF: predicated region fallthrough
CT: control target
= control target key end

     0   :  { %17 = vsyncpa [#allocation3], 0  ;;  %s7977_s0 = inlined_call_operand.hbm [shape: f32[8,2,64], index: 0, kind: input, shape index: {}]   ;;  %s7978_s1 = inlined_call_operand.hbm [shape: f32[4,16], index: 1, kind: input, shape index: {}]   ;;  %s7979_s2 = inlined_call_operand.hbm [shape: f32[4,16], index: 2, kind: input, shape index: {}]   ;;  %s7980_s3 = inlined_call_operand.hbm [shape: f32[16,64], index: 3, kind: input, shape index: {}]   ;;  %s7981_s4 = inlined_call_operand.hbm [shape: f32[16,16], index: 4, kind: input, shape index: {}]   ;;  %s7982_s5 = inlined_call_operand.vmem [shape: f32[1,16], index: 5, kind: input, shape index: {}]   ;;  %s7983_s6 = inlined_call_operand.hbm [shape: f32[16,64], index: 6, kind: input, shape index: {}]   ;;  %s7984_s7 = inlined_call_operand.hbm [shape: f32[16,64], index: 7, kind: input, shape index: {}]   ;;  %s7985_s8 = inlined_call_operand.hbm [shape: f32[16,64], index: 8, kind: input, shape index: {}]   ;;  %s7986_s9 = inlined_call_operand.vmem [shape: f32[1,64], index: 9, kind: input, shape index: {}]   ;;  %s7987_s10 = inlined_call_operand.vmem [shape: f32[16,32], index: 10, kind: input, shape index: {}]   ;;  %s7988_s11 = inlined_call_operand.vmem [shape: f32[1,32], index: 11, kind: input, shape index: {}]   ;;  %s7989_s12 = inlined_call_operand.hbm [shape: f32[8,2,32], index: 12, kind: output, shape index: {}]  }
   0x1   :  { %18 = vsyncpa [#allocation6], 0 }
   0x2   :  { %19 = vsyncpa [#allocation9], 0 }
   0x3   :  { %20 = vsyncpa [#allocation12], 0 }
   0x4   :  { %21 = vsyncpa [#allocation15], 0 }
   0x5   :  { %22 = vsyncpa [#allocation4], 0  ;;  %s6911_s21 = smov [#allocation5]   ;;  %s6912_s23 = smov [#allocation8]  }
   0x6   :  { %s41_s22 = sshll.u32 %s6911_s21, 4  ;;  %s60_s24 = sshll.u32 %s6912_s23, 4  ;;  %s42_s22 = int_to_ptr.vmem [resolvable:$true] %s41_s22  ;;  %s61_s24 = int_to_ptr.vmem [resolvable:$true] %s60_s24 }
   0x7   :  { %s6727_s25 = scalar_lea.vmem %s42_s22, 64  ;;  %p6732_p1 = scmp.lt.s32.totalorder %s42_s22, %s42_s22 }
   0x8   :  { %p6728_p0 = scmp.ne.s32.totalorder %s42_s22, %s6727_s25  ;;  %p6733_p2 = scmp.lt.s32.totalorder %s6727_s25, %s6727_s25 }
   0xa   :  { %p6734_p3 = por %p6733_p2, %p6732_p1 }
   0xc   :  { %p6735_p4 = pnand %p6734_p3, %p6728_p0 }
   0xe   :  { %6738 = shalt.err (!%p6735_p4)
}
   0xf   :  { %44 = dma.hbm_to_vmem [thread:$0]  %s7978_s1, 64, %s42_s22, [#allocation6]  }
  0x10   :  { %s6747_s28 = scalar_lea.vmem %s61_s24, 256  ;;  %p6752_p6 = scmp.lt.s32.totalorder %s61_s24, %s61_s24 }
  0x11   :  { %p6748_p5 = scmp.ne.s32.totalorder %s61_s24, %s6747_s28  ;;  %p6753_p7 = scmp.lt.s32.totalorder %s6747_s28, %s6747_s28 }
  0x13   :  { %p6754_p8 = por %p6753_p7, %p6752_p6 }
  0x15   :  { %p6755_p9 = pnand %p6754_p8, %p6748_p5 }
  0x17   :  { %6758 = shalt.err (!%p6755_p9)
}
  0x18   :  { %s6913_s29 = smov 128   ;;  %s6914_s30 = smov 8  }
  0x19   :  { %66 = dma.hbm_to_vmem [thread:$0]  %s7980_s3, 256, %s61_s24, [#allocation9], %s6913_s29, %s6913_s29, %s6914_s30  }
  0x1a   :  { %s6915_s15 = smov [#allocation11]   ;;  %s6916_s17 = smov [#allocation2]  }
  0x1b   :  { %s86_s16 = sshll.u32 %s6915_s15, 4  ;;  %s28_s1 = sshll.u32 %s6916_s17, 4  ;;  %s87_s16 = int_to_ptr.vmem [resolvable:$true] %s86_s16  ;;  %s29_s1 = int_to_ptr.vmem [resolvable:$true] %s28_s1 }
  0x1c   :  { %s6767_s18 = scalar_lea.vmem %s87_s16, 256  ;;  %p6772_p11 = scmp.lt.s32.totalorder %s87_s16, %s87_s16 }
  0x1d   :  { %p6768_p10 = scmp.ne.s32.totalorder %s87_s16, %s6767_s18  ;;  %p6773_p12 = scmp.lt.s32.totalorder %s6767_s18, %s6767_s18 }
  0x1f   :  { %p6774_p13 = por %p6773_p12, %p6772_p11 }
  0x21   :  { %p6775_p0 = pnand %p6774_p13, %p6768_p10 }
  0x23   :  { %6778 = shalt.err (!%p6775_p0)
}
  0x24   :  { %92 = dma.hbm_to_vmem [thread:$0]  %s7983_s6, 256, %s87_s16, [#allocation12], %s6913_s29, %s6913_s29, %s6914_s30  }
  0x25   :  { %s6787_s3 = scalar_lea.vmem %s29_s1, 256  ;;  %p6792_p2 = scmp.lt.s32.totalorder %s29_s1, %s29_s1 }
  0x26   :  { %p6788_p1 = scmp.ne.s32.totalorder %s29_s1, %s6787_s3  ;;  %p6793_p3 = scmp.lt.s32.totalorder %s6787_s3, %s6787_s3 }
  0x28   :  { %p6794_p4 = por %p6793_p3, %p6792_p2 }
  0x2a   :  { %p6795_p5 = pnand %p6794_p4, %p6788_p1 }
  0x2c   :  { %6798 = shalt.err (!%p6795_p5)
}
  0x2d   :  { %s6917_s21 = smov 32   ;;  %s6918_s22 = smov 2  }
  0x2e   :  { %34 = dma.hbm_to_vmem [thread:$0]  %s7977_s0, 256, %s29_s1, [#allocation3], %s6917_s21, %s6917_s21, %s6918_s22  }
  0x2f   :  { %s6919_s25 = smov [#allocation7]   ;;  %s6920_s27 = smov [#allocation10]  }
  0x30   :  { %s51_s26 = sshll.u32 %s6919_s25, 4  ;;  %s72_s6 = sshll.u32 %s6920_s27, 4  ;;  %s52_s26 = int_to_ptr.vmem [resolvable:$true] %s51_s26  ;;  %s73_s6 = int_to_ptr.vmem [resolvable:$true] %s72_s6 }
  0x31   :  { %s6807_s28 = scalar_lea.vmem %s52_s26, 64  ;;  %p6812_p7 = scmp.lt.s32.totalorder %s52_s26, %s52_s26 }
  0x32   :  { %p6808_p6 = scmp.ne.s32.totalorder %s52_s26, %s6807_s28  ;;  %p6813_p8 = scmp.lt.s32.totalorder %s6807_s28, %s6807_s28 }
  0x34   :  { %p6814_p9 = por %p6813_p8, %p6812_p7 }
  0x36   :  { %p6815_p10 = pnand %p6814_p9, %p6808_p6 }
  0x38   :  { %6818 = shalt.err (!%p6815_p10)
}
  0x39   :  { %54 = dma.hbm_to_vmem [thread:$0]  %s7979_s2, 64, %s52_s26, [#allocation6]  }
  0x3a   :  { %s6827_s15 = scalar_lea.vmem %s73_s6, 256  ;;  %p6832_p12 = scmp.lt.s32.totalorder %s73_s6, %s73_s6 }
  0x3b   :  { %p6828_p11 = scmp.ne.s32.totalorder %s73_s6, %s6827_s15  ;;  %p6833_p13 = scmp.lt.s32.totalorder %s6827_s15, %s6827_s15 }
  0x3d   :  { %p6834_p0 = por %p6833_p13, %p6832_p12 }
  0x3f   :  { %p6835_p1 = pnand %p6834_p0, %p6828_p11 }
  0x41   :  { %6838 = shalt.err (!%p6835_p1)
}
  0x42   :  { %78 = dma.hbm_to_vmem [thread:$0]  %s7981_s4, 256, %s73_s6, [#allocation9], %s6913_s29, %s6913_s29, %s6914_s30  }
  0x43   :  { %s6921_s17 = smov [#allocation13]   ;;  %s6922_s18 = smov [#allocation14]  }
  0x44   :  { %s98_s1 = sshll.u32 %s6921_s17, 4  ;;  %s110_s19 = sshll.u32 %s6922_s18, 4  ;;  %s99_s1 = int_to_ptr.vmem [resolvable:$true] %s98_s1  ;;  %s111_s19 = int_to_ptr.vmem [resolvable:$true] %s110_s19 }
  0x45   :  { %s6847_s2 = scalar_lea.vmem %s99_s1, 256  ;;  %p6852_p3 = scmp.lt.s32.totalorder %s99_s1, %s99_s1 }
  0x46   :  { %p6848_p2 = scmp.ne.s32.totalorder %s99_s1, %s6847_s2  ;;  %p6853_p4 = scmp.lt.s32.totalorder %s6847_s2, %s6847_s2 }
  0x48   :  { %p6854_p5 = por %p6853_p4, %p6852_p3 }
  0x4a   :  { %p6855_p6 = pnand %p6854_p5, %p6848_p2 }
  0x4c   :  { %6858 = shalt.err (!%p6855_p6)
}
  0x4d   :  { %104 = dma.hbm_to_vmem [thread:$0]  %s7984_s7, 256, %s99_s1, [#allocation12], %s6913_s29, %s6913_s29, %s6914_s30  }
  0x4e   :  { %s6867_s4 = scalar_lea.vmem %s111_s19, 256  ;;  %p6872_p8 = scmp.lt.s32.totalorder %s111_s19, %s111_s19 }
  0x4f   :  { %p6868_p7 = scmp.ne.s32.totalorder %s111_s19, %s6867_s4  ;;  %p6873_p9 = scmp.lt.s32.totalorder %s6867_s4, %s6867_s4 }
  0x51   :  { %p6874_p10 = por %p6873_p9, %p6872_p8 }
  0x53   :  { %p6875_p11 = pnand %p6874_p10, %p6868_p7 }
  0x55   :  { %6878 = shalt.err (!%p6875_p11)
}
  0x56   :  { %116 = dma.hbm_to_vmem [thread:$0]  %s7985_s8, 256, %s111_s19, [#allocation15], %s6913_s29, %s6913_s29, %s6914_s30  }
  0x57   :  { %6899 = dma.done.wait [#allocation3], 256  }
  0x58   :  { %6900 = vsyncadd [#allocation3], 4294967040 }
  0x59   :  { %6901 = dma.done.wait [#allocation6], 128  }
  0x5a   :  { %6902 = vsyncadd [#allocation6], 4294967168 }
  0x5b   :  { %6903 = dma.done.wait [#allocation9], 512  }
  0x5c   :  { %6904 = vsyncadd [#allocation9], 4294966784 }
  0x5d   :  { %6905 = dma.done.wait [#allocation12], 512  }
  0x5e   :  { %6906 = vsyncadd [#allocation12], 4294966784 }
  0x5f   :  { %6907 = dma.done.wait [#allocation15], 256  }
  0x60   :  { %6908 = vsyncadd [#allocation15], 4294967040  ;;  %v6923_v0 = vmov 0.0   ;;  %vm6924_vm0 = vmmov 0   ;;  %v7044_v1 = vld [vmem:[#allocation8 + $0x8] sm:$0xff]  ;;  %v7046_v2 = vld [vmem:[#allocation8] sm:$0xff]  ;;  %v343_v29 = vlaneseq }
  0x61   :  { %6057 = vmatprep.subr.mxu0 %v6923_v0  ;;  %6061 = vmatprep.mubr.msk.f32.mxu0 %vm6924_vm0, %v6923_v0  ;;  %v164_v3 = vld [vmem:[#allocation2] sm:$0x3]  ;;  %s6925_s7 = smov 96   ;;  %s6926_s8 = smov 16   ;;  %v7060_v17 = vld [vmem:[#allocation10 + $0x8] sm:$0xff]  ;;  %v7062_v18 = vld [vmem:[#allocation10] sm:$0xff] }
  0x62   :  { %6064 = vmatprep.subr.mxu1 %v6923_v0  ;;  %6068 = vmatprep.mubr.msk.f32.mxu1 %vm6924_vm0, %v6923_v0  ;;  %s6927_s29 = smov 80   ;;  %vm165_vm1 = vcmask 130048   ;;  %v7070_v22 = vld [vmem:[#allocation13 + $0x8] sm:$0xff]  ;;  %v7073_v24 = vld [vmem:[#allocation13] sm:$0xff]  ;;  %v7079_v25 = vld [vmem:[#allocation14 + $0x8] sm:$0xff]  ;;  %v344_v31 = vshrl.u32 %v343_v29, 7 }
  0x63   :  { %6058 = vmatpush3.msra.mxu0 %v7044_v1  ;;  %6065 = vmatpush3.msra.mxu1 %v7060_v17  ;;  %v7084_v26 = vld [vmem:[#allocation14] sm:$0xff]  ;;  %v6928_v27 = vmov 1966171168   ;;  %v7108_v39 = vld [vmem:[#allocation7] sm:$0xf]  ;;  %vm384_vm2 = vcmask 125952  }
  0x64   :  { %6059 = vmatprep.subr.mxu0 %v6923_v0  ;;  %6066 = vmatprep.subr.mxu1 %v6923_v0  ;;  %v341_v28 = vunpack.c.l.s4 %v6928_v27  ;;  %v7105_v35 = vsub.s32 0, %v344_v31  ;;  %v7122_v51 = vld [vmem:[%s7982_s5] ss:$0 sm:$0xff]  ;;  %v394_v58 = vand.u32 127, %v343_v29  ;;  %vm403_vm3 = vcmask 1041409  }
  0x65   :  { %6060 = vmatpush3.msra.mxu0 %v7046_v2  ;;  %6067 = vmatpush3.msra.mxu1 %v7062_v18  ;;  %vm406_vm4 = vcmask 25600   ;;  %vm482_vm5 = vcmask 1043456   ;;  %vm479_vm6 = vcmask 31744   ;;  %vm882_vm7 = vcmask 254976  }
  0x66   :  { %6062 = vmatmul.mubr.f32.vlgmr.msra.gmra.mxu0 %v6923_v0  ;;  %6071 = vmatprep.subr.mxu0 %v6923_v0  ;;  %v342_v30 = vunpack.c.0.s8 %v341_v28  ;;  %v7128_v59 = vsub.s32 %v394_v58, %v344_v31 }
  0x67   :  { %6073 = vmatprep.mubr.msk.f32.mxu0 %vm6924_vm0, %v6923_v0  ;;  %6076 = vmatprep.subr.mxu1 %v6923_v0 }
  0x68   :  { %v7102_v32 = vsub.s32 %v342_v30, %v344_v31 }
 0x126   :  { %v235_v4 = vpop.f32.mrf.mxu0 }
 0x127   :  { %v239_v5 = vadd.f32 %v235_v4, %v164_v3 }
 0x128   :  { %v6063_v6 = vpop.f32.mrf.mxu0 }
 0x129   :  { %6455 = vtanh.f32 %v239_v5  ;;  %v5816_v8 = vmul.f32 -1.442695, %v239_v5  ;;  %v6929_v5 = vmov 0   ;;  %v7134_v6 = vsub.s32 1, %v344_v31 }
 0x12a   :  { %6454 = vset.pattern.permute.xlu1 %v6929_v5  ;;  %6453 = vset.pattern.permute.xlu0 %v6929_v5 }
 0x12b   :  { %6457 = vpow2.f32 %v5816_v8 }
 0x136   :  { %v6456_v7 = vpop.eup %6455 }
 0x137   :  { %249 = vrot.lane.b32.xlu0 %v6456_v7, %s6925_s7 }
 0x138   :  { %v6458_v9 = vpop.eup %6457 }
 0x139   :  { %v243_v10 = vadd.f32 1.0, %v6458_v9 }
 0x13b   :  { %6459 = vrcp.f32 %v243_v10 }
 0x148   :  { %v6460_v11 = vpop.eup %6459 }
 0x149   :  { %v247_v14 = vmul.f32 0.0, %v6460_v11 }
 0x1a9   :  { %v250_v12 = vpop.permute.xlu0 %249 }
 0x1aa   :  { %v252_v13 = vmul.f32 %v6460_v11, %v250_v12 }
 0x1ac   :  { %254 = vrot.lane.b32.xlu0 %v252_v13, %s6926_s8 }
 0x21e   :  { %v255_v15 = vpop.permute.xlu0 %254 }
 0x21f   :  { %v7057_v16 = vadd.f32 %v255_v15, %v247_v14 }
 0x221   :  { %6461 = vtanh.f32 %v7057_v16 }
 0x22e   :  { %v6462_v19 = vpop.eup %6461 }
 0x22f   :  { %260 = vrot.lane.b32.xlu1 %v6462_v19, %s6917_s21 }
 0x2a1   :  { %v261_v20 = vpop.permute.xlu1 %260 }
 0x2a2   :  { %v263_v21 = vmul.f32 %v6460_v11, %v261_v20 }
 0x2a4   :  { %265 = vrot.lane.b32.xlu1 %v263_v21, %s6927_s29 }
 0x316   :  { %v266_v23 = vpop.permute.xlu1 %265 }
 0x317   :  { %6069 = vmatmul.mubr.msk.f32.vlgmr.msra.gmra.mxu1 %vm165_vm1, %v266_v23 }
 0x318   :  { %6077 = vmatpush3.msra.mxu1 %v7070_v22  ;;  %6080 = vmatprep.mubr.msk.f32.mxu1 %vm6924_vm0, %v6923_v0 }
 0x319   :  { %6078 = vmatprep.subr.mxu1 %v6923_v0 }
 0x31a   :  { %6079 = vmatpush3.msra.mxu1 %v7073_v24 }
 0x31b   :  { %6081 = vmatmul.mubr.msk.f32.vlgmr.msra.gmra.mxu1 %vm165_vm1, %v266_v23  ;;  %6090 = vmatprep.subr.mxu1 %v6923_v0 }
 0x31c   :  { %6091 = vmatpush3.msra.mxu1 %v7079_v25  ;;  %6094 = vmatprep.mubr.msk.f32.mxu1 %vm6924_vm0, %v6923_v0 }
 0x31d   :  { %6092 = vmatprep.subr.mxu1 %v6923_v0 }
 0x31e   :  { %6093 = vmatpush3.msra.mxu1 %v7084_v26 }
 0x31f   :  { %6095 = vmatmul.mubr.f32.vlgmr.msra.gmra.mxu1 %v6923_v0  ;;  %6104 = vmatprep.subr.mxu1 %v6923_v0 }
 0x320   :  { %6105 = vmatpush3.msra.mxu1 %v7044_v1  ;;  %6108 = vmatprep.mubr.msk.f32.mxu1 %vm6924_vm0, %v6923_v0 }
 0x321   :  { %6106 = vmatprep.subr.mxu1 %v6923_v0 }
 0x322   :  { %6107 = vmatpush3.msra.mxu1 %v7046_v2 }
 0x323   :  { %6109 = vmatmul.mubr.msk.f32.vlgmr.msra.gmra.mxu1 %vm165_vm1, %v266_v23  ;;  %6118 = vmatprep.subr.mxu1 %v6923_v0  ;;  %v896_v23 = vld [vmem:[#allocation2 + $0x2] sm:$0x3] }
 0x324   :  { %6120 = vmatprep.mubr.msk.f32.mxu1 %vm6924_vm0, %v6923_v0 }
 0x3d7   :  { %v335_v33 = vpop.f32.mrf.mxu1 }
 0x3d8   :  { %v346_v34 = vrot.slane %v335_v33, %v7102_v32 }
 0x3d9   :  { %v6070_v36 = vpop.f32.mrf.mxu1 }
 0x3da   :  { %v347_v37 = vcombine.high %v346_v34, %v346_v34  ;;  %v354_v38 = vrot.slane %v346_v34, %v7102_v32 }
 0x3db   :  { %v7110_v40 = vpop.f32.mrf.mxu1 }
 0x3dc   :  { %v361_v41 = vrot.slane %v347_v37, %v7102_v32  ;;  %v365_v42 = vrot.slane %v354_v38, %v7105_v35 }
 0x3dd   :  { %v6082_v43 = vpop.f32.mrf.mxu1 }
 0x3de   :  { %v369_v44 = vrot.slane %v361_v41, %v7105_v35  ;;  %v372_v45 = vadd.f32 %v365_v42, %v7108_v39  ;;  %v7145_v41 = vld [vmem:[#allocation5] sm:$0xf] }
 0x3df   :  { %v7116_v46 = vpop.f32.mrf.mxu1  ;;  %6072 = vmatpush3.msk.msra.mxu0 %vm482_vm5, %v7145_v41  ;;  %6119 = vmatpush3.msk.msra.mxu1 %vm482_vm5, %v7145_v41 }
 0x3e0   :  { %v373_v47 = vadd.f32 %v369_v44, %v7108_v39  ;;  %6463 = vtanh.f32 %v372_v45  ;;  %6083 = vmatprep.subr.mxu0 %v6923_v0  ;;  %6130 = vmatprep.subr.mxu1 %v6923_v0 }
 0x3e1   :  { %v6096_v48 = vpop.f32.mrf.mxu1 }
 0x3e2   :  { %6465 = vtanh.f32 %v373_v47  ;;  %v7155_v48 = vld [vmem:[#allocation11 + $0x8] sm:$0xff] }
 0x3e3   :  { %v963_v49 = vpop.f32.mrf.mxu1 }
 0x3e4   :  { %v967_v29 = vadd.f32 %v963_v49, %v896_v23  ;;  %v7196_v23 = vld [vmem:[%s7987_s10] sm:$0xff] }
 0x3e5   :  { %v6110_v50 = vpop.f32.mrf.mxu1 }
 0x3e6   :  { %v7159_v50 = vld [vmem:[#allocation11] sm:$0xff] }
 0x3ed   :  { %v6464_v52 = vpop.eup %6463 }
 0x3ee   :  { %v382_v53 = vmul.f32 %v6464_v52, %v7122_v51 }
 0x3ef   :  { %v6466_v54 = vpop.eup %6465 }
 0x3f0   :  { %v385_v55 = vsel %vm384_vm2, %v382_v53, 0.0  ;;  %v383_v56 = vmul.f32 %v6466_v54, %v7122_v51 }
 0x3f1   :  { %386 = vadd.xlane.f32.xlu0 %v385_v55 }
 0x3f2   :  { %v388_v57 = vsel %vm384_vm2, %v383_v56, 0.0  ;;  %v7174_v56 = vld [vmem:[%s7986_s9] ss:$0 sm:$0xff] }
 0x3f3   :  { %389 = vadd.xlane.f32.xlu1 %v388_v57 }
 0x47a   :  { %v387_v60 = vpop.xlane.xlu0 %386 }
 0x47b   :  { %v398_v62 = vrot.slane %v387_v60, %v7128_v59 }
 0x47c   :  { %v390_v61 = vpop.xlane.xlu1 %389 }
 0x47d   :  { %v402_v63 = vrot.slane %v390_v61, %v7128_v59 }
 0x47f   :  { %v404_v3 = vsel %vm403_vm3, %v402_v63, %v398_v62  ;;  %v5828_v63 = vmul.f32 -1.442695, %v967_v29 }
 0x480   :  { %v407_v4 = vsel %vm406_vm4, %v404_v3, -inf }
 0x481   :  { %408 = vmax.xlane.f32.xlu0 %v407_v4 }
 0x50a   :  { %v409_v7 = vpop.xlane.xlu0 %408 }
 0x50b   :  { %v414_v8 = vrot.slane %v409_v7, %v7105_v35  ;;  %v418_v9 = vrot.slane %v409_v7, %v7134_v6 }
 0x50d   :  { %v421_v10 = vsub.f32 %v387_v60, %v414_v8  ;;  %v422_v11 = vsub.f32 %v390_v61, %v418_v9 }
 0x50f   :  { %v423_v12 = vmul.f32 1.442695, %v421_v10  ;;  %v425_v13 = vmul.f32 1.442695, %v422_v11 }
 0x511   :  { %6467 = vpow2.f32 %v423_v12 }
 0x512   :  { %6469 = vpow2.f32 %v425_v13 }
 0x513   :  { %6471 = vtanh.f32 %v967_v29 }
 0x51e   :  { %v6468_v14 = vpop.eup %6467 }
 0x51f   :  { %v6470_v15 = vpop.eup %6469  ;;  %430 = vperm.xlu0 %6453, %v6468_v14  }
 0x520   :  { %433 = vperm.xlu1 %6454, %v6470_v15   ;;  %v6472_v31 = vpop.eup %6471 }
 0x59a   :  { %v431_v19 = vpop.permute.xlu0 %430 }
 0x59b   :  { %v434_v20 = vpop.permute.xlu1 %433  ;;  %v438_v21 = vrot.slane %v431_v19, %v7128_v59 }
 0x59c   :  { %v442_v27 = vrot.slane %v434_v20, %v7128_v59 }
 0x59e   :  { %v443_v28 = vsel %vm403_vm3, %v442_v27, %v438_v21  ;;  %v7191_v21 = vld [vmem:[%s7987_s10 + $0x8] sm:$0xff] }
 0x59f   :  { %v445_v30 = vsel %vm406_vm4, %v443_v28, 0.0 }
 0x5a0   :  { %446 = vadd.xlane.f32.xlu1 %v445_v30 }
 0x5b1   :  { %977 = vrot.lane.b32.xlu1 %v6472_v31, %s6925_s7 }
 0x629   :  { %v447_v33 = vpop.xlane.xlu1 %446 }
 0x62a   :  { %6473 = vrcp.f32 %v447_v33 }
 0x637   :  { %v6474_v34 = vpop.eup %6473 }
 0x638   :  { %v453_v36 = vrot.slane %v6474_v34, %v7105_v35  ;;  %v457_v38 = vrot.slane %v6474_v34, %v7134_v6 }
 0x63a   :  { %v460_v37 = vmul.f32 %v6468_v14, %v453_v36  ;;  %v461_v42 = vmul.f32 %v6470_v15, %v457_v38 }
 0x63c   :  { %465 = vperm.xlu0 %6453, %v460_v37  }
 0x640   :  { %468 = vperm.xlu0 %6453, %v461_v42  }
 0x6b7   :  { %v466_v43 = vpop.permute.xlu0 %465 }
 0x6b8   :  { %v473_v45 = vrot.slane %v466_v43, %v7128_v59 }
 0x6bb   :  { %v469_v44 = vpop.permute.xlu0 %468 }
 0x6bc   :  { %v477_v47 = vrot.slane %v469_v44, %v7128_v59 }
 0x6be   :  { %v478_v49 = vsel %vm403_vm3, %v477_v47, %v473_v45 }
 0x6bf   :  { %6074 = vmatmul.mubr.msk.f32.vlgmr.msra.gmra.mxu0 %vm479_vm6, %v478_v49 }
 0x6c0   :  { %6084 = vmatpush3.msra.mxu0 %v7155_v48  ;;  %6087 = vmatprep.mubr.msk.f32.mxu0 %vm6924_vm0, %v6923_v0 }
 0x6c1   :  { %6085 = vmatprep.subr.mxu0 %v6923_v0 }
 0x6c2   :  { %6086 = vmatpush3.msra.mxu0 %v7159_v50 }
 0x6c3   :  { %6097 = vmatprep.subr.mxu0 %v6923_v0 }
 0x77f   :  { %v552_v52 = vpop.f32.mrf.mxu0 }
 0x780   :  { %6088 = vmatmul.mubr.msk.f32.vlgmr.msra.gmra.mxu0 %vm165_vm1, %v552_v52 }
 0x781   :  { %v6075_v53 = vpop.f32.mrf.mxu0  ;;  %6101 = vmatprep.mubr.msk.f32.mxu0 %vm6924_vm0, %v6923_v0  ;;  %6098 = vmatpush3.msra.mxu0 %v7191_v21 }
 0x782   :  { %6099 = vmatprep.subr.mxu0 %v6923_v0 }
 0x783   :  { %6100 = vmatpush3.msra.mxu0 %v7196_v23 }
 0x784   :  { %6111 = vmatprep.subr.mxu0 %v6923_v0 }
 0x840   :  { %v695_v54 = vpop.f32.mrf.mxu0 }
 0x841   :  { %v696_v55 = vadd.f32 %v695_v54, %v7110_v40 }
 0x842   :  { %v6089_v57 = vpop.f32.mrf.mxu0 }
 0x843   :  { %v769_v58 = vadd.f32 %v7116_v46, %v696_v55  ;;  %v978_v46 = vpop.permute.xlu1 %977 }
 0x845   :  { %v776_v60 = vadd.f32 %v7174_v56, %v769_v58 }
 0x847   :  { %6475 = vtanh.f32 %v776_v60  ;;  %v5824_v62 = vmul.f32 -1.442695, %v776_v60 }
 0x849   :  { %6477 = vpow2.f32 %v5824_v62 }
 0x84a   :  { %6479 = vpow2.f32 %v5828_v63 }
 0x854   :  { %v6476_v61 = vpop.eup %6475 }
 0x855   :  { %786 = vrot.lane.b32.xlu0 %v6476_v61, %s6925_s7 }
 0x856   :  { %v6478_v3 = vpop.eup %6477 }
 0x857   :  { %v780_v40 = vadd.f32 1.0, %v6478_v3  ;;  %v6480_v4 = vpop.eup %6479 }
 0x858   :  { %v971_v5 = vadd.f32 1.0, %v6480_v4 }
 0x859   :  { %6481 = vrcp.f32 %v780_v40 }
 0x85a   :  { %6483 = vrcp.f32 %v971_v5 }
 0x866   :  { %v6482_v7 = vpop.eup %6481 }
 0x867   :  { %v6484_v10 = vpop.eup %6483  ;;  %v784_v12 = vmul.f32 0.0, %v6482_v7 }
 0x868   :  { %v980_v11 = vmul.f32 %v6484_v10, %v978_v46  ;;  %v975_v15 = vmul.f32 %v6484_v10, %v7057_v16 }
 0x8c7   :  { %v787_v8 = vpop.permute.xlu0 %786 }
 0x8c8   :  { %v789_v9 = vmul.f32 %v6482_v7, %v787_v8 }
 0x8ca   :  { %791 = vrot.lane.b32.xlu0 %v789_v9, %s6926_s8 }
 0x8ce   :  { %982 = vrot.lane.b32.xlu0 %v980_v11, %s6926_s8 }
 0x93c   :  { %v792_v13 = vpop.permute.xlu0 %791 }
 0x93d   :  { %v7181_v14 = vadd.f32 %v792_v13, %v784_v12 }
 0x93f   :  { %6485 = vtanh.f32 %v7181_v14 }
 0x940   :  { %v983_v19 = vpop.permute.xlu0 %982 }
 0x941   :  { %v7185_v20 = vadd.f32 %v983_v19, %v975_v15 }
 0x943   :  { %6487 = vtanh.f32 %v7185_v20 }
 0x94c   :  { %v6486_v16 = vpop.eup %6485 }
 0x94d   :  { %797 = vrot.lane.b32.xlu0 %v6486_v16, %s6917_s21 }
 0x950   :  { %v6488_v27 = vpop.eup %6487 }
 0x951   :  { %988 = vrot.lane.b32.xlu0 %v6488_v27, %s6917_s21 }
 0x9bf   :  { %v798_v28 = vpop.permute.xlu0 %797 }
 0x9c0   :  { %v800_v29 = vmul.f32 %v6482_v7, %v798_v28 }
 0x9c2   :  { %808 = vrot.lane.b32.xlu1 %v800_v29, %s6927_s29 }
 0x9c3   :  { %v989_v30 = vpop.permute.xlu0 %988 }
 0x9c4   :  { %v991_v31 = vmul.f32 %v6484_v10, %v989_v30 }
 0x9c6   :  { %993 = vrot.lane.b32.xlu0 %v991_v31, %s6927_s29 }
 0xa34   :  { %v809_v33 = vpop.permute.xlu1 %808 }
 0xa35   :  { %6102 = vmatmul.mubr.msk.f32.vlgmr.msra.gmra.mxu0 %vm165_vm1, %v809_v33 }
 0xa36   :  { %6112 = vmatpush3.msra.mxu0 %v7060_v17  ;;  %6115 = vmatprep.mubr.msk.f32.mxu0 %vm6924_vm0, %v6923_v0 }
 0xa37   :  { %6113 = vmatprep.subr.mxu0 %v6923_v0 }
 0xa38   :  { %6114 = vmatpush3.msra.mxu0 %v7062_v18  ;;  %v994_v34 = vpop.permute.xlu0 %993 }
 0xa39   :  { %6116 = vmatmul.mubr.msk.f32.vlgmr.msra.gmra.mxu0 %vm165_vm1, %v994_v34  ;;  %6123 = vmatprep.subr.mxu0 %v6923_v0 }
 0xa3a   :  { %6124 = vmatpush3.msra.mxu0 %v7070_v22  ;;  %6127 = vmatprep.mubr.msk.f32.mxu0 %vm6924_vm0, %v6923_v0 }
 0xa3b   :  { %6125 = vmatprep.subr.mxu0 %v6923_v0 }
 0xa3c   :  { %6126 = vmatpush3.msra.mxu0 %v7073_v24 }
 0xa3d   :  { %6128 = vmatmul.mubr.msk.f32.vlgmr.msra.gmra.mxu0 %vm165_vm1, %v994_v34  ;;  %6137 = vmatprep.subr.mxu0 %v6923_v0 }
 0xa3e   :  { %6138 = vmatpush3.msra.mxu0 %v7079_v25  ;;  %6141 = vmatprep.mubr.msk.f32.mxu0 %vm6924_vm0, %v6923_v0 }
 0xa3f   :  { %6139 = vmatprep.subr.mxu0 %v6923_v0 }
 0xa40   :  { %6140 = vmatpush3.msra.mxu0 %v7084_v26 }
 0xa41   :  { %6142 = vmatmul.mubr.msk.f32.vlgmr.msra.gmra.mxu0 %vm165_vm1, %v809_v33  ;;  %6151 = vmatprep.subr.mxu0 %v6923_v0 }
 0xa42   :  { %6152 = vmatpush3.msra.mxu0 %v7044_v1  ;;  %6155 = vmatprep.mubr.msk.f32.mxu0 %vm6924_vm0, %v6923_v0 }
 0xa43   :  { %6153 = vmatprep.subr.mxu0 %v6923_v0 }
 0xa44   :  { %6154 = vmatpush3.msra.mxu0 %v7046_v2 }
 0xa45   :  { %6156 = vmatmul.mubr.msk.f32.vlgmr.msra.gmra.mxu0 %vm165_vm1, %v994_v34  ;;  %6165 = vmatprep.subr.mxu0 %v6923_v0 }
 0xa46   :  { %6166 = vmatpush3.msk.msra.mxu0 %vm482_vm5, %v7145_v41  ;;  %6167 = vmatprep.mubr.msk.f32.mxu0 %vm6924_vm0, %v6923_v0 }
 0xa47   :  { %6177 = vmatprep.subr.mxu0 %v6923_v0 }
 0xaf5   :  { %v7240_v36 = vpop.f32.mrf.mxu0 }
 0xaf7   :  { %v6103_v37 = vpop.f32.mrf.mxu0 }
 0xaf9   :  { %v1063_v38 = vpop.f32.mrf.mxu0 }
 0xafa   :  { %v1074_v42 = vrot.slane %v1063_v38, %v7102_v32 }
 0xafb   :  { %v6117_v43 = vpop.f32.mrf.mxu0 }
 0xafc   :  { %v1075_v44 = vcombine.high %v1074_v42, %v1074_v42  ;;  %v1082_v45 = vrot.slane %v1074_v42, %v7102_v32 }
 0xafd   :  { %v7244_v47 = vpop.f32.mrf.mxu0 }
 0xafe   :  { %v1089_v49 = vrot.slane %v1075_v44, %v7102_v32  ;;  %v1093_v52 = vrot.slane %v1082_v45, %v7105_v35 }
 0xaff   :  { %v6129_v53 = vpop.f32.mrf.mxu0 }
 0xb00   :  { %v1097_v54 = vrot.slane %v1089_v49, %v7105_v35  ;;  %v1100_v55 = vadd.f32 %v1093_v52, %v7108_v39 }
 0xb01   :  { %v7250_v57 = vpop.f32.mrf.mxu0 }
 0xb02   :  { %v1101_v58 = vadd.f32 %v1097_v54, %v7108_v39  ;;  %6489 = vtanh.f32 %v1100_v55 }
 0xb03   :  { %v6143_v60 = vpop.f32.mrf.mxu0 }
 0xb04   :  { %6491 = vtanh.f32 %v1101_v58 }
 0xb05   :  { %v7253_v61 = vpop.f32.mrf.mxu0 }
 0xb07   :  { %v6157_v62 = vpop.f32.mrf.mxu0 }
 0xb0f   :  { %v6490_v63 = vpop.eup %6489 }
 0xb10   :  { %v1104_v3 = vmul.f32 %v6490_v63, %v7122_v51 }
 0xb11   :  { %v6492_v40 = vpop.eup %6491 }
 0xb12   :  { %v1106_v4 = vsel %vm384_vm2, %v1104_v3, 0.0  ;;  %v1105_v5 = vmul.f32 %v6492_v40, %v7122_v51 }
 0xb13   :  { %1107 = vadd.xlane.f32.xlu1 %v1106_v4 }
 0xb14   :  { %v1109_v7 = vsel %vm384_vm2, %v1105_v5, 0.0 }
 0xb15   :  { %1110 = vadd.xlane.f32.xlu0 %v1109_v7 }
 0xb9c   :  { %v1108_v8 = vpop.xlane.xlu1 %1107 }
 0xb9d   :  { %v1117_v46 = vrot.slane %v1108_v8, %v7128_v59 }
 0xb9e   :  { %v1111_v9 = vpop.xlane.xlu0 %1110 }
 0xb9f   :  { %v1121_v10 = vrot.slane %v1111_v9, %v7128_v59 }
 0xba1   :  { %v1122_v11 = vsel %vm403_vm3, %v1121_v10, %v1117_v46 }
 0xba2   :  { %v1124_v12 = vsel %vm406_vm4, %v1122_v11, -inf }
 0xba3   :  { %1125 = vmax.xlane.f32.xlu0 %v1124_v12 }
 0xc2c   :  { %v1126_v13 = vpop.xlane.xlu0 %1125 }
 0xc2d   :  { %v1131_v15 = vrot.slane %v1126_v13, %v7105_v35  ;;  %v1135_v19 = vrot.slane %v1126_v13, %v7134_v6 }
 0xc2f   :  { %v1138_v16 = vsub.f32 %v1108_v8, %v1131_v15  ;;  %v1139_v27 = vsub.f32 %v1111_v9, %v1135_v19  ;;  %v1596_v9 = vld [vmem:[#allocation2 + $0x4] sm:$0x3] }
 0xc30   :  { %v1667_v10 = vadd.f32 %v7253_v61, %v1596_v9 }
 0xc31   :  { %v1140_v28 = vmul.f32 1.442695, %v1138_v16  ;;  %v1142_v29 = vmul.f32 1.442695, %v1139_v27 }
 0xc32   :  { %v5838_v15 = vmul.f32 -1.442695, %v1667_v10 }
 0xc33   :  { %6493 = vpow2.f32 %v1140_v28 }
 0xc34   :  { %6495 = vpow2.f32 %v1142_v29 }
 0xc40   :  { %v6494_v30 = vpop.eup %6493 }
 0xc41   :  { %v6496_v31 = vpop.eup %6495  ;;  %1147 = vperm.xlu0 %6453, %v6494_v30  }
 0xc42   :  { %1150 = vperm.xlu1 %6454, %v6496_v31  }
 0xcbc   :  { %v1148_v33 = vpop.permute.xlu0 %1147 }
 0xcbd   :  { %v1151_v34 = vpop.permute.xlu1 %1150  ;;  %v1155_v37 = vrot.slane %v1148_v33, %v7128_v59 }
 0xcbe   :  { %v1159_v38 = vrot.slane %v1151_v34, %v7128_v59 }
 0xcc0   :  { %v1160_v42 = vsel %vm403_vm3, %v1159_v38, %v1155_v37 }
 0xcc1   :  { %v1162_v43 = vsel %vm406_vm4, %v1160_v42, 0.0 }
 0xcc2   :  { %1163 = vadd.xlane.f32.xlu1 %v1162_v43 }
 0xd4b   :  { %v1164_v44 = vpop.xlane.xlu1 %1163 }
 0xd4c   :  { %6497 = vrcp.f32 %v1164_v44 }
 0xd59   :  { %v6498_v45 = vpop.eup %6497 }
 0xd5a   :  { %v1170_v49 = vrot.slane %v6498_v45, %v7105_v35  ;;  %v1174_v53 = vrot.slane %v6498_v45, %v7134_v6 }
 0xd5c   :  { %v1177_v52 = vmul.f32 %v6494_v30, %v1170_v49  ;;  %v1178_v54 = vmul.f32 %v6496_v31, %v1174_v53 }
 0xd5e   :  { %1182 = vperm.xlu0 %6453, %v1177_v52  }
 0xd62   :  { %1185 = vperm.xlu0 %6453, %v1178_v54  }
 0xdd9   :  { %v1183_v55 = vpop.permute.xlu0 %1182 }
 0xdda   :  { %v1190_v60 = vrot.slane %v1183_v55, %v7128_v59 }
 0xddd   :  { %v1186_v58 = vpop.permute.xlu0 %1185 }
 0xdde   :  { %v1194_v62 = vrot.slane %v1186_v58, %v7128_v59 }
 0xde0   :  { %v1195_v63 = vsel %vm403_vm3, %v1194_v62, %v1190_v60 }
 0xde1   :  { %6121 = vmatmul.mubr.msk.f32.vlgmr.msra.gmra.mxu1 %vm479_vm6, %v1195_v63 }
 0xde2   :  { %6131 = vmatpush3.msra.mxu1 %v7155_v48  ;;  %6134 = vmatprep.mubr.msk.f32.mxu1 %vm6924_vm0, %v6923_v0 }
 0xde3   :  { %6132 = vmatprep.subr.mxu1 %v6923_v0 }
 0xde4   :  { %6133 = vmatpush3.msra.mxu1 %v7159_v50 }
 0xde5   :  { %6144 = vmatprep.subr.mxu1 %v6923_v0 }
 0xea1   :  { %v1264_v3 = vpop.f32.mrf.mxu1 }
 0xea2   :  { %6135 = vmatmul.mubr.msk.f32.vlgmr.msra.gmra.mxu1 %vm165_vm1, %v1264_v3 }
 0xea3   :  { %v6122_v40 = vpop.f32.mrf.mxu1  ;;  %6145 = vmatpush3.msra.mxu1 %v7191_v21  ;;  %6148 = vmatprep.mubr.msk.f32.mxu1 %vm6924_vm0, %v6923_v0 }
 0xea4   :  { %6146 = vmatprep.subr.mxu1 %v6923_v0 }
 0xea5   :  { %6147 = vmatpush3.msra.mxu1 %v7196_v23 }
 0xea6   :  { %6158 = vmatprep.subr.mxu1 %v6923_v0 }
 0xf62   :  { %v1407_v4 = vpop.f32.mrf.mxu1 }
 0xf63   :  { %v1408_v5 = vadd.f32 %v1407_v4, %v7244_v47 }
 0xf64   :  { %v6136_v7 = vpop.f32.mrf.mxu1 }
 0xf65   :  { %v1481_v8 = vadd.f32 %v7250_v57, %v1408_v5 }
 0xf67   :  { %v1482_v46 = vadd.f32 %v7174_v56, %v1481_v8 }
 0xf69   :  { %6499 = vtanh.f32 %v1482_v46  ;;  %v5835_v13 = vmul.f32 -1.442695, %v1482_v46 }
 0xf6a   :  { %6501 = vtanh.f32 %v1667_v10 }
 0xf6b   :  { %6503 = vpow2.f32 %v5835_v13 }
 0xf6c   :  { %6505 = vpow2.f32 %v5838_v15 }
 0xf76   :  { %v6500_v11 = vpop.eup %6499 }
 0xf77   :  { %1492 = vrot.lane.b32.xlu0 %v6500_v11, %s6925_s7  ;;  %v6502_v12 = vpop.eup %6501 }
 0xf78   :  { %v6504_v47 = vpop.eup %6503 }
 0xf79   :  { %v1486_v19 = vadd.f32 1.0, %v6504_v47  ;;  %v6506_v57 = vpop.eup %6505 }
 0xf7a   :  { %v1671_v16 = vadd.f32 1.0, %v6506_v57 }
 0xf7b   :  { %1677 = vrot.lane.b32.xlu0 %v6502_v12, %s6925_s7  ;;  %6507 = vrcp.f32 %v1486_v19 }
 0xf7c   :  { %6509 = vrcp.f32 %v1671_v16 }
 0xf88   :  { %v6508_v27 = vpop.eup %6507 }
 0xf89   :  { %v6510_v29 = vpop.eup %6509  ;;  %v1490_v33 = vmul.f32 %v6508_v27, %v7181_v14 }
 0xf8a   :  { %v1675_v38 = vmul.f32 %v6510_v29, %v7185_v20 }
 0xfe9   :  { %v1493_v61 = vpop.permute.xlu0 %1492 }
 0xfea   :  { %v1495_v28 = vmul.f32 %v6508_v27, %v1493_v61 }
 0xfec   :  { %1497 = vrot.lane.b32.xlu0 %v1495_v28, %s6926_s8 }
 0xfed   :  { %v1678_v30 = vpop.permute.xlu0 %1677 }
 0xfee   :  { %v1680_v31 = vmul.f32 %v6510_v29, %v1678_v30 }
 0xff0   :  { %1682 = vrot.lane.b32.xlu0 %v1680_v31, %s6926_s8 }
0x105e   :  { %v1498_v34 = vpop.permute.xlu0 %1497 }
0x105f   :  { %v7297_v37 = vadd.f32 %v1498_v34, %v1490_v33 }
0x1061   :  { %6511 = vtanh.f32 %v7297_v37 }
0x1062   :  { %v1683_v42 = vpop.permute.xlu0 %1682 }
0x1063   :  { %v7301_v43 = vadd.f32 %v1683_v42, %v1675_v38 }
0x1065   :  { %6513 = vtanh.f32 %v7301_v43 }
0x106e   :  { %v6512_v44 = vpop.eup %6511 }
0x106f   :  { %1503 = vrot.lane.b32.xlu0 %v6512_v44, %s6917_s21 }
0x1072   :  { %v6514_v45 = vpop.eup %6513 }
0x1073   :  { %1688 = vrot.lane.b32.xlu0 %v6514_v45, %s6917_s21 }
0x10e1   :  { %v1504_v49 = vpop.permute.xlu0 %1503 }
0x10e2   :  { %v1506_v14 = vmul.f32 %v6508_v27, %v1504_v49 }
0x10e4   :  { %1508 = vrot.lane.b32.xlu1 %v1506_v14, %s6927_s29 }
0x10e5   :  { %v1689_v52 = vpop.permute.xlu0 %1688 }
0x10e6   :  { %v1691_v53 = vmul.f32 %v6510_v29, %v1689_v52 }
0x10e8   :  { %1693 = vrot.lane.b32.xlu0 %v1691_v53, %s6927_s29 }
0x1156   :  { %v1509_v20 = vpop.permute.xlu1 %1508 }
0x1157   :  { %6149 = vmatmul.mubr.msk.f32.vlgmr.msra.gmra.mxu1 %vm165_vm1, %v1509_v20 }
0x1158   :  { %6159 = vmatpush3.msra.mxu1 %v7060_v17  ;;  %6162 = vmatprep.mubr.msk.f32.mxu1 %vm6924_vm0, %v6923_v0 }
0x1159   :  { %6160 = vmatprep.subr.mxu1 %v6923_v0 }
0x115a   :  { %6161 = vmatpush3.msra.mxu1 %v7062_v18  ;;  %v1694_v54 = vpop.permute.xlu0 %1693 }
0x115b   :  { %6163 = vmatmul.mubr.msk.f32.vlgmr.msra.gmra.mxu1 %vm165_vm1, %v1694_v54  ;;  %6170 = vmatprep.subr.mxu1 %v6923_v0 }
0x115c   :  { %6171 = vmatpush3.msra.mxu1 %v7070_v22  ;;  %6174 = vmatprep.mubr.msk.f32.mxu1 %vm6924_vm0, %v6923_v0 }
0x115d   :  { %6172 = vmatprep.subr.mxu1 %v6923_v0 }
0x115e   :  { %6173 = vmatpush3.msra.mxu1 %v7073_v24 }
0x115f   :  { %6175 = vmatmul.mubr.msk.f32.vlgmr.msra.gmra.mxu1 %vm165_vm1, %v1694_v54  ;;  %6184 = vmatprep.subr.mxu1 %v6923_v0 }
0x1160   :  { %6185 = vmatpush3.msra.mxu1 %v7079_v25  ;;  %6188 = vmatprep.mubr.msk.f32.mxu1 %vm6924_vm0, %v6923_v0 }
0x1161   :  { %6186 = vmatprep.subr.mxu1 %v6923_v0 }
0x1162   :  { %6187 = vmatpush3.msra.mxu1 %v7084_v26 }
0x1163   :  { %6189 = vmatmul.mubr.msk.f32.vlgmr.msra.gmra.mxu1 %vm165_vm1, %v1509_v20  ;;  %6198 = vmatprep.subr.mxu1 %v6923_v0 }
0x1164   :  { %6199 = vmatpush3.msra.mxu1 %v7044_v1  ;;  %6202 = vmatprep.mubr.msk.f32.mxu1 %vm6924_vm0, %v6923_v0 }
0x1165   :  { %6200 = vmatprep.subr.mxu1 %v6923_v0 }
0x1166   :  { %6201 = vmatpush3.msra.mxu1 %v7046_v2 }
0x1167   :  { %6203 = vmatmul.mubr.msk.f32.vlgmr.msra.gmra.mxu1 %vm165_vm1, %v1694_v54  ;;  %6212 = vmatprep.subr.mxu1 %v6923_v0 }
0x1168   :  { %6213 = vmatpush3.msk.msra.mxu1 %vm482_vm5, %v7145_v41  ;;  %6214 = vmatprep.mubr.msk.f32.mxu1 %vm6924_vm0, %v6923_v0 }
0x1169   :  { %6224 = vmatprep.subr.mxu1 %v6923_v0 }
0x1217   :  { %v7342_v1 = vpop.f32.mrf.mxu1 }
0x1219   :  { %v6150_v17 = vpop.f32.mrf.mxu1 }
0x121b   :  { %v1763_v18 = vpop.f32.mrf.mxu1 }
0x121c   :  { %v1774_v22 = vrot.slane %v1763_v18, %v7102_v32 }
0x121d   :  { %v6164_v24 = vpop.f32.mrf.mxu1 }
0x121e   :  { %v1775_v2 = vcombine.high %v1774_v22, %v1774_v22  ;;  %v1782_v25 = vrot.slane %v1774_v22, %v7102_v32 }
0x121f   :  { %v7346_v26 = vpop.f32.mrf.mxu1 }
0x1220   :  { %v1789_v55 = vrot.slane %v1775_v2, %v7102_v32  ;;  %v1793_v58 = vrot.slane %v1782_v25, %v7105_v35 }
0x1221   :  { %v6176_v60 = vpop.f32.mrf.mxu1 }
0x1222   :  { %v1797_v62 = vrot.slane %v1789_v55, %v7105_v35  ;;  %v1800_v63 = vadd.f32 %v1793_v58, %v7108_v39 }
0x1223   :  { %v7352_v3 = vpop.f32.mrf.mxu1 }
0x1224   :  { %v1801_v40 = vadd.f32 %v1797_v62, %v7108_v39  ;;  %6515 = vtanh.f32 %v1800_v63 }
0x1225   :  { %v6190_v4 = vpop.f32.mrf.mxu1 }
0x1226   :  { %6517 = vtanh.f32 %v1801_v40 }
0x1227   :  { %v7355_v5 = vpop.f32.mrf.mxu1 }
0x1229   :  { %v6204_v7 = vpop.f32.mrf.mxu1 }
0x122a   :  { %v2296_v7 = vld [vmem:[#allocation2 + $0x6] sm:$0x3] }
0x1231   :  { %v6516_v8 = vpop.eup %6515 }
0x1232   :  { %v1804_v9 = vmul.f32 %v6516_v8, %v7122_v51 }
0x1233   :  { %v6518_v46 = vpop.eup %6517 }
0x1234   :  { %v1806_v10 = vsel %vm384_vm2, %v1804_v9, 0.0  ;;  %v1805_v11 = vmul.f32 %v6518_v46, %v7122_v51  ;;  %v2367_v9 = vadd.f32 %v7355_v5, %v2296_v7  ;;  %v7469_v7 = vld [vmem:[#allocation7] sm:$0xf] }
0x1235   :  { %1807 = vadd.xlane.f32.xlu0 %v1806_v10 }
0x1236   :  { %v1809_v12 = vsel %vm384_vm2, %v1805_v11, 0.0 }
0x1237   :  { %1810 = vadd.xlane.f32.xlu1 %v1809_v12  ;;  %v5848_v12 = vmul.f32 -1.442695, %v2367_v9 }
0x12be   :  { %v1808_v13 = vpop.xlane.xlu0 %1807 }
0x12bf   :  { %v1817_v15 = vrot.slane %v1808_v13, %v7128_v59 }
0x12c0   :  { %v1811_v39 = vpop.xlane.xlu1 %1810 }
0x12c1   :  { %v1821_v47 = vrot.slane %v1811_v39, %v7128_v59 }
0x12c3   :  { %v1822_v19 = vsel %vm403_vm3, %v1821_v47, %v1817_v15 }
0x12c4   :  { %v1824_v57 = vsel %vm406_vm4, %v1822_v19, -inf }
0x12c5   :  { %1825 = vmax.xlane.f32.xlu0 %v1824_v57 }
0x134e   :  { %v1826_v16 = vpop.xlane.xlu0 %1825 }
0x134f   :  { %v1831_v27 = vrot.slane %v1826_v16, %v7105_v35  ;;  %v1835_v61 = vrot.slane %v1826_v16, %v7134_v6 }
0x1351   :  { %v1838_v28 = vsub.f32 %v1808_v13, %v1831_v27  ;;  %v1839_v29 = vsub.f32 %v1811_v39, %v1835_v61 }
0x1353   :  { %v1840_v30 = vmul.f32 1.442695, %v1838_v28  ;;  %v1842_v31 = vmul.f32 1.442695, %v1839_v29 }
0x1355   :  { %6519 = vpow2.f32 %v1840_v30 }
0x1356   :  { %6521 = vpow2.f32 %v1842_v31 }
0x1362   :  { %v6520_v33 = vpop.eup %6519 }
0x1363   :  { %v6522_v34 = vpop.eup %6521  ;;  %1847 = vperm.xlu0 %6453, %v6520_v33  }
0x1364   :  { %1850 = vperm.xlu1 %6454, %v6522_v34  }
0x13de   :  { %v1848_v38 = vpop.permute.xlu0 %1847 }
0x13df   :  { %v1851_v42 = vpop.permute.xlu1 %1850  ;;  %v1855_v44 = vrot.slane %v1848_v38, %v7128_v59 }
0x13e0   :  { %v1859_v45 = vrot.slane %v1851_v42, %v7128_v59 }
0x13e2   :  { %v1860_v49 = vsel %vm403_vm3, %v1859_v45, %v1855_v44  ;;  %v7411_v45 = vld [vmem:[#allocation10 + $0x8] sm:$0xff] }
0x13e3   :  { %v1862_v14 = vsel %vm406_vm4, %v1860_v49, 0.0  ;;  %v7417_v49 = vld [vmem:[#allocation10] sm:$0xff] }
0x13e4   :  { %1863 = vadd.xlane.f32.xlu0 %v1862_v14 }
0x146d   :  { %v1864_v52 = vpop.xlane.xlu0 %1863 }
0x146e   :  { %6523 = vrcp.f32 %v1864_v52  ;;  %v7422_v52 = vld [vmem:[#allocation13 + $0x8] sm:$0xff] }
0x147b   :  { %v6524_v53 = vpop.eup %6523 }
0x147c   :  { %v1870_v20 = vrot.slane %v6524_v53, %v7105_v35  ;;  %v1874_v17 = vrot.slane %v6524_v53, %v7134_v6  ;;  %v7428_v53 = vld [vmem:[#allocation13] sm:$0xff] }
0x147e   :  { %v1877_v54 = vmul.f32 %v6520_v33, %v1870_v20  ;;  %v1878_v18 = vmul.f32 %v6522_v34, %v1874_v17  ;;  %v7433_v20 = vld [vmem:[#allocation14 + $0x8] sm:$0xff] }
0x147f   :  { %v7444_v17 = vld [vmem:[#allocation8 + $0x8] sm:$0xff] }
0x1480   :  { %1882 = vperm.xlu1 %6454, %v1877_v54   ;;  %v7439_v54 = vld [vmem:[#allocation14] sm:$0xff] }
0x1484   :  { %1885 = vperm.xlu1 %6454, %v1878_v18   ;;  %v7450_v18 = vld [vmem:[#allocation8] sm:$0xff] }
0x14fb   :  { %v1883_v22 = vpop.permute.xlu1 %1882 }
0x14fc   :  { %v1890_v2 = vrot.slane %v1883_v22, %v7128_v59 }
0x14ff   :  { %v1886_v24 = vpop.permute.xlu1 %1885 }
0x1500   :  { %v1894_v25 = vrot.slane %v1886_v24, %v7128_v59 }
0x1502   :  { %v1895_v55 = vsel %vm403_vm3, %v1894_v25, %v1890_v2 }
0x1503   :  { %6168 = vmatmul.mubr.msk.f32.vlgmr.msra.gmra.mxu0 %vm479_vm6, %v1895_v55 }
0x1504   :  { %6178 = vmatpush3.msra.mxu0 %v7155_v48  ;;  %6181 = vmatprep.mubr.msk.f32.mxu0 %vm6924_vm0, %v6923_v0 }
0x1505   :  { %6179 = vmatprep.subr.mxu0 %v6923_v0 }
0x1506   :  { %6180 = vmatpush3.msra.mxu0 %v7159_v50 }
0x1507   :  { %6191 = vmatprep.subr.mxu0 %v6923_v0 }
0x15c3   :  { %v1964_v58 = vpop.f32.mrf.mxu0 }
0x15c4   :  { %6182 = vmatmul.mubr.msk.f32.vlgmr.msra.gmra.mxu0 %vm165_vm1, %v1964_v58 }
0x15c5   :  { %v6169_v60 = vpop.f32.mrf.mxu0  ;;  %6192 = vmatpush3.msra.mxu0 %v7191_v21  ;;  %6195 = vmatprep.mubr.msk.f32.mxu0 %vm6924_vm0, %v6923_v0 }
0x15c6   :  { %6193 = vmatprep.subr.mxu0 %v6923_v0 }
0x15c7   :  { %6194 = vmatpush3.msra.mxu0 %v7196_v23 }
0x15c8   :  { %6205 = vmatprep.subr.mxu0 %v6923_v0 }
0x1684   :  { %v2107_v62 = vpop.f32.mrf.mxu0 }
0x1685   :  { %v2108_v63 = vadd.f32 %v2107_v62, %v7346_v26 }
0x1686   :  { %v6183_v40 = vpop.f32.mrf.mxu0 }
0x1687   :  { %v2181_v4 = vadd.f32 %v7352_v3, %v2108_v63 }
0x1689   :  { %v2182_v8 = vadd.f32 %v7174_v56, %v2181_v4 }
0x168b   :  { %6525 = vtanh.f32 %v2182_v8  ;;  %v5845_v11 = vmul.f32 -1.442695, %v2182_v8 }
0x168c   :  { %6527 = vtanh.f32 %v2367_v9 }
0x168d   :  { %6529 = vpow2.f32 %v5845_v11 }
0x168e   :  { %6531 = vpow2.f32 %v5848_v12 }
0x1698   :  { %v6526_v46 = vpop.eup %6525 }
0x1699   :  { %2192 = vrot.lane.b32.xlu1 %v6526_v46, %s6925_s7  ;;  %v6528_v10 = vpop.eup %6527 }
0x169a   :  { %v6530_v26 = vpop.eup %6529 }
0x169b   :  { %v2186_v13 = vadd.f32 1.0, %v6530_v26  ;;  %v6532_v3 = vpop.eup %6531 }
0x169c   :  { %v2371_v39 = vadd.f32 1.0, %v6532_v3 }
0x169d   :  { %2377 = vrot.lane.b32.xlu1 %v6528_v10, %s6925_s7  ;;  %6533 = vrcp.f32 %v2186_v13 }
0x169e   :  { %6535 = vrcp.f32 %v2371_v39 }
0x16aa   :  { %v6534_v15 = vpop.eup %6533 }
0x16ab   :  { %v6536_v19 = vpop.eup %6535  ;;  %v2190_v27 = vmul.f32 %v6534_v15, %v7297_v37 }
0x16ac   :  { %v2375_v29 = vmul.f32 %v6536_v19, %v7301_v43 }
0x170b   :  { %v2193_v5 = vpop.permute.xlu1 %2192 }
0x170c   :  { %v2195_v47 = vmul.f32 %v6534_v15, %v2193_v5 }
0x170e   :  { %2197 = vrot.lane.b32.xlu1 %v2195_v47, %s6926_s8 }
0x170f   :  { %v2378_v57 = vpop.permute.xlu1 %2377 }
0x1710   :  { %v2380_v16 = vmul.f32 %v6536_v19, %v2378_v57 }
0x1712   :  { %2382 = vrot.lane.b32.xlu1 %v2380_v16, %s6926_s8 }
0x1780   :  { %v2198_v61 = vpop.permute.xlu1 %2197 }
0x1781   :  { %v7399_v28 = vadd.f32 %v2198_v61, %v2190_v27 }
0x1783   :  { %6537 = vtanh.f32 %v7399_v28 }
0x1784   :  { %v2383_v30 = vpop.permute.xlu1 %2382 }
0x1785   :  { %v7403_v31 = vadd.f32 %v2383_v30, %v2375_v29 }
0x1787   :  { %6539 = vtanh.f32 %v7403_v31 }
0x1790   :  { %v6538_v33 = vpop.eup %6537 }
0x1791   :  { %2203 = vrot.lane.b32.xlu0 %v6538_v33, %s6917_s21 }
0x1794   :  { %v6540_v34 = vpop.eup %6539 }
0x1795   :  { %2388 = vrot.lane.b32.xlu1 %v6540_v34, %s6917_s21 }
0x1803   :  { %v2204_v38 = vpop.permute.xlu0 %2203 }
0x1804   :  { %v2206_v37 = vmul.f32 %v6534_v15, %v2204_v38  ;;  %v7482_v15 = vld [vmem:[%s7982_s5] ss:$0 sm:$0xff] }
0x1806   :  { %2208 = vrot.lane.b32.xlu1 %v2206_v37, %s6927_s29 }
0x1807   :  { %v2389_v42 = vpop.permute.xlu1 %2388 }
0x1808   :  { %v2391_v44 = vmul.f32 %v6536_v19, %v2389_v42 }
0x180a   :  { %2393 = vrot.lane.b32.xlu1 %v2391_v44, %s6927_s29 }
0x1878   :  { %v2209_v43 = vpop.permute.xlu1 %2208 }
0x1879   :  { %6196 = vmatmul.mubr.msk.f32.vlgmr.msra.gmra.mxu0 %vm165_vm1, %v2209_v43 }
0x187a   :  { %6206 = vmatpush3.msra.mxu0 %v7411_v45  ;;  %6209 = vmatprep.mubr.msk.f32.mxu0 %vm6924_vm0, %v6923_v0 }
0x187b   :  { %6207 = vmatprep.subr.mxu0 %v6923_v0 }
0x187c   :  { %6208 = vmatpush3.msra.mxu0 %v7417_v49  ;;  %v2394_v14 = vpop.permute.xlu1 %2393 }
0x187d   :  { %6210 = vmatmul.mubr.msk.f32.vlgmr.msra.gmra.mxu0 %vm165_vm1, %v2394_v14  ;;  %6217 = vmatprep.subr.mxu0 %v6923_v0 }
0x187e   :  { %6218 = vmatpush3.msra.mxu0 %v7422_v52  ;;  %6221 = vmatprep.mubr.msk.f32.mxu0 %vm6924_vm0, %v6923_v0 }
0x187f   :  { %6219 = vmatprep.subr.mxu0 %v6923_v0 }
0x1880   :  { %6220 = vmatpush3.msra.mxu0 %v7428_v53 }
0x1881   :  { %6222 = vmatmul.mubr.msk.f32.vlgmr.msra.gmra.mxu0 %vm165_vm1, %v2394_v14  ;;  %6231 = vmatprep.subr.mxu0 %v6923_v0 }
0x1882   :  { %6232 = vmatpush3.msra.mxu0 %v7433_v20  ;;  %6235 = vmatprep.mubr.msk.f32.mxu0 %vm6924_vm0, %v6923_v0 }
0x1883   :  { %6233 = vmatprep.subr.mxu0 %v6923_v0 }
0x1884   :  { %6234 = vmatpush3.msra.mxu0 %v7439_v54 }
0x1885   :  { %6236 = vmatmul.mubr.msk.f32.vlgmr.msra.gmra.mxu0 %vm165_vm1, %v2209_v43  ;;  %6245 = vmatprep.subr.mxu0 %v6923_v0 }
0x1886   :  { %6246 = vmatpush3.msra.mxu0 %v7444_v17  ;;  %6249 = vmatprep.mubr.msk.f32.mxu0 %vm6924_vm0, %v6923_v0 }
0x1887   :  { %6247 = vmatprep.subr.mxu0 %v6923_v0 }
0x1888   :  { %6248 = vmatpush3.msra.mxu0 %v7450_v18 }
0x1889   :  { %6250 = vmatmul.mubr.msk.f32.vlgmr.msra.gmra.mxu0 %vm165_vm1, %v2394_v14  ;;  %6259 = vmatprep.subr.mxu0 %v6923_v0 }
0x188a   :  { %6260 = vmatpush3.msk.msra.mxu0 %vm482_vm5, %v7145_v41  ;;  %6261 = vmatprep.mubr.msk.f32.mxu0 %vm6924_vm0, %v6923_v0 }
0x188b   :  { %6271 = vmatprep.subr.mxu0 %v6923_v0 }
0x1939   :  { %v7460_v22 = vpop.f32.mrf.mxu0 }
0x193b   :  { %v6197_v24 = vpop.f32.mrf.mxu0 }
0x193d   :  { %v2463_v2 = vpop.f32.mrf.mxu0 }
0x193e   :  { %v2474_v25 = vrot.slane %v2463_v2, %v7102_v32 }
0x193f   :  { %v6211_v55 = vpop.f32.mrf.mxu0 }
0x1940   :  { %v2475_v58 = vcombine.high %v2474_v25, %v2474_v25  ;;  %v2482_v60 = vrot.slane %v2474_v25, %v7102_v32 }
0x1941   :  { %v7464_v62 = vpop.f32.mrf.mxu0 }
0x1942   :  { %v2489_v63 = vrot.slane %v2475_v58, %v7102_v32  ;;  %v2493_v41 = vrot.slane %v2482_v60, %v7105_v35 }
0x1943   :  { %v6223_v40 = vpop.f32.mrf.mxu0 }
0x1944   :  { %v2497_v4 = vrot.slane %v2489_v63, %v7105_v35  ;;  %v2500_v8 = vadd.f32 %v7469_v7, %v2493_v41 }
0x1945   :  { %v7472_v9 = vpop.f32.mrf.mxu0 }
0x1946   :  { %v2501_v46 = vadd.f32 %v7469_v7, %v2497_v4  ;;  %6541 = vtanh.f32 %v2500_v8 }
0x1947   :  { %v6237_v10 = vpop.f32.mrf.mxu0 }
0x1948   :  { %6543 = vtanh.f32 %v2501_v46 }
0x1949   :  { %v7475_v11 = vpop.f32.mrf.mxu0 }
0x194b   :  { %v6251_v12 = vpop.f32.mrf.mxu0 }
0x1953   :  { %v6542_v26 = vpop.eup %6541 }
0x1954   :  { %v2504_v13 = vmul.f32 %v6542_v26, %v7122_v51 }
0x1955   :  { %v6544_v3 = vpop.eup %6543 }
0x1956   :  { %v2506_v39 = vsel %vm384_vm2, %v2504_v13, 0.0  ;;  %v2505_v5 = vmul.f32 %v7482_v15, %v6544_v3 }
0x1957   :  { %2507 = vadd.xlane.f32.xlu1 %v2506_v39 }
0x1958   :  { %v2509_v47 = vsel %vm384_vm2, %v2505_v5, 0.0 }
0x1959   :  { %2510 = vadd.xlane.f32.xlu0 %v2509_v47 }
0x19e0   :  { %v2508_v19 = vpop.xlane.xlu1 %2507 }
0x19e1   :  { %v2517_v16 = vrot.slane %v2508_v19, %v7128_v59 }
0x19e2   :  { %v2511_v57 = vpop.xlane.xlu0 %2510 }
0x19e3   :  { %v2521_v51 = vrot.slane %v2511_v57, %v7128_v59 }
0x19e5   :  { %v2522_v27 = vsel %vm403_vm3, %v2521_v51, %v2517_v16 }
0x19e6   :  { %v2524_v61 = vsel %vm406_vm4, %v2522_v27, -inf }
0x19e7   :  { %2525 = vmax.xlane.f32.xlu1 %v2524_v61 }
0x1a70   :  { %v2526_v29 = vpop.xlane.xlu1 %2525 }
0x1a71   :  { %v2531_v30 = vrot.slane %v2526_v29, %v7105_v35  ;;  %v2535_v33 = vrot.slane %v2526_v29, %v7134_v6 }
0x1a73   :  { %v2538_v34 = vsub.f32 %v2508_v19, %v2531_v30  ;;  %v2539_v38 = vsub.f32 %v2511_v57, %v2535_v33  ;;  %v2996_v19 = vld [vmem:[#allocation2 + $0x8] sm:$0x3] }
0x1a75   :  { %v2540_v37 = vmul.f32 1.442695, %v2538_v34  ;;  %v2542_v42 = vmul.f32 1.442695, %v2539_v38 }
0x1a77   :  { %6545 = vpow2.f32 %v2540_v37 }
0x1a78   :  { %6547 = vpow2.f32 %v2542_v42 }
0x1a84   :  { %v6546_v44 = vpop.eup %6545 }
0x1a85   :  { %v6548_v43 = vpop.eup %6547  ;;  %2547 = vperm.xlu0 %6453, %v6546_v44  }
0x1a86   :  { %2550 = vperm.xlu1 %6454, %v6548_v43  }
0x1b00   :  { %v2548_v14 = vpop.permute.xlu0 %2547 }
0x1b01   :  { %v2551_v24 = vpop.permute.xlu1 %2550  ;;  %v2555_v2 = vrot.slane %v2548_v14, %v7128_v59 }
0x1b02   :  { %v2559_v25 = vrot.slane %v2551_v24, %v7128_v59 }
0x1b04   :  { %v2560_v55 = vsel %vm403_vm3, %v2559_v25, %v2555_v2 }
0x1b05   :  { %v2562_v58 = vsel %vm406_vm4, %v2560_v55, 0.0 }
0x1b06   :  { %2563 = vadd.xlane.f32.xlu1 %v2562_v58 }
0x1b8f   :  { %v2564_v60 = vpop.xlane.xlu1 %2563 }
0x1b90   :  { %6549 = vrcp.f32 %v2564_v60 }
0x1b9d   :  { %v6550_v63 = vpop.eup %6549 }
0x1b9e   :  { %v2570_v41 = vrot.slane %v6550_v63, %v7105_v35  ;;  %v2574_v4 = vrot.slane %v6550_v63, %v7134_v6 }
0x1ba0   :  { %v2577_v40 = vmul.f32 %v6546_v44, %v2570_v41  ;;  %v2578_v8 = vmul.f32 %v6548_v43, %v2574_v4  ;;  %v7564_v41 = vld [vmem:[#allocation5] sm:$0xf] }
0x1ba2   :  { %2582 = vperm.xlu0 %6453, %v2577_v40  }
0x1ba6   :  { %2585 = vperm.xlu0 %6453, %v2578_v8  }
0x1c1d   :  { %v2583_v46 = vpop.permute.xlu0 %2582 }
0x1c1e   :  { %v2590_v12 = vrot.slane %v2583_v46, %v7128_v59 }
0x1c21   :  { %v2586_v10 = vpop.permute.xlu0 %2585 }
0x1c22   :  { %v2594_v26 = vrot.slane %v2586_v10, %v7128_v59 }
0x1c24   :  { %v2595_v13 = vsel %vm403_vm3, %v2594_v26, %v2590_v12 }
0x1c25   :  { %6215 = vmatmul.mubr.msk.f32.vlgmr.msra.gmra.mxu1 %vm479_vm6, %v2595_v13 }
0x1c26   :  { %6225 = vmatpush3.msra.mxu1 %v7155_v48  ;;  %6228 = vmatprep.mubr.msk.f32.mxu1 %vm6924_vm0, %v6923_v0 }
0x1c27   :  { %6226 = vmatprep.subr.mxu1 %v6923_v0 }
0x1c28   :  { %6227 = vmatpush3.msra.mxu1 %v7159_v50 }
0x1c29   :  { %6238 = vmatprep.subr.mxu1 %v6923_v0 }
0x1ce5   :  { %v2664_v3 = vpop.f32.mrf.mxu1 }
0x1ce6   :  { %6229 = vmatmul.mubr.msk.f32.vlgmr.msra.gmra.mxu1 %vm165_vm1, %v2664_v3 }
0x1ce7   :  { %v6216_v39 = vpop.f32.mrf.mxu1  ;;  %6239 = vmatpush3.msra.mxu1 %v7191_v21  ;;  %6242 = vmatprep.mubr.msk.f32.mxu1 %vm6924_vm0, %v6923_v0  ;;  %v3067_v21 = vadd.f32 %v7475_v11, %v2996_v19 }
0x1ce8   :  { %6240 = vmatprep.subr.mxu1 %v6923_v0 }
0x1ce9   :  { %6241 = vmatpush3.msra.mxu1 %v7196_v23  ;;  %v5858_v27 = vmul.f32 -1.442695, %v3067_v21 }
0x1cea   :  { %6252 = vmatprep.subr.mxu1 %v6923_v0 }
0x1da6   :  { %v2807_v48 = vpop.f32.mrf.mxu1 }
0x1da7   :  { %v2808_v50 = vadd.f32 %v2807_v48, %v7464_v62 }
0x1da8   :  { %v6230_v5 = vpop.f32.mrf.mxu1 }
0x1da9   :  { %v2881_v47 = vadd.f32 %v7472_v9, %v2808_v50 }
0x1dab   :  { %v2882_v57 = vadd.f32 %v7174_v56, %v2881_v47 }
0x1dad   :  { %6551 = vtanh.f32 %v2882_v57  ;;  %v5855_v23 = vmul.f32 -1.442695, %v2882_v57 }
0x1dae   :  { %6553 = vtanh.f32 %v3067_v21 }
0x1daf   :  { %6555 = vpow2.f32 %v5855_v23 }
0x1db0   :  { %6557 = vpow2.f32 %v5858_v27 }
0x1dba   :  { %v6552_v16 = vpop.eup %6551 }
0x1dbb   :  { %2892 = vrot.lane.b32.xlu0 %v6552_v16, %s6925_s7  ;;  %v6554_v51 = vpop.eup %6553 }
0x1dbc   :  { %v6556_v62 = vpop.eup %6555 }
0x1dbd   :  { %v2886_v61 = vadd.f32 1.0, %v6556_v62  ;;  %v6558_v9 = vpop.eup %6557 }
0x1dbe   :  { %v3071_v29 = vadd.f32 1.0, %v6558_v9 }
0x1dbf   :  { %3077 = vrot.lane.b32.xlu0 %v6554_v51, %s6925_s7  ;;  %6559 = vrcp.f32 %v2886_v61 }
0x1dc0   :  { %6561 = vrcp.f32 %v3071_v29 }
0x1dcc   :  { %v6560_v56 = vpop.eup %6559 }
0x1dcd   :  { %v6562_v33 = vpop.eup %6561  ;;  %v2890_v37 = vmul.f32 %v6560_v56, %v7399_v28 }
0x1dce   :  { %v3075_v43 = vmul.f32 %v6562_v33, %v7403_v31 }
0x1e2d   :  { %v2893_v11 = vpop.permute.xlu0 %2892 }
0x1e2e   :  { %v2895_v30 = vmul.f32 %v6560_v56, %v2893_v11 }
0x1e30   :  { %2897 = vrot.lane.b32.xlu0 %v2895_v30, %s6926_s8 }
0x1e31   :  { %v3078_v34 = vpop.permute.xlu0 %3077 }
0x1e32   :  { %v3080_v38 = vmul.f32 %v6562_v33, %v3078_v34 }
0x1e34   :  { %3082 = vrot.lane.b32.xlu0 %v3080_v38, %s6926_s8 }
0x1ea2   :  { %v2898_v42 = vpop.permute.xlu0 %2897 }
0x1ea3   :  { %v7524_v44 = vadd.f32 %v2898_v42, %v2890_v37 }
0x1ea5   :  { %6563 = vtanh.f32 %v7524_v44 }
0x1ea6   :  { %v3083_v14 = vpop.permute.xlu0 %3082 }
0x1ea7   :  { %v7528_v24 = vadd.f32 %v3083_v14, %v3075_v43 }
0x1ea9   :  { %6565 = vtanh.f32 %v7528_v24 }
0x1eb2   :  { %v6564_v2 = vpop.eup %6563 }
0x1eb3   :  { %2903 = vrot.lane.b32.xlu0 %v6564_v2, %s6917_s21 }
0x1eb6   :  { %v6566_v25 = vpop.eup %6565 }
0x1eb7   :  { %3088 = vrot.lane.b32.xlu0 %v6566_v25, %s6917_s21 }
0x1f25   :  { %v2904_v55 = vpop.permute.xlu0 %2903 }
0x1f26   :  { %v2906_v28 = vmul.f32 %v6560_v56, %v2904_v55 }
0x1f28   :  { %2908 = vrot.lane.b32.xlu1 %v2906_v28, %s6927_s29 }
0x1f29   :  { %v3089_v58 = vpop.permute.xlu0 %3088 }
0x1f2a   :  { %v3091_v60 = vmul.f32 %v6562_v33, %v3089_v58 }
0x1f2c   :  { %3093 = vrot.lane.b32.xlu0 %v3091_v60, %s6927_s29 }
0x1f9a   :  { %v2909_v31 = vpop.permute.xlu1 %2908 }
0x1f9b   :  { %6243 = vmatmul.mubr.msk.f32.vlgmr.msra.gmra.mxu1 %vm165_vm1, %v2909_v31 }
0x1f9c   :  { %6253 = vmatpush3.msra.mxu1 %v7411_v45  ;;  %6256 = vmatprep.mubr.msk.f32.mxu1 %vm6924_vm0, %v6923_v0 }
0x1f9d   :  { %6254 = vmatprep.subr.mxu1 %v6923_v0 }
0x1f9e   :  { %6255 = vmatpush3.msra.mxu1 %v7417_v49  ;;  %v3094_v63 = vpop.permute.xlu0 %3093 }
0x1f9f   :  { %6257 = vmatmul.mubr.msk.f32.vlgmr.msra.gmra.mxu1 %vm165_vm1, %v3094_v63  ;;  %6264 = vmatprep.subr.mxu1 %v6923_v0 }
0x1fa0   :  { %6265 = vmatpush3.msra.mxu1 %v7422_v52  ;;  %6268 = vmatprep.mubr.msk.f32.mxu1 %vm6924_vm0, %v6923_v0 }
0x1fa1   :  { %6266 = vmatprep.subr.mxu1 %v6923_v0 }
0x1fa2   :  { %6267 = vmatpush3.msra.mxu1 %v7428_v53 }
0x1fa3   :  { %6269 = vmatmul.mubr.msk.f32.vlgmr.msra.gmra.mxu1 %vm165_vm1, %v3094_v63  ;;  %6278 = vmatprep.subr.mxu1 %v6923_v0 }
0x1fa4   :  { %6279 = vmatpush3.msra.mxu1 %v7433_v20  ;;  %6282 = vmatprep.mubr.msk.f32.mxu1 %vm6924_vm0, %v6923_v0 }
0x1fa5   :  { %6280 = vmatprep.subr.mxu1 %v6923_v0 }
0x1fa6   :  { %6281 = vmatpush3.msra.mxu1 %v7439_v54 }
0x1fa7   :  { %6283 = vmatmul.mubr.msk.f32.vlgmr.msra.gmra.mxu1 %vm165_vm1, %v2909_v31  ;;  %6292 = vmatprep.subr.mxu1 %v6923_v0 }
0x1fa8   :  { %6293 = vmatpush3.msra.mxu1 %v7444_v17  ;;  %6296 = vmatprep.mubr.msk.f32.mxu1 %vm6924_vm0, %v6923_v0 }
0x1fa9   :  { %6294 = vmatprep.subr.mxu1 %v6923_v0 }
0x1faa   :  { %6295 = vmatpush3.msra.mxu1 %v7450_v18 }
0x1fab   :  { %6297 = vmatmul.mubr.msk.f32.vlgmr.msra.gmra.mxu1 %vm165_vm1, %v3094_v63  ;;  %6306 = vmatprep.subr.mxu1 %v6923_v0 }
0x1fac   :  { %6307 = vmatpush3.msk.msra.mxu1 %vm482_vm5, %v7564_v41  ;;  %6308 = vmatprep.mubr.msk.f32.mxu1 %vm6924_vm0, %v6923_v0 }
0x1fad   :  { %6318 = vmatprep.subr.mxu1 %v6923_v0 }
0x205b   :  { %v7571_v40 = vpop.f32.mrf.mxu1 }
0x205d   :  { %v6244_v4 = vpop.f32.mrf.mxu1 }
0x205f   :  { %v3163_v8 = vpop.f32.mrf.mxu1 }
0x2060   :  { %v3174_v46 = vrot.slane %v3163_v8, %v7102_v32 }
0x2061   :  { %v6258_v10 = vpop.f32.mrf.mxu1 }
0x2062   :  { %v3175_v12 = vcombine.high %v3174_v46, %v3174_v46  ;;  %v3182_v26 = vrot.slane %v3174_v46, %v7102_v32 }
0x2063   :  { %v7575_v13 = vpop.f32.mrf.mxu1 }
0x2064   :  { %v3189_v3 = vrot.slane %v3175_v12, %v7102_v32  ;;  %v3193_v39 = vrot.slane %v3182_v26, %v7105_v35 }
0x2065   :  { %v6270_v48 = vpop.f32.mrf.mxu1 }
0x2066   :  { %v3197_v50 = vrot.slane %v3189_v3, %v7105_v35  ;;  %v3200_v5 = vadd.f32 %v7469_v7, %v3193_v39 }
0x2067   :  { %v7581_v47 = vpop.f32.mrf.mxu1 }
0x2068   :  { %v3201_v19 = vadd.f32 %v7469_v7, %v3197_v50  ;;  %6567 = vtanh.f32 %v3200_v5 }
0x2069   :  { %v6284_v57 = vpop.f32.mrf.mxu1 }
0x206a   :  { %6569 = vtanh.f32 %v3201_v19 }
0x206b   :  { %v7584_v21 = vpop.f32.mrf.mxu1 }
0x206d   :  { %v6298_v16 = vpop.f32.mrf.mxu1 }
0x206e   :  { %v7606_v16 = vld [vmem:[#allocation11 + $0x8] sm:$0xff] }
0x2075   :  { %v6568_v51 = vpop.eup %6567 }
0x2076   :  { %v3204_v23 = vmul.f32 %v7482_v15, %v6568_v51  ;;  %v7612_v51 = vld [vmem:[#allocation11] sm:$0xff] }
0x2077   :  { %v6570_v27 = vpop.eup %6569 }
0x2078   :  { %v3206_v62 = vsel %vm384_vm2, %v3204_v23, 0.0  ;;  %v3205_v61 = vmul.f32 %v7482_v15, %v6570_v27 }
0x2079   :  { %3207 = vadd.xlane.f32.xlu0 %v3206_v62  ;;  %v7620_v62 = vld [vmem:[%s7987_s10 + $0x8] sm:$0xff] }
0x207a   :  { %v3209_v9 = vsel %vm384_vm2, %v3205_v61, 0.0  ;;  %v7629_v61 = vld [vmem:[%s7987_s10] sm:$0xff] }
0x207b   :  { %3210 = vadd.xlane.f32.xlu1 %v3209_v9 }
0x2102   :  { %v3208_v29 = vpop.xlane.xlu0 %3207 }
0x2103   :  { %v3217_v11 = vrot.slane %v3208_v29, %v7128_v59 }
0x2104   :  { %v3211_v56 = vpop.xlane.xlu1 %3210 }
0x2105   :  { %v3221_v30 = vrot.slane %v3211_v56, %v7128_v59 }
0x2107   :  { %v3222_v33 = vsel %vm403_vm3, %v3221_v30, %v3217_v11  ;;  %v3696_v30 = vld [vmem:[#allocation2 + $0xa] sm:$0x3] }
0x2108   :  { %v3224_v34 = vsel %vm406_vm4, %v3222_v33, -inf  ;;  %v7638_v33 = vld [vmem:[%s7986_s9] ss:$0 sm:$0xff] }
0x2109   :  { %3225 = vmax.xlane.f32.xlu0 %v3224_v34 }
0x2192   :  { %v3226_v38 = vpop.xlane.xlu0 %3225 }
0x2193   :  { %v3231_v37 = vrot.slane %v3226_v38, %v7105_v35  ;;  %v3235_v42 = vrot.slane %v3226_v38, %v7134_v6  ;;  %v3767_v38 = vadd.f32 %v7584_v21, %v3696_v30 }
0x2195   :  { %v3238_v43 = vsub.f32 %v3208_v29, %v3231_v37  ;;  %v3239_v14 = vsub.f32 %v3211_v56, %v3235_v42 }
0x2197   :  { %v3240_v2 = vmul.f32 1.442695, %v3238_v43  ;;  %v3242_v25 = vmul.f32 1.442695, %v3239_v14 }
0x2199   :  { %6571 = vpow2.f32 %v3240_v2 }
0x219a   :  { %6573 = vpow2.f32 %v3242_v25 }
0x21a6   :  { %v6572_v55 = vpop.eup %6571 }
0x21a7   :  { %v6574_v28 = vpop.eup %6573  ;;  %3247 = vperm.xlu0 %6453, %v6572_v55  }
0x21a8   :  { %3250 = vperm.xlu1 %6454, %v6574_v28  }
0x2222   :  { %v3248_v58 = vpop.permute.xlu0 %3247 }
0x2223   :  { %v3251_v60 = vpop.permute.xlu1 %3250  ;;  %v3255_v31 = vrot.slane %v3248_v58, %v7128_v59 }
0x2224   :  { %v3259_v63 = vrot.slane %v3251_v60, %v7128_v59 }
0x2226   :  { %v3260_v4 = vsel %vm403_vm3, %v3259_v63, %v3255_v31 }
0x2227   :  { %v3262_v8 = vsel %vm406_vm4, %v3260_v4, 0.0 }
0x2228   :  { %3263 = vadd.xlane.f32.xlu0 %v3262_v8 }
0x22b1   :  { %v3264_v46 = vpop.xlane.xlu0 %3263 }
0x22b2   :  { %6575 = vrcp.f32 %v3264_v46 }
0x22bf   :  { %v6576_v10 = vpop.eup %6575 }
0x22c0   :  { %v3270_v12 = vrot.slane %v6576_v10, %v7105_v35  ;;  %v3274_v3 = vrot.slane %v6576_v10, %v7134_v6 }
0x22c2   :  { %v3277_v26 = vmul.f32 %v6572_v55, %v3270_v12  ;;  %v3278_v39 = vmul.f32 %v6574_v28, %v3274_v3 }
0x22c4   :  { %3282 = vperm.xlu1 %6454, %v3277_v26  }
0x22c8   :  { %3285 = vperm.xlu1 %6454, %v3278_v39  }
0x233f   :  { %v3283_v48 = vpop.permute.xlu1 %3282 }
0x2340   :  { %v3290_v5 = vrot.slane %v3283_v48, %v7128_v59 }
0x2343   :  { %v3286_v50 = vpop.permute.xlu1 %3285 }
0x2344   :  { %v3294_v19 = vrot.slane %v3286_v50, %v7128_v59 }
0x2346   :  { %v3295_v57 = vsel %vm403_vm3, %v3294_v19, %v3290_v5 }
0x2347   :  { %6262 = vmatmul.mubr.msk.f32.vlgmr.msra.gmra.mxu0 %vm479_vm6, %v3295_v57 }
0x2348   :  { %6272 = vmatpush3.msra.mxu0 %v7606_v16  ;;  %6275 = vmatprep.mubr.msk.f32.mxu0 %vm6924_vm0, %v6923_v0 }
0x2349   :  { %6273 = vmatprep.subr.mxu0 %v6923_v0 }
0x234a   :  { %6274 = vmatpush3.msra.mxu0 %v7612_v51 }
0x234b   :  { %6285 = vmatprep.subr.mxu0 %v6923_v0 }
0x2407   :  { %v3364_v23 = vpop.f32.mrf.mxu0 }
0x2408   :  { %6276 = vmatmul.mubr.msk.f32.vlgmr.msra.gmra.mxu0 %vm165_vm1, %v3364_v23 }
0x2409   :  { %v6263_v27 = vpop.f32.mrf.mxu0  ;;  %6286 = vmatpush3.msra.mxu0 %v7620_v62  ;;  %6289 = vmatprep.mubr.msk.f32.mxu0 %vm6924_vm0, %v6923_v0 }
0x240a   :  { %6287 = vmatprep.subr.mxu0 %v6923_v0 }
0x240b   :  { %6288 = vmatpush3.msra.mxu0 %v7629_v61 }
0x240c   :  { %6299 = vmatprep.subr.mxu0 %v6923_v0 }
0x24c8   :  { %v3507_v9 = vpop.f32.mrf.mxu0 }
0x24c9   :  { %v3508_v29 = vadd.f32 %v3507_v9, %v7575_v13 }
0x24ca   :  { %v6277_v56 = vpop.f32.mrf.mxu0 }
0x24cb   :  { %v3581_v11 = vadd.f32 %v7581_v47, %v3508_v29  ;;  %v5868_v47 = vmul.f32 -1.442695, %v3767_v38 }
0x24cd   :  { %v3582_v34 = vadd.f32 %v7638_v33, %v3581_v11 }
0x24cf   :  { %6577 = vtanh.f32 %v3582_v34  ;;  %v5865_v13 = vmul.f32 -1.442695, %v3582_v34 }
0x24d0   :  { %6579 = vtanh.f32 %v3767_v38 }
0x24d1   :  { %6581 = vpow2.f32 %v5865_v13 }
0x24d2   :  { %6583 = vpow2.f32 %v5868_v47 }
0x24dc   :  { %v6578_v37 = vpop.eup %6577 }
0x24dd   :  { %3592 = vrot.lane.b32.xlu1 %v6578_v37, %s6925_s7  ;;  %v6580_v42 = vpop.eup %6579 }
0x24de   :  { %v6582_v43 = vpop.eup %6581 }
0x24df   :  { %v3586_v14 = vadd.f32 1.0, %v6582_v43  ;;  %v6584_v2 = vpop.eup %6583 }
0x24e0   :  { %v3771_v25 = vadd.f32 1.0, %v6584_v2 }
0x24e1   :  { %3777 = vrot.lane.b32.xlu1 %v6580_v42, %s6925_s7  ;;  %6585 = vrcp.f32 %v3586_v14 }
0x24e2   :  { %6587 = vrcp.f32 %v3771_v25 }
0x24ee   :  { %v6586_v55 = vpop.eup %6585 }
0x24ef   :  { %v6588_v58 = vpop.eup %6587  ;;  %v3590_v63 = vmul.f32 %v6586_v55, %v7524_v44 }
0x24f0   :  { %v3775_v46 = vmul.f32 %v6588_v58, %v7528_v24 }
0x254f   :  { %v3593_v21 = vpop.permute.xlu1 %3592 }
0x2550   :  { %v3595_v28 = vmul.f32 %v6586_v55, %v3593_v21 }
0x2552   :  { %3597 = vrot.lane.b32.xlu1 %v3595_v28, %s6926_s8 }
0x2553   :  { %v3778_v60 = vpop.permute.xlu1 %3777 }
0x2554   :  { %v3780_v31 = vmul.f32 %v6588_v58, %v3778_v60 }
0x2556   :  { %3782 = vrot.lane.b32.xlu1 %v3780_v31, %s6926_s8 }
0x25c4   :  { %v3598_v4 = vpop.permute.xlu1 %3597 }
0x25c5   :  { %v7647_v8 = vadd.f32 %v3598_v4, %v3590_v63 }
0x25c7   :  { %6589 = vtanh.f32 %v7647_v8 }
0x25c8   :  { %v3783_v10 = vpop.permute.xlu1 %3782 }
0x25c9   :  { %v7651_v12 = vadd.f32 %v3783_v10, %v3775_v46 }
0x25cb   :  { %6591 = vtanh.f32 %v7651_v12 }
0x25d4   :  { %v6590_v26 = vpop.eup %6589 }
0x25d5   :  { %3603 = vrot.lane.b32.xlu0 %v6590_v26, %s6917_s21 }
0x25d8   :  { %v6592_v3 = vpop.eup %6591 }
0x25d9   :  { %3788 = vrot.lane.b32.xlu1 %v6592_v3, %s6917_s21 }
0x2647   :  { %v3604_v39 = vpop.permute.xlu0 %3603 }
0x2648   :  { %v3606_v44 = vmul.f32 %v6586_v55, %v3604_v39 }
0x264a   :  { %3608 = vrot.lane.b32.xlu1 %v3606_v44, %s6927_s29 }
0x264b   :  { %v3789_v48 = vpop.permute.xlu1 %3788 }
0x264c   :  { %v3791_v50 = vmul.f32 %v6588_v58, %v3789_v48 }
0x264e   :  { %3793 = vrot.lane.b32.xlu1 %v3791_v50, %s6927_s29 }
0x26bc   :  { %v3609_v24 = vpop.permute.xlu1 %3608 }
0x26bd   :  { %6290 = vmatmul.mubr.msk.f32.vlgmr.msra.gmra.mxu0 %vm165_vm1, %v3609_v24 }
0x26be   :  { %6300 = vmatpush3.msra.mxu0 %v7411_v45  ;;  %6303 = vmatprep.mubr.msk.f32.mxu0 %vm6924_vm0, %v6923_v0 }
0x26bf   :  { %6301 = vmatprep.subr.mxu0 %v6923_v0 }
0x26c0   :  { %6302 = vmatpush3.msra.mxu0 %v7417_v49  ;;  %v3794_v5 = vpop.permute.xlu1 %3793 }
0x26c1   :  { %6304 = vmatmul.mubr.msk.f32.vlgmr.msra.gmra.mxu0 %vm165_vm1, %v3794_v5  ;;  %6311 = vmatprep.subr.mxu0 %v6923_v0 }
0x26c2   :  { %6312 = vmatpush3.msra.mxu0 %v7422_v52  ;;  %6315 = vmatprep.mubr.msk.f32.mxu0 %vm6924_vm0, %v6923_v0 }
0x26c3   :  { %6313 = vmatprep.subr.mxu0 %v6923_v0 }
0x26c4   :  { %6314 = vmatpush3.msra.mxu0 %v7428_v53 }
0x26c5   :  { %6316 = vmatmul.mubr.msk.f32.vlgmr.msra.gmra.mxu0 %vm165_vm1, %v3794_v5  ;;  %6325 = vmatprep.subr.mxu0 %v6923_v0 }
0x26c6   :  { %6326 = vmatpush3.msra.mxu0 %v7433_v20  ;;  %6329 = vmatprep.mubr.msk.f32.mxu0 %vm6924_vm0, %v6923_v0 }
0x26c7   :  { %6327 = vmatprep.subr.mxu0 %v6923_v0 }
0x26c8   :  { %6328 = vmatpush3.msra.mxu0 %v7439_v54 }
0x26c9   :  { %6330 = vmatmul.mubr.msk.f32.vlgmr.msra.gmra.mxu0 %vm165_vm1, %v3609_v24  ;;  %6339 = vmatprep.subr.mxu0 %v6923_v0 }
0x26ca   :  { %6340 = vmatpush3.msra.mxu0 %v7444_v17  ;;  %6343 = vmatprep.mubr.msk.f32.mxu0 %vm6924_vm0, %v6923_v0 }
0x26cb   :  { %6341 = vmatprep.subr.mxu0 %v6923_v0 }
0x26cc   :  { %6342 = vmatpush3.msra.mxu0 %v7450_v18 }
0x26cd   :  { %6344 = vmatmul.mubr.msk.f32.vlgmr.msra.gmra.mxu0 %vm165_vm1, %v3794_v5  ;;  %6353 = vmatprep.subr.mxu0 %v6923_v0 }
0x26ce   :  { %6354 = vmatpush3.msk.msra.mxu0 %vm482_vm5, %v7564_v41  ;;  %6355 = vmatprep.mubr.msk.f32.mxu0 %vm6924_vm0, %v6923_v0 }
0x26cf   :  { %6365 = vmatprep.subr.mxu0 %v6923_v0 }
0x277d   :  { %v7692_v19 = vpop.f32.mrf.mxu0 }
0x277f   :  { %v6291_v57 = vpop.f32.mrf.mxu0 }
0x2781   :  { %v3863_v23 = vpop.f32.mrf.mxu0 }
0x2782   :  { %v3874_v27 = vrot.slane %v3863_v23, %v7102_v32 }
0x2783   :  { %v6305_v9 = vpop.f32.mrf.mxu0 }
0x2784   :  { %v3875_v29 = vcombine.high %v3874_v27, %v3874_v27  ;;  %v3882_v56 = vrot.slane %v3874_v27, %v7102_v32 }
0x2785   :  { %v7696_v11 = vpop.f32.mrf.mxu0 }
0x2786   :  { %v3889_v30 = vrot.slane %v3875_v29, %v7102_v32  ;;  %v3893_v34 = vrot.slane %v3882_v56, %v7105_v35 }
0x2787   :  { %v6317_v38 = vpop.f32.mrf.mxu0 }
0x2788   :  { %v3897_v37 = vrot.slane %v3889_v30, %v7105_v35  ;;  %v3900_v42 = vadd.f32 %v7469_v7, %v3893_v34 }
0x2789   :  { %v7702_v13 = vpop.f32.mrf.mxu0 }
0x278a   :  { %v3901_v47 = vadd.f32 %v7469_v7, %v3897_v37  ;;  %6593 = vtanh.f32 %v3900_v42 }
0x278b   :  { %v6331_v43 = vpop.f32.mrf.mxu0 }
0x278c   :  { %6595 = vtanh.f32 %v3901_v47 }
0x278d   :  { %v7705_v14 = vpop.f32.mrf.mxu0 }
0x278f   :  { %v6345_v2 = vpop.f32.mrf.mxu0 }
0x2797   :  { %v6594_v25 = vpop.eup %6593 }
0x2798   :  { %v3904_v55 = vmul.f32 %v7482_v15, %v6594_v25 }
0x2799   :  { %v6596_v21 = vpop.eup %6595 }
0x279a   :  { %v3906_v28 = vsel %vm384_vm2, %v3904_v55, 0.0  ;;  %v3905_v58 = vmul.f32 %v7482_v15, %v6596_v21 }
0x279b   :  { %3907 = vadd.xlane.f32.xlu1 %v3906_v28 }
0x279c   :  { %v3909_v60 = vsel %vm384_vm2, %v3905_v58, 0.0 }
0x279d   :  { %3910 = vadd.xlane.f32.xlu0 %v3909_v60 }
0x2824   :  { %v3908_v31 = vpop.xlane.xlu1 %3907 }
0x2825   :  { %v3917_v4 = vrot.slane %v3908_v31, %v7128_v59 }
0x2826   :  { %v3911_v63 = vpop.xlane.xlu0 %3910 }
0x2827   :  { %v3921_v46 = vrot.slane %v3911_v63, %v7128_v59 }
0x2829   :  { %v3922_v10 = vsel %vm403_vm3, %v3921_v46, %v3917_v4 }
0x282a   :  { %v3924_v26 = vsel %vm406_vm4, %v3922_v10, -inf }
0x282b   :  { %3925 = vmax.xlane.f32.xlu1 %v3924_v26  ;;  %v4396_v26 = vld [vmem:[#allocation2 + $0xc] sm:$0x3] }
0x28b4   :  { %v3926_v3 = vpop.xlane.xlu1 %3925 }
0x28b5   :  { %v3931_v39 = vrot.slane %v3926_v3, %v7105_v35  ;;  %v3935_v44 = vrot.slane %v3926_v3, %v7134_v6 }
0x28b7   :  { %v3938_v48 = vsub.f32 %v3908_v31, %v3931_v39  ;;  %v3939_v50 = vsub.f32 %v3911_v63, %v3935_v44  ;;  %v4467_v39 = vadd.f32 %v7705_v14, %v4396_v26 }
0x28b9   :  { %v3940_v24 = vmul.f32 1.442695, %v3938_v48  ;;  %v3942_v5 = vmul.f32 1.442695, %v3939_v50 }
0x28bb   :  { %6597 = vpow2.f32 %v3940_v24  ;;  %v5878_v24 = vmul.f32 -1.442695, %v4467_v39 }
0x28bc   :  { %6599 = vpow2.f32 %v3942_v5 }
0x28c8   :  { %v6598_v57 = vpop.eup %6597 }
0x28c9   :  { %v6600_v23 = vpop.eup %6599  ;;  %3947 = vperm.xlu0 %6453, %v6598_v57  }
0x28ca   :  { %3950 = vperm.xlu1 %6454, %v6600_v23  }
0x2944   :  { %v3948_v27 = vpop.permute.xlu0 %3947 }
0x2945   :  { %v3951_v9 = vpop.permute.xlu1 %3950  ;;  %v3955_v29 = vrot.slane %v3948_v27, %v7128_v59 }
0x2946   :  { %v3959_v56 = vrot.slane %v3951_v9, %v7128_v59 }
0x2948   :  { %v3960_v30 = vsel %vm403_vm3, %v3959_v56, %v3955_v29 }
0x2949   :  { %v3962_v34 = vsel %vm406_vm4, %v3960_v30, 0.0 }
0x294a   :  { %3963 = vadd.xlane.f32.xlu1 %v3962_v34 }
0x29d3   :  { %v3964_v38 = vpop.xlane.xlu1 %3963 }
0x29d4   :  { %6601 = vrcp.f32 %v3964_v38 }
0x29e1   :  { %v6602_v37 = vpop.eup %6601 }
0x29e2   :  { %v3970_v42 = vrot.slane %v6602_v37, %v7105_v35  ;;  %v3974_v43 = vrot.slane %v6602_v37, %v7134_v6 }
0x29e4   :  { %v3977_v47 = vmul.f32 %v6598_v57, %v3970_v42  ;;  %v3978_v2 = vmul.f32 %v6600_v23, %v3974_v43 }
0x29e6   :  { %3982 = vperm.xlu0 %6453, %v3977_v47  }
0x29ea   :  { %3985 = vperm.xlu0 %6453, %v3978_v2  }
0x2a61   :  { %v3983_v25 = vpop.permute.xlu0 %3982 }
0x2a62   :  { %v3990_v21 = vrot.slane %v3983_v25, %v7128_v59 }
0x2a65   :  { %v3986_v55 = vpop.permute.xlu0 %3985 }
0x2a66   :  { %v3994_v28 = vrot.slane %v3986_v55, %v7128_v59 }
0x2a68   :  { %v3995_v58 = vsel %vm403_vm3, %v3994_v28, %v3990_v21 }
0x2a69   :  { %6309 = vmatmul.mubr.msk.f32.vlgmr.msra.gmra.mxu1 %vm479_vm6, %v3995_v58 }
0x2a6a   :  { %6319 = vmatpush3.msra.mxu1 %v7606_v16  ;;  %6322 = vmatprep.mubr.msk.f32.mxu1 %vm6924_vm0, %v6923_v0 }
0x2a6b   :  { %6320 = vmatprep.subr.mxu1 %v6923_v0 }
0x2a6c   :  { %6321 = vmatpush3.msra.mxu1 %v7612_v51 }
0x2a6d   :  { %6332 = vmatprep.subr.mxu1 %v6923_v0 }
0x2b29   :  { %v4064_v60 = vpop.f32.mrf.mxu1 }
0x2b2a   :  { %6323 = vmatmul.mubr.msk.f32.vlgmr.msra.gmra.mxu1 %vm165_vm1, %v4064_v60 }
0x2b2b   :  { %v6310_v31 = vpop.f32.mrf.mxu1  ;;  %6333 = vmatpush3.msra.mxu1 %v7620_v62  ;;  %6336 = vmatprep.mubr.msk.f32.mxu1 %vm6924_vm0, %v6923_v0 }
0x2b2c   :  { %6334 = vmatprep.subr.mxu1 %v6923_v0 }
0x2b2d   :  { %6335 = vmatpush3.msra.mxu1 %v7629_v61 }
0x2b2e   :  { %6346 = vmatprep.subr.mxu1 %v6923_v0 }
0x2bea   :  { %v4207_v63 = vpop.f32.mrf.mxu1 }
0x2beb   :  { %v4208_v4 = vadd.f32 %v4207_v63, %v7696_v11 }
0x2bec   :  { %v6324_v46 = vpop.f32.mrf.mxu1 }
0x2bed   :  { %v4281_v10 = vadd.f32 %v7702_v13, %v4208_v4 }
0x2bef   :  { %v4282_v3 = vadd.f32 %v7638_v33, %v4281_v10 }
0x2bf1   :  { %6603 = vtanh.f32 %v4282_v3  ;;  %v5875_v50 = vmul.f32 -1.442695, %v4282_v3 }
0x2bf2   :  { %6605 = vtanh.f32 %v4467_v39 }
0x2bf3   :  { %6607 = vpow2.f32 %v5875_v50 }
0x2bf4   :  { %6609 = vpow2.f32 %v5878_v24 }
0x2bfe   :  { %v6604_v44 = vpop.eup %6603 }
0x2bff   :  { %4292 = vrot.lane.b32.xlu0 %v6604_v44, %s6925_s7  ;;  %v6606_v48 = vpop.eup %6605 }
0x2c00   :  { %v6608_v11 = vpop.eup %6607 }
0x2c01   :  { %v4286_v5 = vadd.f32 1.0, %v6608_v11  ;;  %v6610_v13 = vpop.eup %6609 }
0x2c02   :  { %v4471_v57 = vadd.f32 1.0, %v6610_v13 }
0x2c03   :  { %4477 = vrot.lane.b32.xlu0 %v6606_v48, %s6925_s7  ;;  %6611 = vrcp.f32 %v4286_v5 }
0x2c04   :  { %6613 = vrcp.f32 %v4471_v57 }
0x2c10   :  { %v6612_v23 = vpop.eup %6611 }
0x2c11   :  { %v6614_v9 = vpop.eup %6613  ;;  %v4290_v30 = vmul.f32 %v6612_v23, %v7647_v8 }
0x2c12   :  { %v4475_v37 = vmul.f32 %v6614_v9, %v7651_v12 }
0x2c71   :  { %v4293_v14 = vpop.permute.xlu0 %4292 }
0x2c72   :  { %v4295_v27 = vmul.f32 %v6612_v23, %v4293_v14 }
0x2c74   :  { %4297 = vrot.lane.b32.xlu0 %v4295_v27, %s6926_s8 }
0x2c75   :  { %v4478_v29 = vpop.permute.xlu0 %4477 }
0x2c76   :  { %v4480_v56 = vmul.f32 %v6614_v9, %v4478_v29 }
0x2c78   :  { %4482 = vrot.lane.b32.xlu0 %v4480_v56, %s6926_s8 }
0x2ce6   :  { %v4298_v34 = vpop.permute.xlu0 %4297 }
0x2ce7   :  { %v7749_v38 = vadd.f32 %v4298_v34, %v4290_v30 }
0x2ce9   :  { %6615 = vtanh.f32 %v7749_v38 }
0x2cea   :  { %v4483_v42 = vpop.permute.xlu0 %4482 }
0x2ceb   :  { %v7753_v47 = vadd.f32 %v4483_v42, %v4475_v37 }
0x2ced   :  { %6617 = vtanh.f32 %v7753_v47 }
0x2cf6   :  { %v6616_v43 = vpop.eup %6615 }
0x2cf7   :  { %4303 = vrot.lane.b32.xlu0 %v6616_v43, %s6917_s21 }
0x2cfa   :  { %v6618_v2 = vpop.eup %6617 }
0x2cfb   :  { %4488 = vrot.lane.b32.xlu0 %v6618_v2, %s6917_s21 }
0x2d69   :  { %v4304_v25 = vpop.permute.xlu0 %4303 }
0x2d6a   :  { %v4306_v8 = vmul.f32 %v6612_v23, %v4304_v25 }
0x2d6c   :  { %4308 = vrot.lane.b32.xlu1 %v4306_v8, %s6927_s29 }
0x2d6d   :  { %v4489_v55 = vpop.permute.xlu0 %4488 }
0x2d6e   :  { %v4491_v21 = vmul.f32 %v6614_v9, %v4489_v55 }
0x2d70   :  { %4493 = vrot.lane.b32.xlu0 %v4491_v21, %s6927_s29 }
0x2dde   :  { %v4309_v12 = vpop.permute.xlu1 %4308 }
0x2ddf   :  { %6337 = vmatmul.mubr.msk.f32.vlgmr.msra.gmra.mxu1 %vm165_vm1, %v4309_v12 }
0x2de0   :  { %6347 = vmatpush3.msra.mxu1 %v7411_v45  ;;  %6350 = vmatprep.mubr.msk.f32.mxu1 %vm6924_vm0, %v6923_v0 }
0x2de1   :  { %6348 = vmatprep.subr.mxu1 %v6923_v0 }
0x2de2   :  { %6349 = vmatpush3.msra.mxu1 %v7417_v49  ;;  %v4494_v28 = vpop.permute.xlu0 %4493 }
0x2de3   :  { %6351 = vmatmul.mubr.msk.f32.vlgmr.msra.gmra.mxu1 %vm165_vm1, %v4494_v28  ;;  %6358 = vmatprep.subr.mxu1 %v6923_v0 }
0x2de4   :  { %6359 = vmatpush3.msra.mxu1 %v7422_v52  ;;  %6362 = vmatprep.mubr.msk.f32.mxu1 %vm6924_vm0, %v6923_v0 }
0x2de5   :  { %6360 = vmatprep.subr.mxu1 %v6923_v0 }
0x2de6   :  { %6361 = vmatpush3.msra.mxu1 %v7428_v53 }
0x2de7   :  { %6363 = vmatmul.mubr.msk.f32.vlgmr.msra.gmra.mxu1 %vm165_vm1, %v4494_v28  ;;  %6372 = vmatprep.subr.mxu1 %v6923_v0 }
0x2de8   :  { %6373 = vmatpush3.msra.mxu1 %v7433_v20  ;;  %6376 = vmatprep.mubr.msk.f32.mxu1 %vm6924_vm0, %v6923_v0 }
0x2de9   :  { %6374 = vmatprep.subr.mxu1 %v6923_v0 }
0x2dea   :  { %6375 = vmatpush3.msra.mxu1 %v7439_v54 }
0x2deb   :  { %6377 = vmatmul.mubr.msk.f32.vlgmr.msra.gmra.mxu1 %vm165_vm1, %v4309_v12  ;;  %6386 = vmatprep.subr.mxu1 %v6923_v0 }
0x2dec   :  { %6387 = vmatpush3.msra.mxu1 %v7444_v17  ;;  %6390 = vmatprep.mubr.msk.f32.mxu1 %vm6924_vm0, %v6923_v0 }
0x2ded   :  { %6388 = vmatprep.subr.mxu1 %v6923_v0 }
0x2dee   :  { %6389 = vmatpush3.msra.mxu1 %v7450_v18 }
0x2def   :  { %6391 = vmatmul.mubr.msk.f32.vlgmr.msra.gmra.mxu1 %vm165_vm1, %v4494_v28  ;;  %6400 = vmatprep.subr.mxu1 %v6923_v0 }
0x2df0   :  { %6401 = vmatpush3.msk.msra.mxu1 %vm482_vm5, %v7564_v41  ;;  %6402 = vmatprep.mubr.msk.f32.mxu1 %vm6924_vm0, %v6923_v0 }
0x2df1   :  { %6412 = vmatprep.subr.mxu1 %v6923_v0 }
0x2e9f   :  { %v7794_v45 = vpop.f32.mrf.mxu1 }
0x2ea1   :  { %v6338_v49 = vpop.f32.mrf.mxu1 }
0x2ea3   :  { %v4563_v52 = vpop.f32.mrf.mxu1 }
0x2ea4   :  { %v4574_v53 = vrot.slane %v4563_v52, %v7102_v32 }
0x2ea5   :  { %v6352_v20 = vpop.f32.mrf.mxu1 }
0x2ea6   :  { %v4575_v54 = vcombine.high %v4574_v53, %v4574_v53  ;;  %v4582_v17 = vrot.slane %v4574_v53, %v7102_v32 }
0x2ea7   :  { %v7798_v18 = vpop.f32.mrf.mxu1 }
0x2ea8   :  { %v4589_v58 = vrot.slane %v4575_v54, %v7102_v32  ;;  %v4593_v41 = vrot.slane %v4582_v17, %v7105_v35 }
0x2ea9   :  { %v6364_v60 = vpop.f32.mrf.mxu1 }
0x2eaa   :  { %v4597_v31 = vrot.slane %v4589_v58, %v7105_v35  ;;  %v4600_v63 = vadd.f32 %v7469_v7, %v4593_v41 }
0x2eab   :  { %v7804_v4 = vpop.f32.mrf.mxu1 }
0x2eac   :  { %v4601_v46 = vadd.f32 %v7469_v7, %v4597_v31  ;;  %6619 = vtanh.f32 %v4600_v63 }
0x2ead   :  { %v6378_v10 = vpop.f32.mrf.mxu1 }
0x2eae   :  { %6621 = vtanh.f32 %v4601_v46 }
0x2eaf   :  { %v7807_v26 = vpop.f32.mrf.mxu1 }
0x2eb1   :  { %v6392_v3 = vpop.f32.mrf.mxu1 }
0x2eb9   :  { %v6620_v39 = vpop.eup %6619 }
0x2eba   :  { %v4604_v44 = vmul.f32 %v7482_v15, %v6620_v39 }
0x2ebb   :  { %v6622_v48 = vpop.eup %6621 }
0x2ebc   :  { %v4606_v50 = vsel %vm384_vm2, %v4604_v44, 0.0  ;;  %v4605_v24 = vmul.f32 %v7482_v15, %v6622_v48  ;;  %v5096_v44 = vld [vmem:[#allocation2 + $0xe] sm:$0x3] }
0x2ebd   :  { %4607 = vadd.xlane.f32.xlu0 %v4606_v50  ;;  %v5167_v50 = vadd.f32 %v7807_v26, %v5096_v44 }
0x2ebe   :  { %v4609_v11 = vsel %vm384_vm2, %v4605_v24, 0.0 }
0x2ebf   :  { %4610 = vadd.xlane.f32.xlu1 %v4609_v11 }
0x2f46   :  { %v4608_v5 = vpop.xlane.xlu0 %4607 }
0x2f47   :  { %v4617_v13 = vrot.slane %v4608_v5, %v7128_v59 }
0x2f48   :  { %v4611_v7 = vpop.xlane.xlu1 %4610 }
0x2f49   :  { %v4621_v57 = vrot.slane %v4611_v7, %v7128_v59 }
0x2f4b   :  { %v4622_v23 = vsel %vm403_vm3, %v4621_v57, %v4617_v13 }
0x2f4c   :  { %v4624_v14 = vsel %vm406_vm4, %v4622_v23, -inf }
0x2f4d   :  { %4625 = vmax.xlane.f32.xlu0 %v4624_v14 }
0x2fd6   :  { %v4626_v27 = vpop.xlane.xlu0 %4625 }
0x2fd7   :  { %v4631_v9 = vrot.slane %v4626_v27, %v7105_v35  ;;  %v4635_v15 = vrot.slane %v4626_v27, %v7134_v6 }
0x2fd9   :  { %v4638_v29 = vsub.f32 %v4608_v5, %v4631_v9  ;;  %v4639_v56 = vsub.f32 %v4611_v7, %v4635_v15  ;;  %v5888_v7 = vmul.f32 -1.442695, %v5167_v50 }
0x2fdb   :  { %v4640_v30 = vmul.f32 1.442695, %v4638_v29  ;;  %v4642_v34 = vmul.f32 1.442695, %v4639_v56 }
0x2fdd   :  { %6623 = vpow2.f32 %v4640_v30 }
0x2fde   :  { %6625 = vpow2.f32 %v4642_v34 }
0x2fea   :  { %v6624_v37 = vpop.eup %6623 }
0x2feb   :  { %v6626_v42 = vpop.eup %6625  ;;  %4647 = vperm.xlu0 %6453, %v6624_v37  }
0x2fec   :  { %4650 = vperm.xlu1 %6454, %v6626_v42  }
0x3066   :  { %v4648_v43 = vpop.permute.xlu0 %4647 }
0x3067   :  { %v4651_v2 = vpop.permute.xlu1 %4650  ;;  %v4655_v25 = vrot.slane %v4648_v43, %v7128_v59 }
0x3068   :  { %v4659_v8 = vrot.slane %v4651_v2, %v7128_v59 }
0x306a   :  { %v4660_v55 = vsel %vm403_vm3, %v4659_v8, %v4655_v25 }
0x306b   :  { %v4662_v21 = vsel %vm406_vm4, %v4660_v55, 0.0 }
0x306c   :  { %4663 = vadd.xlane.f32.xlu0 %v4662_v21 }
0x30f5   :  { %v4664_v12 = vpop.xlane.xlu0 %4663 }
0x30f6   :  { %6627 = vrcp.f32 %v4664_v12  ;;  %v6712_v12 = vld [vmem:[#allocation10] sm:$0xff] }
0x3103   :  { %v6628_v28 = vpop.eup %6627 }
0x3104   :  { %v4670_v49 = vrot.slane %v6628_v28, %v7105_v35  ;;  %v4674_v53 = vrot.slane %v6628_v28, %v7134_v6 }
0x3106   :  { %v4677_v52 = vmul.f32 %v6624_v37, %v4670_v49  ;;  %v4678_v20 = vmul.f32 %v6626_v42, %v4674_v53  ;;  %v6713_v49 = vld [vmem:[#allocation13 + $0x8] sm:$0xff]  ;;  %v6715_v53 = vld [vmem:[#allocation14 + $0x8] sm:$0xff] }
0x3108   :  { %4682 = vperm.xlu1 %6454, %v4677_v52   ;;  %v6714_v52 = vld [vmem:[#allocation13] sm:$0xff] }
0x310c   :  { %4685 = vperm.xlu1 %6454, %v4678_v20   ;;  %v6716_v20 = vld [vmem:[#allocation14] sm:$0xff] }
0x3183   :  { %v4683_v54 = vpop.permute.xlu1 %4682 }
0x3184   :  { %v4690_v58 = vrot.slane %v4683_v54, %v7128_v59 }
0x3187   :  { %v4686_v17 = vpop.permute.xlu1 %4685 }
0x3188   :  { %v4694_v41 = vrot.slane %v4686_v17, %v7128_v59 }
0x318a   :  { %v4695_v60 = vsel %vm403_vm3, %v4694_v41, %v4690_v58 }
0x318b   :  { %6356 = vmatmul.mubr.msk.f32.vlgmr.msra.gmra.mxu0 %vm479_vm6, %v4695_v60 }
0x318c   :  { %6366 = vmatpush3.msra.mxu0 %v7606_v16  ;;  %6369 = vmatprep.mubr.msk.f32.mxu0 %vm6924_vm0, %v6923_v0 }
0x318d   :  { %6367 = vmatprep.subr.mxu0 %v6923_v0 }
0x318e   :  { %6368 = vmatpush3.msra.mxu0 %v7612_v51 }
0x318f   :  { %6379 = vmatprep.subr.mxu0 %v6923_v0 }
0x324b   :  { %v4764_v31 = vpop.f32.mrf.mxu0 }
0x324c   :  { %6370 = vmatmul.mubr.msk.f32.vlgmr.msra.gmra.mxu0 %vm165_vm1, %v4764_v31 }
0x324d   :  { %v6357_v63 = vpop.f32.mrf.mxu0  ;;  %6380 = vmatpush3.msra.mxu0 %v7620_v62  ;;  %6383 = vmatprep.mubr.msk.f32.mxu0 %vm6924_vm0, %v6923_v0 }
0x324e   :  { %6381 = vmatprep.subr.mxu0 %v6923_v0 }
0x324f   :  { %6382 = vmatpush3.msra.mxu0 %v7629_v61 }
0x3250   :  { %6393 = vmatprep.subr.mxu0 %v6923_v0 }
0x330c   :  { %v4907_v46 = vpop.f32.mrf.mxu0 }
0x330d   :  { %v4908_v10 = vadd.f32 %v4907_v46, %v7798_v18 }
0x330e   :  { %v6371_v3 = vpop.f32.mrf.mxu0 }
0x330f   :  { %v4981_v39 = vadd.f32 %v7804_v4, %v4908_v10 }
0x3311   :  { %v4982_v48 = vadd.f32 %v7638_v33, %v4981_v39 }
0x3313   :  { %6629 = vtanh.f32 %v4982_v48  ;;  %v5885_v5 = vmul.f32 -1.442695, %v4982_v48  ;;  %v6717_v48 = vld [vmem:[#allocation7] sm:$0xf] }
0x3314   :  { %6631 = vtanh.f32 %v5167_v50 }
0x3315   :  { %6633 = vpow2.f32 %v5885_v5 }
0x3316   :  { %6635 = vpow2.f32 %v5888_v7 }
0x3320   :  { %v6630_v24 = vpop.eup %6629 }
0x3321   :  { %4992 = vrot.lane.b32.xlu1 %v6630_v24, %s6925_s7  ;;  %v6632_v11 = vpop.eup %6631 }
0x3322   :  { %v6634_v18 = vpop.eup %6633 }
0x3323   :  { %v4986_v13 = vadd.f32 1.0, %v6634_v18  ;;  %v6636_v4 = vpop.eup %6635  ;;  %v6718_v18 = vld [vmem:[%s7982_s5] ss:$0 sm:$0xff] }
0x3324   :  { %v5171_v57 = vadd.f32 1.0, %v6636_v4 }
0x3325   :  { %5177 = vrot.lane.b32.xlu1 %v6632_v11, %s6925_s7  ;;  %6637 = vrcp.f32 %v4986_v13 }
0x3326   :  { %6639 = vrcp.f32 %v5171_v57 }
0x3332   :  { %v6638_v23 = vpop.eup %6637 }
0x3333   :  { %v6640_v27 = vpop.eup %6639  ;;  %v4990_v29 = vmul.f32 %v6638_v23, %v7749_v38 }
0x3334   :  { %v5175_v34 = vmul.f32 %v6640_v27, %v7753_v47  ;;  %v6711_v47 = vld [vmem:[#allocation10 + $0x8] sm:$0xff] }
0x3393   :  { %v4993_v26 = vpop.permute.xlu1 %4992 }
0x3394   :  { %v4995_v14 = vmul.f32 %v6638_v23, %v4993_v26 }
0x3396   :  { %4997 = vrot.lane.b32.xlu1 %v4995_v14, %s6926_s8 }
0x3397   :  { %v5178_v9 = vpop.permute.xlu1 %5177 }
0x3398   :  { %v5180_v15 = vmul.f32 %v6640_v27, %v5178_v9 }
0x339a   :  { %5182 = vrot.lane.b32.xlu1 %v5180_v15, %s6926_s8 }
0x3408   :  { %v4998_v56 = vpop.permute.xlu1 %4997 }
0x3409   :  { %v7851_v30 = vadd.f32 %v4998_v56, %v4990_v29 }
0x340b   :  { %6641 = vtanh.f32 %v7851_v30 }
0x340c   :  { %v5183_v37 = vpop.permute.xlu1 %5182 }
0x340d   :  { %v5185_v42 = vadd.f32 %v5183_v37, %v5175_v34 }
0x340f   :  { %6643 = vtanh.f32 %v5185_v42 }
0x3418   :  { %v6642_v43 = vpop.eup %6641 }
0x3419   :  { %5003 = vrot.lane.b32.xlu0 %v6642_v43, %s6917_s21 }
0x341c   :  { %v6644_v2 = vpop.eup %6643 }
0x341d   :  { %5188 = vrot.lane.b32.xlu1 %v6644_v2, %s6917_s21 }
0x348b   :  { %v5004_v25 = vpop.permute.xlu0 %5003 }
0x348c   :  { %v5006_v8 = vmul.f32 %v6638_v23, %v5004_v25 }
0x348e   :  { %5008 = vrot.lane.b32.xlu1 %v5006_v8, %s6927_s29 }
0x348f   :  { %v5189_v38 = vpop.permute.xlu1 %5188 }
0x3490   :  { %v5191_v55 = vmul.f32 %v6640_v27, %v5189_v38 }
0x3492   :  { %5193 = vrot.lane.b32.xlu1 %v5191_v55, %s6927_s29 }
0x3500   :  { %v5009_v21 = vpop.permute.xlu1 %5008 }
0x3501   :  { %6384 = vmatmul.mubr.msk.f32.vlgmr.msra.gmra.mxu0 %vm165_vm1, %v5009_v21 }
0x3502   :  { %6394 = vmatpush3.msra.mxu0 %v6711_v47  ;;  %6397 = vmatprep.mubr.msk.f32.mxu0 %vm6924_vm0, %v6923_v0 }
0x3503   :  { %6395 = vmatprep.subr.mxu0 %v6923_v0 }
0x3504   :  { %6396 = vmatpush3.msra.mxu0 %v6712_v12  ;;  %v5194_v28 = vpop.permute.xlu1 %5193 }
0x3505   :  { %6398 = vmatmul.mubr.msk.f32.vlgmr.msra.gmra.mxu0 %vm165_vm1, %v5194_v28  ;;  %6405 = vmatprep.subr.mxu0 %v6923_v0 }
0x3506   :  { %6406 = vmatpush3.msra.mxu0 %v6713_v49  ;;  %6409 = vmatprep.mubr.msk.f32.mxu0 %vm6924_vm0, %v6923_v0 }
0x3507   :  { %6407 = vmatprep.subr.mxu0 %v6923_v0 }
0x3508   :  { %6408 = vmatpush3.msra.mxu0 %v6714_v52 }
0x3509   :  { %6410 = vmatmul.mubr.msk.f32.vlgmr.msra.gmra.mxu0 %vm165_vm1, %v5194_v28  ;;  %6419 = vmatprep.subr.mxu0 %v6923_v0 }
0x350a   :  { %6420 = vmatpush3.msra.mxu0 %v6715_v53  ;;  %6423 = vmatprep.mubr.msk.f32.mxu0 %vm6924_vm0, %v6923_v0 }
0x350b   :  { %6421 = vmatprep.subr.mxu0 %v6923_v0 }
0x350c   :  { %6422 = vmatpush3.msra.mxu0 %v6716_v20 }
0x350d   :  { %6424 = vmatmul.mubr.msk.f32.vlgmr.msra.gmra.mxu0 %vm165_vm1, %v5009_v21 }
0x35c1   :  { %v7874_v54 = vpop.f32.mrf.mxu0 }
0x35c3   :  { %v6385_v17 = vpop.f32.mrf.mxu0 }
0x35c5   :  { %v5263_v58 = vpop.f32.mrf.mxu0 }
0x35c6   :  { %v5274_v41 = vrot.slane %v5263_v58, %v7102_v32 }
0x35c7   :  { %v6399_v60 = vpop.f32.mrf.mxu0 }
0x35c8   :  { %v5275_v31 = vcombine.high %v5274_v41, %v5274_v41  ;;  %v5282_v63 = vrot.slane %v5274_v41, %v7102_v32 }
0x35c9   :  { %v7878_v46 = vpop.f32.mrf.mxu0 }
0x35ca   :  { %v5289_v10 = vrot.slane %v5275_v31, %v7102_v32  ;;  %v5293_v3 = vrot.slane %v5282_v63, %v7105_v35 }
0x35cb   :  { %v6411_v39 = vpop.f32.mrf.mxu0 }
0x35cc   :  { %v5297_v44 = vrot.slane %v5289_v10, %v7105_v35  ;;  %v5300_v50 = vadd.f32 %v6717_v48, %v5293_v3 }
0x35cd   :  { %v7883_v24 = vpop.f32.mrf.mxu0 }
0x35ce   :  { %v5301_v11 = vadd.f32 %v6717_v48, %v5297_v44  ;;  %6645 = vtanh.f32 %v5300_v50 }
0x35cf   :  { %v6425_v5 = vpop.f32.mrf.mxu0 }
0x35d0   :  { %6647 = vtanh.f32 %v5301_v11 }
0x35db   :  { %v6646_v7 = vpop.eup %6645 }
0x35dc   :  { %v5304_v13 = vmul.f32 %v6718_v18, %v6646_v7 }
0x35dd   :  { %v6648_v32 = vpop.eup %6647 }
0x35de   :  { %v5306_v4 = vsel %vm384_vm2, %v5304_v13, 0.0  ;;  %v5305_v57 = vmul.f32 %v6718_v18, %v6648_v32  ;;  %v7929_v32 = vld [vmem:[%s7988_s11] ss:$0 sm:$0xff]  ;;  %s6930_s11 = smov [#allocation16]  }
0x35df   :  { %5307 = vadd.xlane.f32.xlu1 %v5306_v4  ;;  %v879_v4 = vadd.f32 %v7929_v32, %v7240_v36  ;;  %s5800_s3 = sshll.u32 %s6930_s11, 4  ;;  %s5801_s3 = int_to_ptr.vmem [resolvable:$true] %s5800_s3 }
0x35e0   :  { %v5309_v23 = vsel %vm384_vm2, %v5305_v57, 0.0  ;;  %s6879_s4 = scalar_lea.vmem %s5801_s3, 256  ;;  %p6884_p13 = scmp.lt.s32.totalorder %s5801_s3, %s5801_s3 }
0x35e1   :  { %5310 = vadd.xlane.f32.xlu0 %v5309_v23  ;;  %p6880_p12 = scmp.ne.s32.totalorder %s5801_s3, %s6879_s4  ;;  %p6885_p0 = scmp.lt.s32.totalorder %s6879_s4, %s6879_s4 }
0x35e3   :  { %p6886_p1 = por %p6885_p0, %p6884_p13 }
0x35e5   :  { %p6887_p2 = pnand %p6886_p1, %p6880_p12 }
0x3668   :  { %v5308_v26 = vpop.xlane.xlu1 %5307 }
0x3669   :  { %v5317_v27 = vrot.slane %v5308_v26, %v7128_v59 }
0x366a   :  { %v5311_v14 = vpop.xlane.xlu0 %5310 }
0x366b   :  { %v5321_v9 = vrot.slane %v5311_v14, %v7128_v59 }
0x366d   :  { %v5322_v15 = vsel %vm403_vm3, %v5321_v9, %v5317_v27  ;;  %v1579_v9 = vadd.f32 %v7929_v32, %v7342_v1  ;;  %v2279_v1 = vadd.f32 %v7929_v32, %v7460_v22  ;;  %v2979_v22 = vadd.f32 %v7929_v32, %v7571_v40 }
0x366e   :  { %v5324_v29 = vsel %vm406_vm4, %v5322_v15, -inf }
0x366f   :  { %5325 = vmax.xlane.f32.xlu1 %v5324_v29  ;;  %v1582_v36 = vsel %vm882_vm7, %v1579_v9, -inf }
0x36f8   :  { %v5326_v56 = vpop.xlane.xlu1 %5325 }
0x36f9   :  { %v5331_v34 = vrot.slane %v5326_v56, %v7105_v35  ;;  %v5335_v37 = vrot.slane %v5326_v56, %v7134_v6 }
0x36fb   :  { %v5338_v42 = vsub.f32 %v5308_v26, %v5331_v34  ;;  %v5339_v43 = vsub.f32 %v5311_v14, %v5335_v37 }
0x36fd   :  { %v5340_v2 = vmul.f32 1.442695, %v5338_v42  ;;  %v5342_v25 = vmul.f32 1.442695, %v5339_v43 }
0x36ff   :  { %6649 = vpow2.f32 %v5340_v2 }
0x3700   :  { %6651 = vpow2.f32 %v5342_v25 }
0x370c   :  { %v6650_v8 = vpop.eup %6649 }
0x370d   :  { %v6652_v38 = vpop.eup %6651  ;;  %5347 = vperm.xlu0 %6453, %v6650_v8  }
0x370e   :  { %5350 = vperm.xlu1 %6454, %v6652_v38  }
0x3788   :  { %v5348_v55 = vpop.permute.xlu0 %5347 }
0x3789   :  { %v5351_v21 = vpop.permute.xlu1 %5350  ;;  %v5355_v47 = vrot.slane %v5348_v55, %v7128_v59  ;;  %v2282_v55 = vsel %vm882_vm7, %v2279_v1, -inf }
0x378a   :  { %v5359_v12 = vrot.slane %v5351_v21, %v7128_v59 }
0x378c   :  { %v5360_v28 = vsel %vm403_vm3, %v5359_v12, %v5355_v47 }
0x378d   :  { %v5362_v49 = vsel %vm406_vm4, %v5360_v28, 0.0 }
0x378e   :  { %5363 = vadd.xlane.f32.xlu1 %v5362_v49 }
0x3817   :  { %v5364_v52 = vpop.xlane.xlu1 %5363 }
0x3818   :  { %6653 = vrcp.f32 %v5364_v52 }
0x3825   :  { %v6654_v53 = vpop.eup %6653 }
0x3826   :  { %v5370_v20 = vrot.slane %v6654_v53, %v7105_v35  ;;  %v5374_v58 = vrot.slane %v6654_v53, %v7134_v6 }
0x3828   :  { %v5377_v17 = vmul.f32 %v6650_v8, %v5370_v20  ;;  %v5378_v41 = vmul.f32 %v6652_v38, %v5374_v58  ;;  %v2982_v58 = vsel %vm882_vm7, %v2979_v22, -inf }
0x382a   :  { %5382 = vperm.xlu0 %6453, %v5377_v17   ;;  %v3679_v17 = vadd.f32 %v7929_v32, %v7692_v19 }
0x382e   :  { %5385 = vperm.xlu0 %6453, %v5378_v41   ;;  %v5079_v41 = vadd.f32 %v7929_v32, %v7874_v54 }
0x38a5   :  { %v5383_v60 = vpop.permute.xlu0 %5382 }
0x38a6   :  { %v5390_v63 = vrot.slane %v5383_v60, %v7128_v59  ;;  %v3682_v60 = vsel %vm882_vm7, %v3679_v17, -inf }
0x38a9   :  { %v5386_v31 = vpop.permute.xlu0 %5385 }
0x38aa   :  { %v5394_v10 = vrot.slane %v5386_v31, %v7128_v59  ;;  %v5082_v31 = vsel %vm882_vm7, %v5079_v41, -inf }
0x38ac   :  { %v5395_v3 = vsel %vm403_vm3, %v5394_v10, %v5390_v63 }
0x38ad   :  { %6403 = vmatmul.mubr.msk.f32.vlgmr.msra.gmra.mxu1 %vm479_vm6, %v5395_v3 }
0x38ae   :  { %6413 = vmatpush3.msra.mxu1 %v7606_v16  ;;  %6416 = vmatprep.mubr.msk.f32.mxu1 %vm6924_vm0, %v6923_v0 }
0x38af   :  { %6414 = vmatprep.subr.mxu1 %v6923_v0 }
0x38b0   :  { %6415 = vmatpush3.msra.mxu1 %v7612_v51 }
0x38b1   :  { %6426 = vmatprep.subr.mxu1 %v6923_v0 }
0x396d   :  { %v5464_v35 = vpop.f32.mrf.mxu1 }
0x396e   :  { %6417 = vmatmul.mubr.msk.f32.vlgmr.msra.gmra.mxu1 %vm165_vm1, %v5464_v35 }
0x396f   :  { %v6404_v6 = vpop.f32.mrf.mxu1  ;;  %6427 = vmatpush3.msra.mxu1 %v7620_v62  ;;  %6430 = vmatprep.mubr.msk.f32.mxu1 %vm6924_vm0, %v6923_v0 }
0x3970   :  { %6428 = vmatprep.subr.mxu1 %v6923_v0 }
0x3971   :  { %6429 = vmatpush3.msra.mxu1 %v7629_v61 }
0x3a2e   :  { %v5607_v59 = vpop.f32.mrf.mxu1 }
0x3a2f   :  { %v5608_v16 = vadd.f32 %v5607_v59, %v7878_v46 }
0x3a30   :  { %v6418_v39 = vpop.f32.mrf.mxu1 }
0x3a31   :  { %v5681_v51 = vadd.f32 %v7883_v24, %v5608_v16 }
0x3a33   :  { %v5682_v44 = vadd.f32 %v7638_v33, %v5681_v51 }
0x3a35   :  { %6655 = vtanh.f32 %v5682_v44  ;;  %v5895_v62 = vmul.f32 -1.442695, %v5682_v44 }
0x3a37   :  { %6657 = vpow2.f32 %v5895_v62 }
0x3a42   :  { %v6656_v48 = vpop.eup %6655 }
0x3a43   :  { %5692 = vrot.lane.b32.xlu0 %v6656_v48, %s6925_s7  ;;  %v4379_v48 = vadd.f32 %v7929_v32, %v7794_v45 }
0x3a44   :  { %v6658_v50 = vpop.eup %6657 }
0x3a45   :  { %v5686_v11 = vadd.f32 1.0, %v6658_v50 }
0x3a47   :  { %6659 = vrcp.f32 %v5686_v11 }
0x3a54   :  { %v6660_v0 = vpop.eup %6659 }
0x3a55   :  { %v5690_v46 = vmul.f32 %v6660_v0, %v7851_v30  ;;  %v883_v30 = vsel %vm882_vm7, %v879_v4, -inf }
0x3ab5   :  { %v5693_v5 = vpop.permute.xlu0 %5692 }
0x3ab6   :  { %v5695_v61 = vmul.f32 %v6660_v0, %v5693_v5 }
0x3ab8   :  { %5697 = vrot.lane.b32.xlu0 %v5695_v61, %s6926_s8 }
0x3b2a   :  { %v5698_v7 = vpop.permute.xlu0 %5697 }
0x3b2b   :  { %v5700_v24 = vadd.f32 %v5698_v7, %v5690_v46 }
0x3b2d   :  { %6661 = vtanh.f32 %v5700_v24 }
0x3b3a   :  { %v6662_v33 = vpop.eup %6661 }
0x3b3b   :  { %5703 = vrot.lane.b32.xlu0 %v6662_v33, %s6917_s21 }
0x3bad   :  { %v5704_v18 = vpop.permute.xlu0 %5703 }
0x3bae   :  { %v5706_v13 = vmul.f32 %v6660_v0, %v5704_v18  ;;  %v4382_v0 = vsel %vm882_vm7, %v4379_v48, -inf }
0x3bb0   :  { %5708 = vrot.lane.b32.xlu0 %v5706_v13, %s6927_s29 }
0x3bcf   :  { %884 = vmax.xlane.f32.xlu0 %v883_v30 }
0x3c22   :  { %v5709_v57 = vpop.permute.xlu0 %5708 }
0x3c23   :  { %6431 = vmatmul.mubr.msk.f32.vlgmr.msra.gmra.mxu1 %vm165_vm1, %v5709_v57 }
0x3c58   :  { %v885_v23 = vpop.xlane.xlu0 %884 }
0x3c59   :  { %v886_v26 = vsub.f32 %v879_v4, %v885_v23 }
0x3c5b   :  { %v887_v14 = vmul.f32 1.442695, %v886_v26 }
0x3c5d   :  { %6663 = vpow2.f32 %v887_v14 }
0x3c6a   :  { %v6664_v27 = vpop.eup %6663 }
0x3c6b   :  { %v889_v15 = vsel %vm882_vm7, %v6664_v27, 0.0 }
0x3c6c   :  { %890 = vadd.xlane.f32.xlu1 %v889_v15 }
0x3c70   :  { %1583 = vmax.xlane.f32.xlu1 %v1582_v36 }
0x3ce3   :  { %v5778_v29 = vpop.f32.mrf.mxu1 }
0x3ce4   :  { %v5779_v11 = vadd.f32 %v7929_v32, %v5778_v29 }
0x3ce5   :  { %v6432_v56 = vpop.f32.mrf.mxu1 }
0x3ce6   :  { %v5782_v46 = vsel %vm882_vm7, %v5779_v11, -inf }
0x3cf5   :  { %v891_v34 = vpop.xlane.xlu1 %890 }
0x3cf6   :  { %6665 = vrcp.f32 %v891_v34 }
0x3cf9   :  { %v1584_v37 = vpop.xlane.xlu1 %1583 }
0x3cfa   :  { %v1585_v42 = vsub.f32 %v1579_v9, %v1584_v37 }
0x3cfc   :  { %v1586_v43 = vmul.f32 1.442695, %v1585_v42 }
0x3cfe   :  { %6667 = vpow2.f32 %v1586_v43 }
0x3d03   :  { %v6666_v2 = vpop.eup %6665 }
0x3d04   :  { %v893_v25 = vmul.f32 %v6666_v2, %v6664_v27 }
0x3d06   :  { %894 = vst.msk [vmem:[#allocation16] sm:$0x3] %vm882_vm7, %v893_v25 }
0x3d0b   :  { %v6668_v8 = vpop.eup %6667 }
0x3d0c   :  { %v1588_v38 = vsel %vm882_vm7, %v6668_v8, 0.0 }
0x3d0d   :  { %1589 = vadd.xlane.f32.xlu1 %v1588_v38 }
0x3d11   :  { %2283 = vmax.xlane.f32.xlu1 %v2282_v55 }
0x3d96   :  { %v1590_v21 = vpop.xlane.xlu1 %1589 }
0x3d97   :  { %6669 = vrcp.f32 %v1590_v21 }
0x3d9a   :  { %v2284_v47 = vpop.xlane.xlu1 %2283 }
0x3d9b   :  { %v2285_v12 = vsub.f32 %v2279_v1, %v2284_v47 }
0x3d9d   :  { %v2286_v28 = vmul.f32 1.442695, %v2285_v12 }
0x3d9f   :  { %6671 = vpow2.f32 %v2286_v28 }
0x3da4   :  { %v6670_v49 = vpop.eup %6669 }
0x3da5   :  { %v1592_v52 = vmul.f32 %v6670_v49, %v6668_v8 }
0x3da7   :  { %1594 = vst.msk [vmem:[#allocation16 + $0x2] sm:$0x3] %vm882_vm7, %v1592_v52 }
0x3dac   :  { %v6672_v53 = vpop.eup %6671 }
0x3dad   :  { %v2288_v20 = vsel %vm882_vm7, %v6672_v53, 0.0 }
0x3dae   :  { %2289 = vadd.xlane.f32.xlu1 %v2288_v20 }
0x3db2   :  { %2983 = vmax.xlane.f32.xlu1 %v2982_v58 }
0x3db6   :  { %3683 = vmax.xlane.f32.xlu1 %v3682_v60 }
0x3dba   :  { %5083 = vmax.xlane.f32.xlu1 %v5082_v31 }
0x3e37   :  { %v2290_v63 = vpop.xlane.xlu1 %2289 }
0x3e38   :  { %6673 = vrcp.f32 %v2290_v63 }
0x3e3b   :  { %v2984_v40 = vpop.xlane.xlu1 %2983 }
0x3e3c   :  { %v2985_v10 = vsub.f32 %v2979_v22, %v2984_v40 }
0x3e3e   :  { %v2986_v3 = vmul.f32 1.442695, %v2985_v10 }
0x3e3f   :  { %v3684_v35 = vpop.xlane.xlu1 %3683 }
0x3e40   :  { %6675 = vpow2.f32 %v2986_v3  ;;  %v3685_v19 = vsub.f32 %v3679_v17, %v3684_v35 }
0x3e42   :  { %v3686_v6 = vmul.f32 1.442695, %v3685_v19 }
0x3e43   :  { %v5084_v59 = vpop.xlane.xlu1 %5083 }
0x3e44   :  { %6677 = vpow2.f32 %v3686_v6  ;;  %v5085_v16 = vsub.f32 %v5079_v41, %v5084_v59 }
0x3e45   :  { %v6674_v39 = vpop.eup %6673 }
0x3e46   :  { %v2292_v54 = vmul.f32 %v6674_v39, %v6672_v53  ;;  %v5086_v51 = vmul.f32 1.442695, %v5085_v16 }
0x3e48   :  { %2294 = vst.msk [vmem:[#allocation16 + $0x4] sm:$0x3] %vm882_vm7, %v2292_v54  ;;  %6679 = vpow2.f32 %v5086_v51 }
0x3e4d   :  { %v6676_v44 = vpop.eup %6675 }
0x3e4e   :  { %v2988_v62 = vsel %vm882_vm7, %v6676_v44, 0.0 }
0x3e4f   :  { %2989 = vadd.xlane.f32.xlu0 %v2988_v62 }
0x3e51   :  { %v6678_v50 = vpop.eup %6677 }
0x3e52   :  { %v3688_v5 = vsel %vm882_vm7, %v6678_v50, 0.0 }
0x3e53   :  { %4383 = vmax.xlane.f32.xlu0 %v4382_v0  ;;  %3689 = vadd.xlane.f32.xlu1 %v3688_v5 }
0x3e55   :  { %v6680_v61 = vpop.eup %6679 }
0x3e56   :  { %v5088_v7 = vsel %vm882_vm7, %v6680_v61, 0.0 }
0x3e57   :  { %5783 = vmax.xlane.f32.xlu0 %v5782_v46  ;;  %5089 = vadd.xlane.f32.xlu1 %v5088_v7 }
0x3ed8   :  { %v2990_v45 = vpop.xlane.xlu0 %2989 }
0x3ed9   :  { %6681 = vrcp.f32 %v2990_v45 }
0x3edc   :  { %v4384_v24 = vpop.xlane.xlu0 %4383  ;;  %v3690_v33 = vpop.xlane.xlu1 %3689 }
0x3edd   :  { %v4385_v18 = vsub.f32 %v4379_v48, %v4384_v24  ;;  %6683 = vrcp.f32 %v3690_v33 }
0x3edf   :  { %v4386_v13 = vmul.f32 1.442695, %v4385_v18 }
0x3ee0   :  { %v5784_v32 = vpop.xlane.xlu0 %5783  ;;  %v5090_v4 = vpop.xlane.xlu1 %5089 }
0x3ee1   :  { %6685 = vpow2.f32 %v4386_v13  ;;  %v5785_v30 = vsub.f32 %v5779_v11, %v5784_v32 }
0x3ee2   :  { %6687 = vrcp.f32 %v5090_v4 }
0x3ee3   :  { %v5786_v57 = vmul.f32 1.442695, %v5785_v30 }
0x3ee5   :  { %6689 = vpow2.f32 %v5786_v57 }
0x3ee6   :  { %v6682_v23 = vpop.eup %6681 }
0x3ee7   :  { %v2992_v26 = vmul.f32 %v6682_v23, %v6676_v44 }
0x3ee9   :  { %2994 = vst.msk [vmem:[#allocation16 + $0x6] sm:$0x3] %vm882_vm7, %v2992_v26 }
0x3eea   :  { %v6684_v14 = vpop.eup %6683 }
0x3eeb   :  { %v3692_v27 = vmul.f32 %v6684_v14, %v6678_v50 }
0x3eed   :  { %3694 = vst.msk [vmem:[#allocation16 + $0x8] sm:$0x3] %vm882_vm7, %v3692_v27 }
0x3eee   :  { %v6686_v9 = vpop.eup %6685 }
0x3eef   :  { %v6688_v15 = vpop.eup %6687  ;;  %v4388_v36 = vsel %vm882_vm7, %v6686_v9, 0.0 }
0x3ef0   :  { %v5092_v29 = vmul.f32 %v6688_v15, %v6680_v61  ;;  %4389 = vadd.xlane.f32.xlu0 %v4388_v36 }
0x3ef2   :  { %v6690_v56 = vpop.eup %6689  ;;  %5094 = vst.msk [vmem:[#allocation16 + $0xc] sm:$0x3] %vm882_vm7, %v5092_v29 }
0x3ef3   :  { %v5788_v34 = vsel %vm882_vm7, %v6690_v56, 0.0 }
0x3ef4   :  { %5789 = vadd.xlane.f32.xlu0 %v5788_v34 }
0x3f79   :  { %v4390_v37 = vpop.xlane.xlu0 %4389 }
0x3f7a   :  { %6691 = vrcp.f32 %v4390_v37 }
0x3f7d   :  { %v5790_v42 = vpop.xlane.xlu0 %5789 }
0x3f7e   :  { %6693 = vrcp.f32 %v5790_v42 }
0x3f87   :  { %v6692_v43 = vpop.eup %6691 }
0x3f88   :  { %v4392_v2 = vmul.f32 %v6692_v43, %v6686_v9 }
0x3f8a   :  { %4394 = vst.msk [vmem:[#allocation16 + $0xa] sm:$0x3] %vm882_vm7, %v4392_v2 }
0x3f8b   :  { %v6694_v25 = vpop.eup %6693 }
0x3f8c   :  { %v5792_v8 = vmul.f32 %v6694_v25, %v6690_v56 }
0x3f8e   :  { %5794 = vst.msk [vmem:[#allocation16 + $0xe] sm:$0x3] %vm882_vm7, %v5792_v8 }
0x3f8f   :  { %6890 = shalt.err (!%p6887_p2)
}
0x3f90   :  { %5806 = dma.vmem_to_hbm [thread:$0]  %s5801_s3, 256, %s7989_s12, [#allocation4], %s6917_s21, %s6917_s21, %s6918_s22  }
0x3f91   :  { %6909 = dma.done.wait [#allocation4], 256  }
0x3f92   :  { %6910 = vsyncadd [#allocation4], 4294967040 }
0x3f93   :  { %5810 = vsyncpa [#allocation3], 1 }
0x3f94   :  { %5811 = vsyncpa [#allocation6], 1 }
0x3f95   :  { %5812 = vsyncpa [#allocation9], 1 }
0x3f96   :  { %5813 = vsyncpa [#allocation12], 1 }
0x3f97   :  { %5814 = vsyncpa [#allocation15], 1 }
0x3f98   :  { %5815 = vsyncpa [#allocation4], 1 }

</bundles_post_ra>
